<compile_context>
chip_gen: v6e
topology: v6e:2x2x1
jax: 0.10.0
libtpu: 0.0.40
codegen_flags: <defaults>
</compile_context>

<pallas_src>
import math

import numpy as np
import jax
import jax.numpy as jnp
from jax.experimental import pallas as pl
from jax.experimental.pallas import tpu as pltpu

# ---- problem sizes (small, consistent with the module) ---------------------
B = 2              # batch
E = 32             # dim_embed
L = 16             # sequence length
N_HEADS = 4
HEAD_DIM = E // N_HEADS
HIDDEN = 64        # FF hidden_dim
N_LAYERS = 2       # SelfAttention n_layers
EPS = 1e-5         # InstanceNorm1d default eps

BL = B * L          # 32: rows of the flattened activations
HBL = N_HEADS * BL  # 128: block-diagonal attention width (one full lane tile)
NEG = -1e9          # additive mask value for cross-batch score columns

# column layout of the per-layer weight slab [E, 3*128]; every block starts at
# a 128-lane boundary so slices feed the MXU without lane rotation.
_QKV_COL = 0          # [:, 0:3E]           fused Wq|Wk|Wv (scale folded into Wq)
_WO_COL = 128         # [:, 128:128+E]      attention output projection
_W1_COL = 256         # [:, 256:256+HIDDEN] FF first conv1x1
# row layout of the per-layer vector slab [8, 128]
_ROW_BQKV, _ROW_BO, _ROW_B1, _ROW_G1, _ROW_BE1, _ROW_G2, _ROW_BE2 = range(7)
# row layout of the shared mask slab [2E + HBL, 128]
_KMASK_ROW = 0            # rows [0, E)        : K-side 0/1 channel mask [E, HBL]
_SMASK_ROW = E            # rows [E, 2E)       : additive cross-batch mask [BL, HBL]
_VMASK_ROW = 2 * E        # rows [2E, 2E+HBL)  : V-side 0/1 channel mask  [HBL, E]


def _instance_norm(z, gamma, beta):
    """InstanceNorm1d over the sequence (L) axis, per batch and channel.

    z: [B*L, E] with batch-major rows (no rank-change reshape: two static
    sublane-aligned row slices). gamma/beta: [1, E].
    """
    parts = []
    for b in range(B):                                       # static unroll
        zb = z[b * L:(b + 1) * L, :]                         # [L, E]
        mu = jnp.mean(zb, axis=0, keepdims=True)
        d = zb - mu
        var = jnp.mean(d * d, axis=0, keepdims=True)         # biased variance
        parts.append(d * jax.lax.rsqrt(var + EPS))
    return jnp.concatenate(parts, axis=0) * gamma + beta


def sa_kernel(x_ref, wslab_ref, w2_ref, vec_ref, mask_ref, out_ref):
    x = x_ref[...]                                           # [B*L, E]

    for layer in range(N_LAYERS):                            # static unroll
        wslab = wslab_ref[layer]                             # [E, 384]
        w2 = w2_ref[layer]                                   # [HIDDEN, E]
        vec = vec_ref[layer]                                 # [8, 128]

        w_qkv = wslab[:, _QKV_COL:_QKV_COL + 3 * E]          # [E, 3E]
        w_o = wslab[:, _WO_COL:_WO_COL + E]                  # [E, E]
        w_1 = wslab[:, _W1_COL:_W1_COL + HIDDEN]             # [E, HIDDEN]

        b_qkv = vec[_ROW_BQKV:_ROW_BQKV + 1, 0:3 * E]        # [1, 3E]
        b_o = vec[_ROW_BO:_ROW_BO + 1, 0:E]
        b_1 = vec[_ROW_B1:_ROW_B1 + 1, 0:HIDDEN]
        g1 = vec[_ROW_G1:_ROW_G1 + 1, 0:E]
        be1 = vec[_ROW_BE1:_ROW_BE1 + 1, 0:E]
        g2 = vec[_ROW_G2:_ROW_G2 + 1, 0:E]
        be2 = vec[_ROW_BE2:_ROW_BE2 + 1, 0:E]

        # ---- fused QKV projection (1/sqrt(hd) already folded into Q part) --
        qkv = jnp.dot(x, w_qkv, preferred_element_type=jnp.float32) + b_qkv
        q = qkv[:, 0:E]                                      # [B*L, E]
        k = qkv[:, E:2 * E]
        v = qkv[:, 2 * E:3 * E]

        # ---- block-diagonal attention: 2 MXU matmuls for all heads+batches -
        # K_bd[e, h*BL + j] = k[j, e] if channel e belongs to head h, else 0
        kT = k.T                                             # [E, B*L]
        k_bd = (jnp.concatenate([kT, kT, kT, kT], axis=1)
                * mask_ref[_KMASK_ROW:_KMASK_ROW + E, :])    # [E, HBL]
        s = jnp.dot(q, k_bd, preferred_element_type=jnp.float32)   # [B*L, HBL]
        # additive -1e9 on cross-batch columns -> they vanish in the softmax
        s = s + mask_ref[_SMASK_ROW:_SMASK_ROW + BL, :]

        # per-(head, batch-row) softmax over 4 x 32-lane column blocks
        p_blocks = []
        for h in range(N_HEADS):                             # static unroll
            sh = s[:, h * BL:(h + 1) * BL]                   # [B*L, B*L]
            mh = jnp.max(sh, axis=-1, keepdims=True)
            ph = jnp.exp(sh - mh)                            # masked cols -> 0
            dh = jnp.sum(ph, axis=-1, keepdims=True)
            inv = pl.reciprocal(dh, approx=True)             # EUP slot
            inv = inv * (2.0 - dh * inv)                     # Newton polish
            p_blocks.append(ph * inv)
        p = jnp.concatenate(p_blocks, axis=-1)               # [B*L, HBL]

        # V_bd[h*BL + j, e] = v[j, e] if channel e belongs to head h, else 0
        v_bd = (jnp.concatenate([v, v, v, v], axis=0)
                * mask_ref[_VMASK_ROW:_VMASK_ROW + HBL, 0:E])  # [HBL, E]
        attn = jnp.dot(p, v_bd, preferred_element_type=jnp.float32)  # [B*L, E]

        y = jnp.dot(attn, w_o, preferred_element_type=jnp.float32) + b_o
        h_mha = _instance_norm(x + y, g1, be1)               # [B*L, E]

        # ---- feed-forward (1x1 convs == per-position linears) --------------
        h1 = jnp.dot(h_mha, w_1, preferred_element_type=jnp.float32) + b_1
        h1 = jnp.maximum(h1, 0.0)
        ff = jnp.dot(h1, w2, preferred_element_type=jnp.float32)
        x = _instance_norm(h_mha + ff, g2, be2)

    out_ref[...] = x                                         # flat [B*L, E]


def _sa_pallas(x_flat, w_slab, w2_stack, vec_slab, mask_slab):
    return pl.pallas_call(
        sa_kernel,
        out_shape=jax.ShapeDtypeStruct((BL, E), jnp.float32),
        grid_spec=pltpu.PrefetchScalarGridSpec(
            num_scalar_prefetch=0,
            # Whole problem in one step: at these toy sizes per-step overhead
            # dominates (~130 KB resident, no tiling needed).  For large B,
            # switch to a leading ("parallel",) batch axis so v7x's second
            # TensorCore gets work.
            grid=(1,),
            in_specs=[
                pl.BlockSpec((BL, E), lambda i: (0, 0)),
                pl.BlockSpec((N_LAYERS, E, 3 * 128), lambda i: (0, 0, 0)),
                pl.BlockSpec((N_LAYERS, HIDDEN, E), lambda i: (0, 0, 0)),
                pl.BlockSpec((N_LAYERS, 8, 128), lambda i: (0, 0, 0)),
                pl.BlockSpec((2 * E + HBL, 128), lambda i: (0, 0)),
            ],
            out_specs=pl.BlockSpec((BL, E), lambda i: (0, 0)),
        ),
        compiler_params=pltpu.CompilerParams(
            dimension_semantics=("arbitrary",)),
    )(x_flat, w_slab, w2_stack, vec_slab, mask_slab)


@jax.jit
def self_attention_forward(x, w_slab, w2_stack, vec_slab, mask_slab):
    """x: [B, dim_embed, L] (PyTorch NCL). Returns [B, dim_embed, L]."""
    # NCL <-> flat NLC handled here (fused by XLA); the kernel itself only
    # ever sees the lane-dense [B*L, E] layout it computes in.
    x_flat = jnp.transpose(x, (0, 2, 1)).reshape(BL, E)
    out_flat = _sa_pallas(x_flat, w_slab, w2_stack, vec_slab, mask_slab)
    return jnp.transpose(out_flat.reshape(B, L, E), (0, 2, 1))


def make_layer_params(key):
    ks = jax.random.split(key, 15)
    s = 0.1
    return {
        "wq": s * jax.random.normal(ks[0], (E, E), jnp.float32),
        "wk": s * jax.random.normal(ks[1], (E, E), jnp.float32),
        "wv": s * jax.random.normal(ks[2], (E, E), jnp.float32),
        "bq": s * jax.random.normal(ks[3], (E,), jnp.float32),
        "bk": s * jax.random.normal(ks[4], (E,), jnp.float32),
        "bv": s * jax.random.normal(ks[5], (E,), jnp.float32),
        "wo": s * jax.random.normal(ks[6], (E, E), jnp.float32),
        "bo": s * jax.random.normal(ks[7], (E,), jnp.float32),
        "w1": s * jax.random.normal(ks[8], (E, HIDDEN), jnp.float32),
        "b1": s * jax.random.normal(ks[9], (HIDDEN,), jnp.float32),
        "w2": s * jax.random.normal(ks[10], (HIDDEN, E), jnp.float32),
        # InstanceNorm1d(affine=True) init is weight=1 / bias=0; use perturbed
        # values so the affine path is genuinely exercised by the parity check.
        "g1": 1.0 + s * jax.random.normal(ks[11], (E,), jnp.float32),
        "be1": s * jax.random.normal(ks[12], (E,), jnp.float32),
        "g2": 1.0 + s * jax.random.normal(ks[13], (E,), jnp.float32),
        "be2": s * jax.random.normal(ks[14], (E,), jnp.float32),
    }


def pack_params(layer_params):
    """Pack per-layer params into 3 stacked slabs; fold the attention scale
    into Wq/bq here (once, outside the jitted forward)."""
    scale = 1.0 / math.sqrt(HEAD_DIM)
    w_slabs, w2s, vecs = [], [], []
    for p in layer_params:
        wqkv = jnp.concatenate([p["wq"] * scale, p["wk"], p["wv"]], axis=1)
        slab = jnp.zeros((E, 3 * 128), jnp.float32)
        slab = slab.at[:, _QKV_COL:_QKV_COL + 3 * E].set(wqkv)
        slab = slab.at[:, _WO_COL:_WO_COL + E].set(p["wo"])
        slab = slab.at[:, _W1_COL:_W1_COL + HIDDEN].set(p["w1"])
        w_slabs.append(slab)
        w2s.append(p["w2"])
        vec = jnp.zeros((8, 128), jnp.float32)
        vec = vec.at[_ROW_BQKV, 0:3 * E].set(
            jnp.concatenate([p["bq"] * scale, p["bk"], p["bv"]]))
        vec = vec.at[_ROW_BO, 0:E].set(p["bo"])
        vec = vec.at[_ROW_B1, 0:HIDDEN].set(p["b1"])
        vec = vec.at[_ROW_G1, 0:E].set(p["g1"])
        vec = vec.at[_ROW_BE1, 0:E].set(p["be1"])
        vec = vec.at[_ROW_G2, 0:E].set(p["g2"])
        vec = vec.at[_ROW_BE2, 0:E].set(p["be2"])
        vecs.append(vec)
    return jnp.stack(w_slabs), jnp.stack(w2s), jnp.stack(vecs)


def make_mask_slab():
    """Precomputed block-diagonal helper masks, packed into one [192,128] slab.

    K-mask  [E, HBL]  : 1 where channel e belongs to the head of the column.
    S-mask  [BL, HBL] : 0 where the column's batch matches the row's batch,
                        -1e9 otherwise (kills cross-batch score columns).
    V-mask  [HBL, E]  : 1 where channel e belongs to the head of the row.
    """
    e = np.arange(E)
    col = np.arange(HBL)
    kmask = (e[:, None] // HEAD_DIM == col[None, :] // BL).astype(np.float32)
    r = np.arange(BL)
    smask = np.where((col[None, :] % BL) // L == r[:, None] // L,
                     0.0, NEG).astype(np.float32)
    row = np.arange(HBL)
    vmask = (e[None, :] // HEAD_DIM == row[:, None] // BL).astype(np.float32)
    slab = np.zeros((2 * E + HBL, 128), np.float32)
    slab[_KMASK_ROW:_KMASK_ROW + E, :] = kmask
    slab[_SMASK_ROW:_SMASK_ROW + BL, :] = smask
    slab[_VMASK_ROW:_VMASK_ROW + HBL, 0:E] = vmask
    return jnp.asarray(slab)


def reference_forward(x, layer_params):
    """Pure-JAX reference mirroring the PyTorch module (eval mode)."""
    xt = jnp.transpose(x, (0, 2, 1))                         # [B, L, E]
    for p in layer_params:
        q = xt @ p["wq"] + p["bq"]
        k = xt @ p["wk"] + p["bk"]
        v = xt @ p["wv"] + p["bv"]

        def split(t):                                        # [B,L,E]->[B,H,L,hd]
            return jnp.transpose(t.reshape(B, L, N_HEADS, HEAD_DIM), (0, 2, 1, 3))

        qh, kh, vh = split(q), split(k), split(v)
        s = jnp.einsum("bhld,bhmd->bhlm", qh, kh) / math.sqrt(HEAD_DIM)
        a = jax.nn.softmax(s, axis=-1)
        o = jnp.einsum("bhlm,bhmd->bhld", a, vh)
        o = jnp.transpose(o, (0, 2, 1, 3)).reshape(B, L, E)
        y = o @ p["wo"] + p["bo"]

        def inorm(z, g, be):
            mu = jnp.mean(z, axis=1, keepdims=True)
            var = jnp.mean((z - mu) ** 2, axis=1, keepdims=True)
            return (z - mu) / jnp.sqrt(var + EPS) * g + be

        h_mha = inorm(xt + y, p["g1"], p["be1"])
        h1 = jnp.maximum(h_mha @ p["w1"] + p["b1"], 0.0)
        ff = h1 @ p["w2"]
        xt = inorm(h_mha + ff, p["g2"], p["be2"])
    return jnp.transpose(xt, (0, 2, 1))                      # [B, E, L]


if __name__ == "__main__":
    key = jax.random.PRNGKey(0)
    kx, kp = jax.random.split(key)
    x = jax.random.normal(kx, (B, E, L), jnp.float32)        # [b, dim_embed, L]
    layer_params = [make_layer_params(k) for k in jax.random.split(kp, N_LAYERS)]
    w_slab, w2_stack, vec_slab = pack_params(layer_params)
    mask_slab = make_mask_slab()

    out = self_attention_forward(x, w_slab, w2_stack, vec_slab, mask_slab)
    out = jax.block_until_ready(out)

    ref = reference_forward(x, layer_params)
    assert out.shape == (B, E, L)
    max_err = float(jnp.max(jnp.abs(out - ref)))
    assert jnp.allclose(out, ref, atol=1e-4, rtol=1e-4), max_err

    # TODO(synk): dropout inside nn.MultiheadAttention is an inference no-op
    # (eval mode), so it is intentionally not modeled in the kernel.
    print("KERNEL_OK")
</pallas_src>

<mosaic_0001>
module attributes {stable_mosaic.version = 11 : i64} {
  func.func @sa_kernel(%arg0: i32, %arg1: memref<32x32xf32, #tpu.memory_space<vmem>>, %arg2: memref<2x32x384xf32, #tpu.memory_space<vmem>>, %arg3: memref<2x64x32xf32, #tpu.memory_space<vmem>>, %arg4: memref<2x8x128xf32, #tpu.memory_space<vmem>>, %arg5: memref<192x128xf32, #tpu.memory_space<vmem>>, %arg6: memref<32x32xf32, #tpu.memory_space<vmem>>) attributes {dimension_semantics = [#tpu.dimension_semantics<arbitrary>], iteration_bounds = array<i64: 1>, scalar_prefetch = 0 : i64, scratch_operands = 0 : i64, tpu.core_type = #tpu.core_type<tc>, window_params = [{pipeline_mode = #tpu.pipeline_mode<synchronous>, transform_indices = @transform_0, window_bounds = array<i64: 32, 32>}, {pipeline_mode = #tpu.pipeline_mode<synchronous>, transform_indices = @transform_1, window_bounds = array<i64: 2, 32, 384>}, {pipeline_mode = #tpu.pipeline_mode<synchronous>, transform_indices = @transform_2, window_bounds = array<i64: 2, 64, 32>}, {pipeline_mode = #tpu.pipeline_mode<synchronous>, transform_indices = @transform_3, window_bounds = array<i64: 2, 8, 128>}, {pipeline_mode = #tpu.pipeline_mode<synchronous>, transform_indices = @transform_4, window_bounds = array<i64: 192, 128>}, {pipeline_mode = #tpu.pipeline_mode<synchronous>, transform_indices = @transform_5, window_bounds = array<i64: 32, 32>}]} {
    %c0 = arith.constant 0 : index
    %c0_0 = arith.constant 0 : index
    %0 = vector.load %arg1[%c0, %c0_0] : memref<32x32xf32, #tpu.memory_space<vmem>>, vector<32x32xf32>
    %c0_1 = arith.constant 0 : index
    %c0_2 = arith.constant 0 : index
    %c0_3 = arith.constant 0 : index
    %1 = vector.load %arg2[%c0_1, %c0_2, %c0_3] : memref<2x32x384xf32, #tpu.memory_space<vmem>>, vector<1x32x384xf32>
    %2 = vector.shape_cast %1 : vector<1x32x384xf32> to vector<32x384xf32>
    %c0_4 = arith.constant 0 : index
    %c0_5 = arith.constant 0 : index
    %c0_6 = arith.constant 0 : index
    %3 = vector.load %arg3[%c0_4, %c0_5, %c0_6] : memref<2x64x32xf32, #tpu.memory_space<vmem>>, vector<1x64x32xf32>
    %4 = vector.shape_cast %3 : vector<1x64x32xf32> to vector<64x32xf32>
    %c0_7 = arith.constant 0 : index
    %c0_8 = arith.constant 0 : index
    %c0_9 = arith.constant 0 : index
    %5 = vector.load %arg4[%c0_7, %c0_8, %c0_9] : memref<2x8x128xf32, #tpu.memory_space<vmem>>, vector<1x8x128xf32>
    %6 = vector.shape_cast %5 : vector<1x8x128xf32> to vector<8x128xf32>
    %7 = vector.extract_strided_slice %2 {offsets = [0, 0], sizes = [32, 96], strides = [1, 1]} : vector<32x384xf32> to vector<32x96xf32>
    %8 = vector.extract_strided_slice %2 {offsets = [0, 128], sizes = [32, 32], strides = [1, 1]} : vector<32x384xf32> to vector<32x32xf32>
    %9 = vector.extract_strided_slice %2 {offsets = [0, 256], sizes = [32, 64], strides = [1, 1]} : vector<32x384xf32> to vector<32x64xf32>
    %10 = vector.extract_strided_slice %6 {offsets = [0, 0], sizes = [1, 96], strides = [1, 1]} : vector<8x128xf32> to vector<1x96xf32>
    %11 = vector.extract_strided_slice %6 {offsets = [1, 0], sizes = [1, 32], strides = [1, 1]} : vector<8x128xf32> to vector<1x32xf32>
    %12 = vector.extract_strided_slice %6 {offsets = [2, 0], sizes = [1, 64], strides = [1, 1]} : vector<8x128xf32> to vector<1x64xf32>
    %13 = vector.extract_strided_slice %6 {offsets = [3, 0], sizes = [1, 32], strides = [1, 1]} : vector<8x128xf32> to vector<1x32xf32>
    %14 = vector.extract_strided_slice %6 {offsets = [4, 0], sizes = [1, 32], strides = [1, 1]} : vector<8x128xf32> to vector<1x32xf32>
    %15 = vector.extract_strided_slice %6 {offsets = [5, 0], sizes = [1, 32], strides = [1, 1]} : vector<8x128xf32> to vector<1x32xf32>
    %16 = vector.extract_strided_slice %6 {offsets = [6, 0], sizes = [1, 32], strides = [1, 1]} : vector<8x128xf32> to vector<1x32xf32>
    %cst = arith.constant dense<0.000000e+00> : vector<32x96xf32>
    %17 = tpu.matmul %0, %7, %cst {dimension_numbers = #tpu.dot_dimension_numbers<[1], [0], [0], [1], [0, 0, 1, 1], [], []>} : vector<32x32xf32>, vector<32x96xf32>, vector<32x96xf32> -> vector<32x96xf32>
    %18 = vector.broadcast %10 : vector<1x96xf32> to vector<32x96xf32>
    %19 = arith.addf %17, %18 : vector<32x96xf32>
    %20 = vector.extract_strided_slice %19 {offsets = [0, 0], sizes = [32, 32], strides = [1, 1]} : vector<32x96xf32> to vector<32x32xf32>
    %21 = vector.extract_strided_slice %19 {offsets = [0, 32], sizes = [32, 32], strides = [1, 1]} : vector<32x96xf32> to vector<32x32xf32>
    %22 = vector.extract_strided_slice %19 {offsets = [0, 64], sizes = [32, 32], strides = [1, 1]} : vector<32x96xf32> to vector<32x32xf32>
    %23 = tpu.transpose %21, [1, 0] : vector<32x32xf32> -> vector<32x32xf32>
    %24 = tpu.concatenate %23, %23, %23, %23 in 1 : vector<32x32xf32>, vector<32x32xf32>, vector<32x32xf32>, vector<32x32xf32> -> vector<32x128xf32>
    %c0_10 = arith.constant 0 : index
    %c0_11 = arith.constant 0 : index
    %25 = vector.load %arg5[%c0_10, %c0_11] : memref<192x128xf32, #tpu.memory_space<vmem>>, vector<32x128xf32>
    %26 = arith.mulf %24, %25 : vector<32x128xf32>
    %cst_12 = arith.constant dense<0.000000e+00> : vector<32x128xf32>
    %27 = tpu.matmul %20, %26, %cst_12 {dimension_numbers = #tpu.dot_dimension_numbers<[1], [0], [0], [1], [0, 0, 1, 1], [], []>} : vector<32x32xf32>, vector<32x128xf32>, vector<32x128xf32> -> vector<32x128xf32>
    %c32 = arith.constant 32 : index
    %c0_13 = arith.constant 0 : index
    %28 = vector.load %arg5[%c32, %c0_13] : memref<192x128xf32, #tpu.memory_space<vmem>>, vector<32x128xf32>
    %29 = arith.addf %27, %28 : vector<32x128xf32>
    %30 = vector.extract_strided_slice %29 {offsets = [0, 0], sizes = [32, 32], strides = [1, 1]} : vector<32x128xf32> to vector<32x32xf32>
    %cst_14 = arith.constant dense<0xFF800000> : vector<32xf32>
    %31 = vector.multi_reduction <maximumf>, %30, %cst_14 [1] : vector<32x32xf32> to vector<32xf32>
    %32 = vector.shape_cast %31 : vector<32xf32> to vector<32x1xf32>
    %33 = vector.broadcast %32 : vector<32x1xf32> to vector<32x32xf32>
    %34 = arith.subf %30, %33 : vector<32x32xf32>
    %35 = math.exp %34 : vector<32x32xf32>
    %cst_15 = arith.constant dense<0.000000e+00> : vector<32xf32>
    %36 = vector.multi_reduction <add>, %35, %cst_15 [1] : vector<32x32xf32> to vector<32xf32>
    %37 = vector.shape_cast %36 : vector<32xf32> to vector<32x1xf32>
    %38 = tpu.reciprocal %37 {approx = true} : vector<32x1xf32> -> vector<32x1xf32>
    %39 = arith.mulf %37, %38 : vector<32x1xf32>
    %cst_16 = arith.constant 2.000000e+00 : f32
    %40 = vector.broadcast %cst_16 : f32 to vector<32x1xf32>
    %41 = arith.subf %40, %39 : vector<32x1xf32>
    %42 = arith.mulf %38, %41 : vector<32x1xf32>
    %43 = vector.broadcast %42 : vector<32x1xf32> to vector<32x32xf32>
    %44 = arith.mulf %35, %43 : vector<32x32xf32>
    %45 = vector.extract_strided_slice %29 {offsets = [0, 32], sizes = [32, 32], strides = [1, 1]} : vector<32x128xf32> to vector<32x32xf32>
    %cst_17 = arith.constant dense<0xFF800000> : vector<32xf32>
    %46 = vector.multi_reduction <maximumf>, %45, %cst_17 [1] : vector<32x32xf32> to vector<32xf32>
    %47 = vector.shape_cast %46 : vector<32xf32> to vector<32x1xf32>
    %48 = vector.broadcast %47 : vector<32x1xf32> to vector<32x32xf32>
    %49 = arith.subf %45, %48 : vector<32x32xf32>
    %50 = math.exp %49 : vector<32x32xf32>
    %cst_18 = arith.constant dense<0.000000e+00> : vector<32xf32>
    %51 = vector.multi_reduction <add>, %50, %cst_18 [1] : vector<32x32xf32> to vector<32xf32>
    %52 = vector.shape_cast %51 : vector<32xf32> to vector<32x1xf32>
    %53 = tpu.reciprocal %52 {approx = true} : vector<32x1xf32> -> vector<32x1xf32>
    %54 = arith.mulf %52, %53 : vector<32x1xf32>
    %cst_19 = arith.constant 2.000000e+00 : f32
    %55 = vector.broadcast %cst_19 : f32 to vector<32x1xf32>
    %56 = arith.subf %55, %54 : vector<32x1xf32>
    %57 = arith.mulf %53, %56 : vector<32x1xf32>
    %58 = vector.broadcast %57 : vector<32x1xf32> to vector<32x32xf32>
    %59 = arith.mulf %50, %58 : vector<32x32xf32>
    %60 = vector.extract_strided_slice %29 {offsets = [0, 64], sizes = [32, 32], strides = [1, 1]} : vector<32x128xf32> to vector<32x32xf32>
    %cst_20 = arith.constant dense<0xFF800000> : vector<32xf32>
    %61 = vector.multi_reduction <maximumf>, %60, %cst_20 [1] : vector<32x32xf32> to vector<32xf32>
    %62 = vector.shape_cast %61 : vector<32xf32> to vector<32x1xf32>
    %63 = vector.broadcast %62 : vector<32x1xf32> to vector<32x32xf32>
    %64 = arith.subf %60, %63 : vector<32x32xf32>
    %65 = math.exp %64 : vector<32x32xf32>
    %cst_21 = arith.constant dense<0.000000e+00> : vector<32xf32>
    %66 = vector.multi_reduction <add>, %65, %cst_21 [1] : vector<32x32xf32> to vector<32xf32>
    %67 = vector.shape_cast %66 : vector<32xf32> to vector<32x1xf32>
    %68 = tpu.reciprocal %67 {approx = true} : vector<32x1xf32> -> vector<32x1xf32>
    %69 = arith.mulf %67, %68 : vector<32x1xf32>
    %cst_22 = arith.constant 2.000000e+00 : f32
    %70 = vector.broadcast %cst_22 : f32 to vector<32x1xf32>
    %71 = arith.subf %70, %69 : vector<32x1xf32>
    %72 = arith.mulf %68, %71 : vector<32x1xf32>
    %73 = vector.broadcast %72 : vector<32x1xf32> to vector<32x32xf32>
    %74 = arith.mulf %65, %73 : vector<32x32xf32>
    %75 = vector.extract_strided_slice %29 {offsets = [0, 96], sizes = [32, 32], strides = [1, 1]} : vector<32x128xf32> to vector<32x32xf32>
    %cst_23 = arith.constant dense<0xFF800000> : vector<32xf32>
    %76 = vector.multi_reduction <maximumf>, %75, %cst_23 [1] : vector<32x32xf32> to vector<32xf32>
    %77 = vector.shape_cast %76 : vector<32xf32> to vector<32x1xf32>
    %78 = vector.broadcast %77 : vector<32x1xf32> to vector<32x32xf32>
    %79 = arith.subf %75, %78 : vector<32x32xf32>
    %80 = math.exp %79 : vector<32x32xf32>
    %cst_24 = arith.constant dense<0.000000e+00> : vector<32xf32>
    %81 = vector.multi_reduction <add>, %80, %cst_24 [1] : vector<32x32xf32> to vector<32xf32>
    %82 = vector.shape_cast %81 : vector<32xf32> to vector<32x1xf32>
    %83 = tpu.reciprocal %82 {approx = true} : vector<32x1xf32> -> vector<32x1xf32>
    %84 = arith.mulf %82, %83 : vector<32x1xf32>
    %cst_25 = arith.constant 2.000000e+00 : f32
    %85 = vector.broadcast %cst_25 : f32 to vector<32x1xf32>
    %86 = arith.subf %85, %84 : vector<32x1xf32>
    %87 = arith.mulf %83, %86 : vector<32x1xf32>
    %88 = vector.broadcast %87 : vector<32x1xf32> to vector<32x32xf32>
    %89 = arith.mulf %80, %88 : vector<32x32xf32>
    %90 = tpu.concatenate %44, %59, %74, %89 in 1 : vector<32x32xf32>, vector<32x32xf32>, vector<32x32xf32>, vector<32x32xf32> -> vector<32x128xf32>
    %91 = tpu.concatenate %22, %22, %22, %22 in 0 : vector<32x32xf32>, vector<32x32xf32>, vector<32x32xf32>, vector<32x32xf32> -> vector<128x32xf32>
    %c64 = arith.constant 64 : index
    %c0_26 = arith.constant 0 : index
    %92 = vector.load %arg5[%c64, %c0_26] : memref<192x128xf32, #tpu.memory_space<vmem>>, vector<128x32xf32>
    %93 = arith.mulf %91, %92 : vector<128x32xf32>
    %cst_27 = arith.constant dense<0.000000e+00> : vector<32x32xf32>
    %94 = tpu.matmul %90, %93, %cst_27 {dimension_numbers = #tpu.dot_dimension_numbers<[1], [0], [0], [1], [0, 0, 1, 1], [], []>} : vector<32x128xf32>, vector<128x32xf32>, vector<32x32xf32> -> vector<32x32xf32>
    %cst_28 = arith.constant dense<0.000000e+00> : vector<32x32xf32>
    %95 = tpu.matmul %94, %8, %cst_28 {dimension_numbers = #tpu.dot_dimension_numbers<[1], [0], [0], [1], [0, 0, 1, 1], [], []>} : vector<32x32xf32>, vector<32x32xf32>, vector<32x32xf32> -> vector<32x32xf32>
    %96 = vector.broadcast %11 : vector<1x32xf32> to vector<32x32xf32>
    %97 = arith.addf %95, %96 : vector<32x32xf32>
    %98 = arith.addf %0, %97 : vector<32x32xf32>
    %99 = vector.extract_strided_slice %98 {offsets = [0, 0], sizes = [16, 32], strides = [1, 1]} : vector<32x32xf32> to vector<16x32xf32>
    %cst_29 = arith.constant dense<0.000000e+00> : vector<32xf32>
    %100 = vector.multi_reduction <add>, %99, %cst_29 [0] : vector<16x32xf32> to vector<32xf32>
    %101 = vector.shape_cast %100 : vector<32xf32> to vector<1x32xf32>
    %cst_30 = arith.constant 1.600000e+01 : f32
    %102 = vector.broadcast %cst_30 : f32 to vector<1x32xf32>
    %103 = arith.divf %101, %102 : vector<1x32xf32>
    %104 = vector.broadcast %103 : vector<1x32xf32> to vector<16x32xf32>
    %105 = arith.subf %99, %104 : vector<16x32xf32>
    %106 = arith.mulf %105, %105 : vector<16x32xf32>
    %cst_31 = arith.constant dense<0.000000e+00> : vector<32xf32>
    %107 = vector.multi_reduction <add>, %106, %cst_31 [0] : vector<16x32xf32> to vector<32xf32>
    %108 = vector.shape_cast %107 : vector<32xf32> to vector<1x32xf32>
    %cst_32 = arith.constant 1.600000e+01 : f32
    %109 = vector.broadcast %cst_32 : f32 to vector<1x32xf32>
    %110 = arith.divf %108, %109 : vector<1x32xf32>
    %cst_33 = arith.constant 9.99999974E-6 : f32
    %111 = vector.broadcast %cst_33 : f32 to vector<1x32xf32>
    %112 = arith.addf %110, %111 : vector<1x32xf32>
    %113 = math.rsqrt %112 : vector<1x32xf32>
    %114 = vector.broadcast %113 : vector<1x32xf32> to vector<16x32xf32>
    %115 = arith.mulf %105, %114 : vector<16x32xf32>
    %116 = vector.extract_strided_slice %98 {offsets = [16, 0], sizes = [16, 32], strides = [1, 1]} : vector<32x32xf32> to vector<16x32xf32>
    %cst_34 = arith.constant dense<0.000000e+00> : vector<32xf32>
    %117 = vector.multi_reduction <add>, %116, %cst_34 [0] : vector<16x32xf32> to vector<32xf32>
    %118 = vector.shape_cast %117 : vector<32xf32> to vector<1x32xf32>
    %cst_35 = arith.constant 1.600000e+01 : f32
    %119 = vector.broadcast %cst_35 : f32 to vector<1x32xf32>
    %120 = arith.divf %118, %119 : vector<1x32xf32>
    %121 = vector.broadcast %120 : vector<1x32xf32> to vector<16x32xf32>
    %122 = arith.subf %116, %121 : vector<16x32xf32>
    %123 = arith.mulf %122, %122 : vector<16x32xf32>
    %cst_36 = arith.constant dense<0.000000e+00> : vector<32xf32>
    %124 = vector.multi_reduction <add>, %123, %cst_36 [0] : vector<16x32xf32> to vector<32xf32>
    %125 = vector.shape_cast %124 : vector<32xf32> to vector<1x32xf32>
    %cst_37 = arith.constant 1.600000e+01 : f32
    %126 = vector.broadcast %cst_37 : f32 to vector<1x32xf32>
    %127 = arith.divf %125, %126 : vector<1x32xf32>
    %cst_38 = arith.constant 9.99999974E-6 : f32
    %128 = vector.broadcast %cst_38 : f32 to vector<1x32xf32>
    %129 = arith.addf %127, %128 : vector<1x32xf32>
    %130 = math.rsqrt %129 : vector<1x32xf32>
    %131 = vector.broadcast %130 : vector<1x32xf32> to vector<16x32xf32>
    %132 = arith.mulf %122, %131 : vector<16x32xf32>
    %133 = tpu.concatenate %115, %132 in 0 : vector<16x32xf32>, vector<16x32xf32> -> vector<32x32xf32>
    %134 = vector.broadcast %13 : vector<1x32xf32> to vector<32x32xf32>
    %135 = arith.mulf %133, %134 : vector<32x32xf32>
    %136 = vector.broadcast %14 : vector<1x32xf32> to vector<32x32xf32>
    %137 = arith.addf %135, %136 : vector<32x32xf32>
    %cst_39 = arith.constant dense<0.000000e+00> : vector<32x64xf32>
    %138 = tpu.matmul %137, %9, %cst_39 {dimension_numbers = #tpu.dot_dimension_numbers<[1], [0], [0], [1], [0, 0, 1, 1], [], []>} : vector<32x32xf32>, vector<32x64xf32>, vector<32x64xf32> -> vector<32x64xf32>
    %139 = vector.broadcast %12 : vector<1x64xf32> to vector<32x64xf32>
    %140 = arith.addf %138, %139 : vector<32x64xf32>
    %cst_40 = arith.constant 0.000000e+00 : f32
    %141 = vector.broadcast %cst_40 : f32 to vector<32x64xf32>
    %142 = arith.maximumf %140, %141 : vector<32x64xf32>
    %cst_41 = arith.constant dense<0.000000e+00> : vector<32x32xf32>
    %143 = tpu.matmul %142, %4, %cst_41 {dimension_numbers = #tpu.dot_dimension_numbers<[1], [0], [0], [1], [0, 0, 1, 1], [], []>} : vector<32x64xf32>, vector<64x32xf32>, vector<32x32xf32> -> vector<32x32xf32>
    %144 = arith.addf %137, %143 : vector<32x32xf32>
    %145 = vector.extract_strided_slice %144 {offsets = [0, 0], sizes = [16, 32], strides = [1, 1]} : vector<32x32xf32> to vector<16x32xf32>
    %cst_42 = arith.constant dense<0.000000e+00> : vector<32xf32>
    %146 = vector.multi_reduction <add>, %145, %cst_42 [0] : vector<16x32xf32> to vector<32xf32>
    %147 = vector.shape_cast %146 : vector<32xf32> to vector<1x32xf32>
    %cst_43 = arith.constant 1.600000e+01 : f32
    %148 = vector.broadcast %cst_43 : f32 to vector<1x32xf32>
    %149 = arith.divf %147, %148 : vector<1x32xf32>
    %150 = vector.broadcast %149 : vector<1x32xf32> to vector<16x32xf32>
    %151 = arith.subf %145, %150 : vector<16x32xf32>
    %152 = arith.mulf %151, %151 : vector<16x32xf32>
    %cst_44 = arith.constant dense<0.000000e+00> : vector<32xf32>
    %153 = vector.multi_reduction <add>, %152, %cst_44 [0] : vector<16x32xf32> to vector<32xf32>
    %154 = vector.shape_cast %153 : vector<32xf32> to vector<1x32xf32>
    %cst_45 = arith.constant 1.600000e+01 : f32
    %155 = vector.broadcast %cst_45 : f32 to vector<1x32xf32>
    %156 = arith.divf %154, %155 : vector<1x32xf32>
    %cst_46 = arith.constant 9.99999974E-6 : f32
    %157 = vector.broadcast %cst_46 : f32 to vector<1x32xf32>
    %158 = arith.addf %156, %157 : vector<1x32xf32>
    %159 = math.rsqrt %158 : vector<1x32xf32>
    %160 = vector.broadcast %159 : vector<1x32xf32> to vector<16x32xf32>
    %161 = arith.mulf %151, %160 : vector<16x32xf32>
    %162 = vector.extract_strided_slice %144 {offsets = [16, 0], sizes = [16, 32], strides = [1, 1]} : vector<32x32xf32> to vector<16x32xf32>
    %cst_47 = arith.constant dense<0.000000e+00> : vector<32xf32>
    %163 = vector.multi_reduction <add>, %162, %cst_47 [0] : vector<16x32xf32> to vector<32xf32>
    %164 = vector.shape_cast %163 : vector<32xf32> to vector<1x32xf32>
    %cst_48 = arith.constant 1.600000e+01 : f32
    %165 = vector.broadcast %cst_48 : f32 to vector<1x32xf32>
    %166 = arith.divf %164, %165 : vector<1x32xf32>
    %167 = vector.broadcast %166 : vector<1x32xf32> to vector<16x32xf32>
    %168 = arith.subf %162, %167 : vector<16x32xf32>
    %169 = arith.mulf %168, %168 : vector<16x32xf32>
    %cst_49 = arith.constant dense<0.000000e+00> : vector<32xf32>
    %170 = vector.multi_reduction <add>, %169, %cst_49 [0] : vector<16x32xf32> to vector<32xf32>
    %171 = vector.shape_cast %170 : vector<32xf32> to vector<1x32xf32>
    %cst_50 = arith.constant 1.600000e+01 : f32
    %172 = vector.broadcast %cst_50 : f32 to vector<1x32xf32>
    %173 = arith.divf %171, %172 : vector<1x32xf32>
    %cst_51 = arith.constant 9.99999974E-6 : f32
    %174 = vector.broadcast %cst_51 : f32 to vector<1x32xf32>
    %175 = arith.addf %173, %174 : vector<1x32xf32>
    %176 = math.rsqrt %175 : vector<1x32xf32>
    %177 = vector.broadcast %176 : vector<1x32xf32> to vector<16x32xf32>
    %178 = arith.mulf %168, %177 : vector<16x32xf32>
    %179 = tpu.concatenate %161, %178 in 0 : vector<16x32xf32>, vector<16x32xf32> -> vector<32x32xf32>
    %180 = vector.broadcast %15 : vector<1x32xf32> to vector<32x32xf32>
    %181 = arith.mulf %179, %180 : vector<32x32xf32>
    %182 = vector.broadcast %16 : vector<1x32xf32> to vector<32x32xf32>
    %183 = arith.addf %181, %182 : vector<32x32xf32>
    %c1 = arith.constant 1 : index
    %c0_52 = arith.constant 0 : index
    %c0_53 = arith.constant 0 : index
    %184 = vector.load %arg2[%c1, %c0_52, %c0_53] : memref<2x32x384xf32, #tpu.memory_space<vmem>>, vector<1x32x384xf32>
    %185 = vector.shape_cast %184 : vector<1x32x384xf32> to vector<32x384xf32>
    %c1_54 = arith.constant 1 : index
    %c0_55 = arith.constant 0 : index
    %c0_56 = arith.constant 0 : index
    %186 = vector.load %arg3[%c1_54, %c0_55, %c0_56] : memref<2x64x32xf32, #tpu.memory_space<vmem>>, vector<1x64x32xf32>
    %187 = vector.shape_cast %186 : vector<1x64x32xf32> to vector<64x32xf32>
    %c1_57 = arith.constant 1 : index
    %c0_58 = arith.constant 0 : index
    %c0_59 = arith.constant 0 : index
    %188 = vector.load %arg4[%c1_57, %c0_58, %c0_59] : memref<2x8x128xf32, #tpu.memory_space<vmem>>, vector<1x8x128xf32>
    %189 = vector.shape_cast %188 : vector<1x8x128xf32> to vector<8x128xf32>
    %190 = vector.extract_strided_slice %185 {offsets = [0, 0], sizes = [32, 96], strides = [1, 1]} : vector<32x384xf32> to vector<32x96xf32>
    %191 = vector.extract_strided_slice %185 {offsets = [0, 128], sizes = [32, 32], strides = [1, 1]} : vector<32x384xf32> to vector<32x32xf32>
    %192 = vector.extract_strided_slice %185 {offsets = [0, 256], sizes = [32, 64], strides = [1, 1]} : vector<32x384xf32> to vector<32x64xf32>
    %193 = vector.extract_strided_slice %189 {offsets = [0, 0], sizes = [1, 96], strides = [1, 1]} : vector<8x128xf32> to vector<1x96xf32>
    %194 = vector.extract_strided_slice %189 {offsets = [1, 0], sizes = [1, 32], strides = [1, 1]} : vector<8x128xf32> to vector<1x32xf32>
    %195 = vector.extract_strided_slice %189 {offsets = [2, 0], sizes = [1, 64], strides = [1, 1]} : vector<8x128xf32> to vector<1x64xf32>
    %196 = vector.extract_strided_slice %189 {offsets = [3, 0], sizes = [1, 32], strides = [1, 1]} : vector<8x128xf32> to vector<1x32xf32>
    %197 = vector.extract_strided_slice %189 {offsets = [4, 0], sizes = [1, 32], strides = [1, 1]} : vector<8x128xf32> to vector<1x32xf32>
    %198 = vector.extract_strided_slice %189 {offsets = [5, 0], sizes = [1, 32], strides = [1, 1]} : vector<8x128xf32> to vector<1x32xf32>
    %199 = vector.extract_strided_slice %189 {offsets = [6, 0], sizes = [1, 32], strides = [1, 1]} : vector<8x128xf32> to vector<1x32xf32>
    %cst_60 = arith.constant dense<0.000000e+00> : vector<32x96xf32>
    %200 = tpu.matmul %183, %190, %cst_60 {dimension_numbers = #tpu.dot_dimension_numbers<[1], [0], [0], [1], [0, 0, 1, 1], [], []>} : vector<32x32xf32>, vector<32x96xf32>, vector<32x96xf32> -> vector<32x96xf32>
    %201 = vector.broadcast %193 : vector<1x96xf32> to vector<32x96xf32>
    %202 = arith.addf %200, %201 : vector<32x96xf32>
    %203 = vector.extract_strided_slice %202 {offsets = [0, 0], sizes = [32, 32], strides = [1, 1]} : vector<32x96xf32> to vector<32x32xf32>
    %204 = vector.extract_strided_slice %202 {offsets = [0, 32], sizes = [32, 32], strides = [1, 1]} : vector<32x96xf32> to vector<32x32xf32>
    %205 = vector.extract_strided_slice %202 {offsets = [0, 64], sizes = [32, 32], strides = [1, 1]} : vector<32x96xf32> to vector<32x32xf32>
    %206 = tpu.transpose %204, [1, 0] : vector<32x32xf32> -> vector<32x32xf32>
    %207 = tpu.concatenate %206, %206, %206, %206 in 1 : vector<32x32xf32>, vector<32x32xf32>, vector<32x32xf32>, vector<32x32xf32> -> vector<32x128xf32>
    %c0_61 = arith.constant 0 : index
    %c0_62 = arith.constant 0 : index
    %208 = vector.load %arg5[%c0_61, %c0_62] : memref<192x128xf32, #tpu.memory_space<vmem>>, vector<32x128xf32>
    %209 = arith.mulf %207, %208 : vector<32x128xf32>
    %cst_63 = arith.constant dense<0.000000e+00> : vector<32x128xf32>
    %210 = tpu.matmul %203, %209, %cst_63 {dimension_numbers = #tpu.dot_dimension_numbers<[1], [0], [0], [1], [0, 0, 1, 1], [], []>} : vector<32x32xf32>, vector<32x128xf32>, vector<32x128xf32> -> vector<32x128xf32>
    %c32_64 = arith.constant 32 : index
    %c0_65 = arith.constant 0 : index
    %211 = vector.load %arg5[%c32_64, %c0_65] : memref<192x128xf32, #tpu.memory_space<vmem>>, vector<32x128xf32>
    %212 = arith.addf %210, %211 : vector<32x128xf32>
    %213 = vector.extract_strided_slice %212 {offsets = [0, 0], sizes = [32, 32], strides = [1, 1]} : vector<32x128xf32> to vector<32x32xf32>
    %cst_66 = arith.constant dense<0xFF800000> : vector<32xf32>
    %214 = vector.multi_reduction <maximumf>, %213, %cst_66 [1] : vector<32x32xf32> to vector<32xf32>
    %215 = vector.shape_cast %214 : vector<32xf32> to vector<32x1xf32>
    %216 = vector.broadcast %215 : vector<32x1xf32> to vector<32x32xf32>
    %217 = arith.subf %213, %216 : vector<32x32xf32>
    %218 = math.exp %217 : vector<32x32xf32>
    %cst_67 = arith.constant dense<0.000000e+00> : vector<32xf32>
    %219 = vector.multi_reduction <add>, %218, %cst_67 [1] : vector<32x32xf32> to vector<32xf32>
    %220 = vector.shape_cast %219 : vector<32xf32> to vector<32x1xf32>
    %221 = tpu.reciprocal %220 {approx = true} : vector<32x1xf32> -> vector<32x1xf32>
    %222 = arith.mulf %220, %221 : vector<32x1xf32>
    %cst_68 = arith.constant 2.000000e+00 : f32
    %223 = vector.broadcast %cst_68 : f32 to vector<32x1xf32>
    %224 = arith.subf %223, %222 : vector<32x1xf32>
    %225 = arith.mulf %221, %224 : vector<32x1xf32>
    %226 = vector.broadcast %225 : vector<32x1xf32> to vector<32x32xf32>
    %227 = arith.mulf %218, %226 : vector<32x32xf32>
    %228 = vector.extract_strided_slice %212 {offsets = [0, 32], sizes = [32, 32], strides = [1, 1]} : vector<32x128xf32> to vector<32x32xf32>
    %cst_69 = arith.constant dense<0xFF800000> : vector<32xf32>
    %229 = vector.multi_reduction <maximumf>, %228, %cst_69 [1] : vector<32x32xf32> to vector<32xf32>
    %230 = vector.shape_cast %229 : vector<32xf32> to vector<32x1xf32>
    %231 = vector.broadcast %230 : vector<32x1xf32> to vector<32x32xf32>
    %232 = arith.subf %228, %231 : vector<32x32xf32>
    %233 = math.exp %232 : vector<32x32xf32>
    %cst_70 = arith.constant dense<0.000000e+00> : vector<32xf32>
    %234 = vector.multi_reduction <add>, %233, %cst_70 [1] : vector<32x32xf32> to vector<32xf32>
    %235 = vector.shape_cast %234 : vector<32xf32> to vector<32x1xf32>
    %236 = tpu.reciprocal %235 {approx = true} : vector<32x1xf32> -> vector<32x1xf32>
    %237 = arith.mulf %235, %236 : vector<32x1xf32>
    %cst_71 = arith.constant 2.000000e+00 : f32
    %238 = vector.broadcast %cst_71 : f32 to vector<32x1xf32>
    %239 = arith.subf %238, %237 : vector<32x1xf32>
    %240 = arith.mulf %236, %239 : vector<32x1xf32>
    %241 = vector.broadcast %240 : vector<32x1xf32> to vector<32x32xf32>
    %242 = arith.mulf %233, %241 : vector<32x32xf32>
    %243 = vector.extract_strided_slice %212 {offsets = [0, 64], sizes = [32, 32], strides = [1, 1]} : vector<32x128xf32> to vector<32x32xf32>
    %cst_72 = arith.constant dense<0xFF800000> : vector<32xf32>
    %244 = vector.multi_reduction <maximumf>, %243, %cst_72 [1] : vector<32x32xf32> to vector<32xf32>
    %245 = vector.shape_cast %244 : vector<32xf32> to vector<32x1xf32>
    %246 = vector.broadcast %245 : vector<32x1xf32> to vector<32x32xf32>
    %247 = arith.subf %243, %246 : vector<32x32xf32>
    %248 = math.exp %247 : vector<32x32xf32>
    %cst_73 = arith.constant dense<0.000000e+00> : vector<32xf32>
    %249 = vector.multi_reduction <add>, %248, %cst_73 [1] : vector<32x32xf32> to vector<32xf32>
    %250 = vector.shape_cast %249 : vector<32xf32> to vector<32x1xf32>
    %251 = tpu.reciprocal %250 {approx = true} : vector<32x1xf32> -> vector<32x1xf32>
    %252 = arith.mulf %250, %251 : vector<32x1xf32>
    %cst_74 = arith.constant 2.000000e+00 : f32
    %253 = vector.broadcast %cst_74 : f32 to vector<32x1xf32>
    %254 = arith.subf %253, %252 : vector<32x1xf32>
    %255 = arith.mulf %251, %254 : vector<32x1xf32>
    %256 = vector.broadcast %255 : vector<32x1xf32> to vector<32x32xf32>
    %257 = arith.mulf %248, %256 : vector<32x32xf32>
    %258 = vector.extract_strided_slice %212 {offsets = [0, 96], sizes = [32, 32], strides = [1, 1]} : vector<32x128xf32> to vector<32x32xf32>
    %cst_75 = arith.constant dense<0xFF800000> : vector<32xf32>
    %259 = vector.multi_reduction <maximumf>, %258, %cst_75 [1] : vector<32x32xf32> to vector<32xf32>
    %260 = vector.shape_cast %259 : vector<32xf32> to vector<32x1xf32>
    %261 = vector.broadcast %260 : vector<32x1xf32> to vector<32x32xf32>
    %262 = arith.subf %258, %261 : vector<32x32xf32>
    %263 = math.exp %262 : vector<32x32xf32>
    %cst_76 = arith.constant dense<0.000000e+00> : vector<32xf32>
    %264 = vector.multi_reduction <add>, %263, %cst_76 [1] : vector<32x32xf32> to vector<32xf32>
    %265 = vector.shape_cast %264 : vector<32xf32> to vector<32x1xf32>
    %266 = tpu.reciprocal %265 {approx = true} : vector<32x1xf32> -> vector<32x1xf32>
    %267 = arith.mulf %265, %266 : vector<32x1xf32>
    %cst_77 = arith.constant 2.000000e+00 : f32
    %268 = vector.broadcast %cst_77 : f32 to vector<32x1xf32>
    %269 = arith.subf %268, %267 : vector<32x1xf32>
    %270 = arith.mulf %266, %269 : vector<32x1xf32>
    %271 = vector.broadcast %270 : vector<32x1xf32> to vector<32x32xf32>
    %272 = arith.mulf %263, %271 : vector<32x32xf32>
    %273 = tpu.concatenate %227, %242, %257, %272 in 1 : vector<32x32xf32>, vector<32x32xf32>, vector<32x32xf32>, vector<32x32xf32> -> vector<32x128xf32>
    %274 = tpu.concatenate %205, %205, %205, %205 in 0 : vector<32x32xf32>, vector<32x32xf32>, vector<32x32xf32>, vector<32x32xf32> -> vector<128x32xf32>
    %c64_78 = arith.constant 64 : index
    %c0_79 = arith.constant 0 : index
    %275 = vector.load %arg5[%c64_78, %c0_79] : memref<192x128xf32, #tpu.memory_space<vmem>>, vector<128x32xf32>
    %276 = arith.mulf %274, %275 : vector<128x32xf32>
    %cst_80 = arith.constant dense<0.000000e+00> : vector<32x32xf32>
    %277 = tpu.matmul %273, %276, %cst_80 {dimension_numbers = #tpu.dot_dimension_numbers<[1], [0], [0], [1], [0, 0, 1, 1], [], []>} : vector<32x128xf32>, vector<128x32xf32>, vector<32x32xf32> -> vector<32x32xf32>
    %cst_81 = arith.constant dense<0.000000e+00> : vector<32x32xf32>
    %278 = tpu.matmul %277, %191, %cst_81 {dimension_numbers = #tpu.dot_dimension_numbers<[1], [0], [0], [1], [0, 0, 1, 1], [], []>} : vector<32x32xf32>, vector<32x32xf32>, vector<32x32xf32> -> vector<32x32xf32>
    %279 = vector.broadcast %194 : vector<1x32xf32> to vector<32x32xf32>
    %280 = arith.addf %278, %279 : vector<32x32xf32>
    %281 = arith.addf %183, %280 : vector<32x32xf32>
    %282 = vector.extract_strided_slice %281 {offsets = [0, 0], sizes = [16, 32], strides = [1, 1]} : vector<32x32xf32> to vector<16x32xf32>
    %cst_82 = arith.constant dense<0.000000e+00> : vector<32xf32>
    %283 = vector.multi_reduction <add>, %282, %cst_82 [0] : vector<16x32xf32> to vector<32xf32>
    %284 = vector.shape_cast %283 : vector<32xf32> to vector<1x32xf32>
    %cst_83 = arith.constant 1.600000e+01 : f32
    %285 = vector.broadcast %cst_83 : f32 to vector<1x32xf32>
    %286 = arith.divf %284, %285 : vector<1x32xf32>
    %287 = vector.broadcast %286 : vector<1x32xf32> to vector<16x32xf32>
    %288 = arith.subf %282, %287 : vector<16x32xf32>
    %289 = arith.mulf %288, %288 : vector<16x32xf32>
    %cst_84 = arith.constant dense<0.000000e+00> : vector<32xf32>
    %290 = vector.multi_reduction <add>, %289, %cst_84 [0] : vector<16x32xf32> to vector<32xf32>
    %291 = vector.shape_cast %290 : vector<32xf32> to vector<1x32xf32>
    %cst_85 = arith.constant 1.600000e+01 : f32
    %292 = vector.broadcast %cst_85 : f32 to vector<1x32xf32>
    %293 = arith.divf %291, %292 : vector<1x32xf32>
    %cst_86 = arith.constant 9.99999974E-6 : f32
    %294 = vector.broadcast %cst_86 : f32 to vector<1x32xf32>
    %295 = arith.addf %293, %294 : vector<1x32xf32>
    %296 = math.rsqrt %295 : vector<1x32xf32>
    %297 = vector.broadcast %296 : vector<1x32xf32> to vector<16x32xf32>
    %298 = arith.mulf %288, %297 : vector<16x32xf32>
    %299 = vector.extract_strided_slice %281 {offsets = [16, 0], sizes = [16, 32], strides = [1, 1]} : vector<32x32xf32> to vector<16x32xf32>
    %cst_87 = arith.constant dense<0.000000e+00> : vector<32xf32>
    %300 = vector.multi_reduction <add>, %299, %cst_87 [0] : vector<16x32xf32> to vector<32xf32>
    %301 = vector.shape_cast %300 : vector<32xf32> to vector<1x32xf32>
    %cst_88 = arith.constant 1.600000e+01 : f32
    %302 = vector.broadcast %cst_88 : f32 to vector<1x32xf32>
    %303 = arith.divf %301, %302 : vector<1x32xf32>
    %304 = vector.broadcast %303 : vector<1x32xf32> to vector<16x32xf32>
    %305 = arith.subf %299, %304 : vector<16x32xf32>
    %306 = arith.mulf %305, %305 : vector<16x32xf32>
    %cst_89 = arith.constant dense<0.000000e+00> : vector<32xf32>
    %307 = vector.multi_reduction <add>, %306, %cst_89 [0] : vector<16x32xf32> to vector<32xf32>
    %308 = vector.shape_cast %307 : vector<32xf32> to vector<1x32xf32>
    %cst_90 = arith.constant 1.600000e+01 : f32
    %309 = vector.broadcast %cst_90 : f32 to vector<1x32xf32>
    %310 = arith.divf %308, %309 : vector<1x32xf32>
    %cst_91 = arith.constant 9.99999974E-6 : f32
    %311 = vector.broadcast %cst_91 : f32 to vector<1x32xf32>
    %312 = arith.addf %310, %311 : vector<1x32xf32>
    %313 = math.rsqrt %312 : vector<1x32xf32>
    %314 = vector.broadcast %313 : vector<1x32xf32> to vector<16x32xf32>
    %315 = arith.mulf %305, %314 : vector<16x32xf32>
    %316 = tpu.concatenate %298, %315 in 0 : vector<16x32xf32>, vector<16x32xf32> -> vector<32x32xf32>
    %317 = vector.broadcast %196 : vector<1x32xf32> to vector<32x32xf32>
    %318 = arith.mulf %316, %317 : vector<32x32xf32>
    %319 = vector.broadcast %197 : vector<1x32xf32> to vector<32x32xf32>
    %320 = arith.addf %318, %319 : vector<32x32xf32>
    %cst_92 = arith.constant dense<0.000000e+00> : vector<32x64xf32>
    %321 = tpu.matmul %320, %192, %cst_92 {dimension_numbers = #tpu.dot_dimension_numbers<[1], [0], [0], [1], [0, 0, 1, 1], [], []>} : vector<32x32xf32>, vector<32x64xf32>, vector<32x64xf32> -> vector<32x64xf32>
    %322 = vector.broadcast %195 : vector<1x64xf32> to vector<32x64xf32>
    %323 = arith.addf %321, %322 : vector<32x64xf32>
    %cst_93 = arith.constant 0.000000e+00 : f32
    %324 = vector.broadcast %cst_93 : f32 to vector<32x64xf32>
    %325 = arith.maximumf %323, %324 : vector<32x64xf32>
    %cst_94 = arith.constant dense<0.000000e+00> : vector<32x32xf32>
    %326 = tpu.matmul %325, %187, %cst_94 {dimension_numbers = #tpu.dot_dimension_numbers<[1], [0], [0], [1], [0, 0, 1, 1], [], []>} : vector<32x64xf32>, vector<64x32xf32>, vector<32x32xf32> -> vector<32x32xf32>
    %327 = arith.addf %320, %326 : vector<32x32xf32>
    %328 = vector.extract_strided_slice %327 {offsets = [0, 0], sizes = [16, 32], strides = [1, 1]} : vector<32x32xf32> to vector<16x32xf32>
    %cst_95 = arith.constant dense<0.000000e+00> : vector<32xf32>
    %329 = vector.multi_reduction <add>, %328, %cst_95 [0] : vector<16x32xf32> to vector<32xf32>
    %330 = vector.shape_cast %329 : vector<32xf32> to vector<1x32xf32>
    %cst_96 = arith.constant 1.600000e+01 : f32
    %331 = vector.broadcast %cst_96 : f32 to vector<1x32xf32>
    %332 = arith.divf %330, %331 : vector<1x32xf32>
    %333 = vector.broadcast %332 : vector<1x32xf32> to vector<16x32xf32>
    %334 = arith.subf %328, %333 : vector<16x32xf32>
    %335 = arith.mulf %334, %334 : vector<16x32xf32>
    %cst_97 = arith.constant dense<0.000000e+00> : vector<32xf32>
    %336 = vector.multi_reduction <add>, %335, %cst_97 [0] : vector<16x32xf32> to vector<32xf32>
    %337 = vector.shape_cast %336 : vector<32xf32> to vector<1x32xf32>
    %cst_98 = arith.constant 1.600000e+01 : f32
    %338 = vector.broadcast %cst_98 : f32 to vector<1x32xf32>
    %339 = arith.divf %337, %338 : vector<1x32xf32>
    %cst_99 = arith.constant 9.99999974E-6 : f32
    %340 = vector.broadcast %cst_99 : f32 to vector<1x32xf32>
    %341 = arith.addf %339, %340 : vector<1x32xf32>
    %342 = math.rsqrt %341 : vector<1x32xf32>
    %343 = vector.broadcast %342 : vector<1x32xf32> to vector<16x32xf32>
    %344 = arith.mulf %334, %343 : vector<16x32xf32>
    %345 = vector.extract_strided_slice %327 {offsets = [16, 0], sizes = [16, 32], strides = [1, 1]} : vector<32x32xf32> to vector<16x32xf32>
    %cst_100 = arith.constant dense<0.000000e+00> : vector<32xf32>
    %346 = vector.multi_reduction <add>, %345, %cst_100 [0] : vector<16x32xf32> to vector<32xf32>
    %347 = vector.shape_cast %346 : vector<32xf32> to vector<1x32xf32>
    %cst_101 = arith.constant 1.600000e+01 : f32
    %348 = vector.broadcast %cst_101 : f32 to vector<1x32xf32>
    %349 = arith.divf %347, %348 : vector<1x32xf32>
    %350 = vector.broadcast %349 : vector<1x32xf32> to vector<16x32xf32>
    %351 = arith.subf %345, %350 : vector<16x32xf32>
    %352 = arith.mulf %351, %351 : vector<16x32xf32>
    %cst_102 = arith.constant dense<0.000000e+00> : vector<32xf32>
    %353 = vector.multi_reduction <add>, %352, %cst_102 [0] : vector<16x32xf32> to vector<32xf32>
    %354 = vector.shape_cast %353 : vector<32xf32> to vector<1x32xf32>
    %cst_103 = arith.constant 1.600000e+01 : f32
    %355 = vector.broadcast %cst_103 : f32 to vector<1x32xf32>
    %356 = arith.divf %354, %355 : vector<1x32xf32>
    %cst_104 = arith.constant 9.99999974E-6 : f32
    %357 = vector.broadcast %cst_104 : f32 to vector<1x32xf32>
    %358 = arith.addf %356, %357 : vector<1x32xf32>
    %359 = math.rsqrt %358 : vector<1x32xf32>
    %360 = vector.broadcast %359 : vector<1x32xf32> to vector<16x32xf32>
    %361 = arith.mulf %351, %360 : vector<16x32xf32>
    %362 = tpu.concatenate %344, %361 in 0 : vector<16x32xf32>, vector<16x32xf32> -> vector<32x32xf32>
    %363 = vector.broadcast %198 : vector<1x32xf32> to vector<32x32xf32>
    %364 = arith.mulf %362, %363 : vector<32x32xf32>
    %365 = vector.broadcast %199 : vector<1x32xf32> to vector<32x32xf32>
    %366 = arith.addf %364, %365 : vector<32x32xf32>
    %c0_105 = arith.constant 0 : index
    %c0_106 = arith.constant 0 : index
    %367 = vector.load %arg6[%c0_105, %c0_106] : memref<32x32xf32, #tpu.memory_space<vmem>>, vector<32x32xf32>
    tpu.vector_store %arg6[%c0_105, %c0_106], %366 {strides = array<i32>} : memref<32x32xf32, #tpu.memory_space<vmem>>, vector<32x32xf32>,
    return
  }
  func.func @transform_0(%arg0: i32) -> (i32, i32) {
    %c0_i32 = arith.constant 0 : i32
    %c0_i32_0 = arith.constant 0 : i32
    %c0_i32_1 = arith.constant 0 : i32
    return %c0_i32, %c0_i32_0 : i32, i32
  }
  func.func @transform_1(%arg0: i32) -> (i32, i32, i32) {
    %c0_i32 = arith.constant 0 : i32
    %c0_i32_0 = arith.constant 0 : i32
    %c0_i32_1 = arith.constant 0 : i32
    %c0_i32_2 = arith.constant 0 : i32
    return %c0_i32, %c0_i32_0, %c0_i32_1 : i32, i32, i32
  }
  func.func @transform_2(%arg0: i32) -> (i32, i32, i32) {
    %c0_i32 = arith.constant 0 : i32
    %c0_i32_0 = arith.constant 0 : i32
    %c0_i32_1 = arith.constant 0 : i32
    %c0_i32_2 = arith.constant 0 : i32
    return %c0_i32, %c0_i32_0, %c0_i32_1 : i32, i32, i32
  }
  func.func @transform_3(%arg0: i32) -> (i32, i32, i32) {
    %c0_i32 = arith.constant 0 : i32
    %c0_i32_0 = arith.constant 0 : i32
    %c0_i32_1 = arith.constant 0 : i32
    %c0_i32_2 = arith.constant 0 : i32
    return %c0_i32, %c0_i32_0, %c0_i32_1 : i32, i32, i32
  }
  func.func @transform_4(%arg0: i32) -> (i32, i32) {
    %c0_i32 = arith.constant 0 : i32
    %c0_i32_0 = arith.constant 0 : i32
    %c0_i32_1 = arith.constant 0 : i32
    return %c0_i32, %c0_i32_0 : i32, i32
  }
  func.func @transform_5(%arg0: i32) -> (i32, i32) {
    %c0_i32 = arith.constant 0 : i32
    %c0_i32_0 = arith.constant 0 : i32
    %c0_i32_1 = arith.constant 0 : i32
    return %c0_i32, %c0_i32_0 : i32, i32
  }
}

</mosaic_0001>

<bundles_post_ra>
// kernel: self_attention_forward.1
= control target key start
LH: loop header
LB: loop body
LE: loop exit
PB: predicated region body
PF: predicated region fallthrough
CT: control target
= control target key end

     0   :  { %10 = vsyncpa [#allocation3], 0  ;;  %s4249_s0 = inlined_call_operand.hbm [shape: f32[32,32], index: 0, kind: input, shape index: {}]   ;;  %s4250_s1 = inlined_call_operand.vmem [shape: f32[2,32,384], index: 1, kind: input, shape index: {}]   ;;  %s4251_s2 = inlined_call_operand.vmem [shape: f32[2,64,32], index: 2, kind: input, shape index: {}]   ;;  %s4252_s3 = inlined_call_operand.hbm [shape: f32[2,8,128], index: 3, kind: input, shape index: {}]   ;;  %s4253_s4 = inlined_call_operand.hbm [shape: f32[192,128], index: 4, kind: input, shape index: {}]   ;;  %s4254_s5 = inlined_call_operand.hbm [shape: f32[32,32], index: 5, kind: output, shape index: {}]  }
   0x1   :  { %11 = vsyncpa [#allocation6], 0 }
   0x2   :  { %12 = vsyncpa [#allocation4], 0  ;;  %s3306_s18 = smov [#allocation5]   ;;  %s3307_s20 = smov [#allocation2]  }
   0x3   :  { %s34_s19 = sshll.u32 %s3306_s18, 4  ;;  %s18_s21 = sshll.u32 %s3307_s20, 4  ;;  %s35_s19 = int_to_ptr.vmem [resolvable:$true] %s34_s19  ;;  %s19_s21 = int_to_ptr.vmem [resolvable:$true] %s18_s21 }
   0x4   :  { %s3228_s22 = scalar_lea.vmem %s35_s19, 256  ;;  %p3233_p1 = scmp.lt.s32.totalorder %s35_s19, %s35_s19 }
   0x5   :  { %p3229_p0 = scmp.ne.s32.totalorder %s35_s19, %s3228_s22  ;;  %p3234_p2 = scmp.lt.s32.totalorder %s3228_s22, %s3228_s22 }
   0x7   :  { %p3235_p3 = por %p3234_p2, %p3233_p1 }
   0x9   :  { %p3236_p4 = pnand %p3235_p3, %p3229_p0 }
   0xb   :  { %3239 = shalt.err (!%p3236_p4)
}
   0xc   :  { %s3308_s23 = smov 128   ;;  %s3309_s24 = smov 8  }
   0xd   :  { %40 = dma.hbm_to_vmem [thread:$0]  %s4252_s3, 256, %s35_s19, [#allocation6], %s3308_s23, %s3308_s23, %s3309_s24  }
   0xe   :  { %s3248_s27 = scalar_lea.vmem %s19_s21, 512  ;;  %p3253_p6 = scmp.lt.s32.totalorder %s19_s21, %s19_s21 }
   0xf   :  { %p3249_p5 = scmp.ne.s32.totalorder %s19_s21, %s3248_s27  ;;  %p3254_p7 = scmp.lt.s32.totalorder %s3248_s27, %s3248_s27 }
  0x11   :  { %p3255_p8 = por %p3254_p7, %p3253_p6 }
  0x13   :  { %p3256_p9 = pnand %p3255_p8, %p3249_p5 }
  0x15   :  { %3259 = shalt.err (!%p3256_p9)
}
  0x16   :  { %24 = dma.hbm_to_vmem [thread:$0]  %s4249_s0, 512, %s19_s21, [#allocation3], %s3308_s23, %s3308_s23, %s3309_s24  }
  0x17   :  { %s3310_s30 = smov [#allocation7]  }
  0x18   :  { %s46_s6 = sshll.u32 %s3310_s30, 4  ;;  %s47_s6 = int_to_ptr.vmem [resolvable:$true] %s46_s6 }
  0x19   :  { %s3268_s7 = scalar_lea.vmem %s47_s6, 3072  ;;  %p3273_p11 = scmp.lt.s32.totalorder %s47_s6, %s47_s6 }
  0x1a   :  { %p3269_p10 = scmp.ne.s32.totalorder %s47_s6, %s3268_s7  ;;  %p3274_p12 = scmp.lt.s32.totalorder %s3268_s7, %s3268_s7 }
  0x1c   :  { %p3275_p13 = por %p3274_p12, %p3273_p11 }
  0x1e   :  { %p3276_p0 = pnand %p3275_p13, %p3269_p10 }
  0x20   :  { %3279 = shalt.err (!%p3276_p0)
}
  0x21   :  { %52 = dma.hbm_to_vmem [thread:$0]  %s4253_s4, 3072, %s47_s6, [#allocation6], %s3308_s23, %s3308_s23, %s3309_s24  }
  0x22   :  { %3300 = dma.done.wait [#allocation3], 512  }
  0x23   :  { %3301 = vsyncadd [#allocation3], 4294966784 }
  0x24   :  { %3302 = dma.done.wait [#allocation6], 3328  }
  0x25   :  { %3303 = vsyncadd [#allocation6], 4294963968  ;;  %vm91_vm0 = vcmask 261120   ;;  %v75_v0 = vld [vmem:[%s4250_s1 + $0x48] sm:$0xff]  ;;  %v72_v1 = vld [vmem:[%s4250_s1 + $0x30] sm:$0xff]  ;;  %v87_v8 = vlaneseq  ;;  %s3311_s15 = smov 96  }
  0x26   :  { %2820 = vmatprep.subr.mxu0 %v75_v0  ;;  %v62_v2 = vld [vmem:[#allocation2] sm:$0xff]  ;;  %v69_v3 = vld [vmem:[%s4250_s1 + $0x18] sm:$0xff]  ;;  %v63_v5 = vld [vmem:[#allocation2 + $0x8] sm:$0xff]  ;;  %s3312_s16 = smov 32   ;;  %s3313_s17 = smov 64   ;;  %vm286_vm1 = vcmask 785408  }
  0x27   :  { %2821 = vmatpush3.msra.mxu0 %v75_v0  ;;  %2828 = vmatprep.mubr.msk.f32.mxu0 %vm91_vm0, %v62_v2  ;;  %v66_v4 = vld [vmem:[%s4250_s1] sm:$0xff]  ;;  %v64_v6 = vld [vmem:[#allocation2 + $0x10] sm:$0xff]  ;;  %v65_v7 = vld [vmem:[#allocation2 + $0x18] sm:$0xff]  ;;  %v3379_v9 = vshrl.u32 %v87_v8, 7  ;;  %vm281_vm2 = vcmask 523264   ;;  %vm452_vm3 = vcmask 523520  }
  0x28   :  { %2822 = vmatprep.subr.mxu0 %v72_v1  ;;  %v86_v11 = vld [vmem:[#allocation5] sm:$0xff]  ;;  %v696_v26 = vld [vmem:[#allocation7 + $0xa8] sm:$0xff]  ;;  %v694_v28 = vld [vmem:[#allocation7 + $0x98] sm:$0xff]  ;;  %vm525_vm4 = vcmask 785920   ;;  %vm598_vm5 = vcmask 1048320  }
  0x29   :  { %2823 = vmatpush3.msra.mxu0 %v72_v1  ;;  %v89_v10 = vsub.s32 0, %v3379_v9  ;;  %v692_v30 = vld [vmem:[#allocation7 + $0x88] sm:$0xff]  ;;  %v690_v31 = vld [vmem:[#allocation7 + $0x78] sm:$0xff]  ;;  %v697_v37 = vld [vmem:[#allocation7 + $0xb0] sm:$0xff] }
  0x2a   :  { %2824 = vmatprep.subr.mxu0 %v69_v3  ;;  %v688_v32 = vld [vmem:[#allocation7 + $0x68] sm:$0xff]  ;;  %v686_v34 = vld [vmem:[#allocation7 + $0x58] sm:$0xff]  ;;  %v695_v38 = vld [vmem:[#allocation7 + $0xa0] sm:$0xff] }
  0x2b   :  { %2825 = vmatpush3.msra.mxu0 %v69_v3  ;;  %v90_v13 = vrot.slane %v86_v11, %v89_v10  ;;  %v684_v35 = vld [vmem:[#allocation7 + $0x48] sm:$0xff]  ;;  %v698_v36 = vld [vmem:[#allocation7 + $0xb8] sm:$0xff]  ;;  %v693_v39 = vld [vmem:[#allocation7 + $0x90] sm:$0xff] }
  0x2c   :  { %2826 = vmatprep.subr.mxu0 %v66_v4  ;;  %v691_v40 = vld [vmem:[#allocation7 + $0x80] sm:$0xff]  ;;  %v689_v41 = vld [vmem:[#allocation7 + $0x70] sm:$0xff]  ;;  %v294_v55 = vld [vmem:[#allocation7 + $0x18] sm:$0xff] }
  0x2d   :  { %2827 = vmatpush3.msra.mxu0 %v66_v4  ;;  %v687_v42 = vld [vmem:[#allocation7 + $0x60] sm:$0xff]  ;;  %v685_v43 = vld [vmem:[#allocation7 + $0x50] sm:$0xff]  ;;  %v292_v0 = vld [vmem:[#allocation7 + $0x8] sm:$0xff] }
  0x2e   :  { %2829 = vmatmul.mubr.msk.f32.vlgmr.msra.gmra.mxu0 %vm91_vm0, %v63_v5  ;;  %v683_v44 = vld [vmem:[#allocation7 + $0x40] sm:$0xff]  ;;  %v293_v59 = vld [vmem:[#allocation7 + $0x10] sm:$0xff] }
  0x2f   :  { %2831 = vmatprep.mubr.msk.f32.mxu0 %vm91_vm0, %v64_v6  ;;  %v291_v11 = vld [vmem:[#allocation7] sm:$0xff] }
  0x32   :  { %2832 = vmatmul.mubr.msk.f32.gmra.mxu0 %vm91_vm0, %v65_v7 }
  0xee   :  { %v2830_v12 = vpop.f32.mrf.mxu0 }
  0xef   :  { %v3390_v18 = vadd.f32 %v2830_v12, %v90_v13 }
  0xf0   :  { %v170_v14 = vpop.f32.mrf.mxu0 }
  0xf1   :  { %v3384_v15 = vadd.f32 %v170_v14, %v90_v13 }
  0xf2   :  { %v2833_v16 = vpop.f32.mrf.mxu0 }
  0xf3   :  { %193 = vrot.lane.b32.xlu0 %v3384_v15, %s3311_s15  ;;  %2842 = vmatprep.mubr.msk.f32.mxu1 %vm91_vm0, %v3384_v15  ;;  %v3398_v20 = vadd.f32 %v2833_v16, %v90_v13 }
  0xf4   :  { %v180_v17 = vpop.f32.mrf.mxu0 }
  0xf5   :  { %v3392_v19 = vadd.f32 %v180_v17, %v90_v13 }
  0xf7   :  { %197 = vrot.lane.b32.xlu1 %v3392_v19, %s3311_s15  ;;  %195 = vrot.lane.b32.xlu0 %v3390_v18, %s3311_s15 }
  0xfb   :  { %199 = vrot.lane.b32.xlu1 %v3398_v20, %s3311_s15 }
 0x165   :  { %v194_v21 = vpop.permute.xlu0 %193 }
 0x166   :  { %205 = vxpose.xlu0.b32.start [1/4] (short) (narrow) %v194_v21, 32 }
 0x169   :  { %v196_v22 = vpop.permute.xlu0 %195  ;;  %v198_v23 = vpop.permute.xlu1 %197 }
 0x16a   :  { %206 = vxpose.xlu0.b32.cont [2/4] (short) (narrow) %v196_v22, 32 }
 0x16d   :  { %v200_v24 = vpop.permute.xlu1 %199 }
 0x16e   :  { %207 = vxpose.xlu0.b32.cont [3/4] (short) (narrow) %v198_v23, 32 }
 0x172   :  { %208 = vxpose.xlu0.b32.end [4/4] (short) (narrow) %v200_v24, 32 }
 0x1e2   :  { %v3402_v25 = vpop.trf.xlu0 }
 0x1e3   :  { %265 = vrot.lane.b32.xlu0 %v3402_v25, %s3311_s15  ;;  %241 = vrot.lane.b32.xlu1 %v3402_v25, %s3312_s16 }
 0x1e6   :  { %v3408_v27 = vpop.trf.xlu0 }
 0x1e7   :  { %741 = vrot.lane.b32.xlu0 %v696_v26, %s3313_s17  ;;  %243 = vrot.lane.b32.xlu1 %v3408_v27, %s3312_s16 }
 0x1ea   :  { %v223_v29 = vpop.trf.xlu0 }
 0x1eb   :  { %737 = vrot.lane.b32.xlu0 %v694_v28, %s3313_s17  ;;  %255 = vrot.lane.b32.xlu1 %v3408_v27, %s3313_s17 }
 0x1ee   :  { %v224_v33 = vpop.trf.xlu0 }
 0x1ef   :  { %733 = vrot.lane.b32.xlu0 %v692_v30, %s3313_s17  ;;  %245 = vrot.lane.b32.xlu1 %v223_v29, %s3312_s16 }
 0x1f3   :  { %729 = vrot.lane.b32.xlu0 %v690_v31, %s3313_s17  ;;  %257 = vrot.lane.b32.xlu1 %v223_v29, %s3313_s17 }
 0x1f7   :  { %725 = vrot.lane.b32.xlu0 %v688_v32, %s3313_s17  ;;  %269 = vrot.lane.b32.xlu1 %v223_v29, %s3311_s15 }
 0x1fb   :  { %721 = vrot.lane.b32.xlu0 %v686_v34, %s3313_s17  ;;  %247 = vrot.lane.b32.xlu1 %v224_v33, %s3312_s16 }
 0x1ff   :  { %717 = vrot.lane.b32.xlu0 %v684_v35, %s3313_s17  ;;  %259 = vrot.lane.b32.xlu1 %v224_v33, %s3313_s17 }
 0x203   :  { %271 = vrot.lane.b32.xlu1 %v224_v33, %s3311_s15 }
 0x207   :  { %267 = vrot.lane.b32.xlu1 %v3408_v27, %s3311_s15 }
 0x20b   :  { %253 = vrot.lane.b32.xlu1 %v3402_v25, %s3313_s17 }
 0x20f   :  { %745 = vrot.lane.b32.xlu1 %v698_v36, %s3313_s17 }
 0x213   :  { %743 = vrot.lane.b32.xlu1 %v697_v37, %s3313_s17 }
 0x217   :  { %739 = vrot.lane.b32.xlu1 %v695_v38, %s3313_s17 }
 0x21b   :  { %735 = vrot.lane.b32.xlu1 %v693_v39, %s3313_s17 }
 0x21f   :  { %731 = vrot.lane.b32.xlu1 %v691_v40, %s3313_s17 }
 0x223   :  { %727 = vrot.lane.b32.xlu1 %v689_v41, %s3313_s17 }
 0x227   :  { %723 = vrot.lane.b32.xlu1 %v687_v42, %s3313_s17 }
 0x22b   :  { %719 = vrot.lane.b32.xlu1 %v685_v43, %s3313_s17 }
 0x22f   :  { %715 = vrot.lane.b32.xlu1 %v683_v44, %s3313_s17 }
 0x255   :  { %v242_v45 = vpop.permute.xlu1 %241  ;;  %v266_v5 = vpop.permute.xlu0 %265 }
 0x256   :  { %v277_v7 = vsel %vm91_vm0, %v3402_v25, %v242_v45 }
 0x259   :  { %v244_v46 = vpop.permute.xlu1 %243  ;;  %v3454_v16 = vpop.permute.xlu0 %741 }
 0x25a   :  { %v278_v63 = vsel %vm91_vm0, %v3408_v27, %v244_v46  ;;  %v776_v23 = vmul.f32 %v3454_v16, %v3390_v18 }
 0x25d   :  { %v256_v47 = vpop.permute.xlu1 %255  ;;  %v3471_v25 = vpop.permute.xlu0 %737 }
 0x25e   :  { %v283_v1 = vsel %vm281_vm2, %v278_v63, %v256_v47  ;;  %v774_v27 = vmul.f32 %v3471_v25, %v3398_v20  ;;  %v300_v47 = vld [vmem:[#allocation7 + $0x28] sm:$0xff] }
 0x261   :  { %v246_v48 = vpop.permute.xlu1 %245  ;;  %v3490_v31 = vpop.permute.xlu0 %733 }
 0x262   :  { %v279_v53 = vsel %vm91_vm0, %v223_v29, %v246_v48 }
 0x265   :  { %v258_v49 = vpop.permute.xlu1 %257 }
 0x266   :  { %v284_v56 = vsel %vm281_vm2, %v279_v53, %v258_v49  ;;  %v299_v49 = vld [vmem:[#allocation7 + $0x20] sm:$0xff] }
 0x269   :  { %v270_v50 = vpop.permute.xlu1 %269 }
 0x26a   :  { %v289_v60 = vsel %vm286_vm1, %v284_v56, %v270_v50 }
 0x26b   :  { %v297_v2 = vmul.f32 %v293_v59, %v289_v60 }
 0x26d   :  { %v248_v51 = vpop.permute.xlu1 %247 }
 0x26e   :  { %v280_v54 = vsel %vm91_vm0, %v224_v33, %v248_v51  ;;  %v3494_v33 = vpop.permute.xlu0 %729 }
 0x271   :  { %v260_v52 = vpop.permute.xlu1 %259 }
 0x272   :  { %v285_v57 = vsel %vm281_vm2, %v280_v54, %v260_v52  ;;  %v3498_v35 = vpop.permute.xlu0 %725 }
 0x275   :  { %v272_v58 = vpop.permute.xlu1 %271 }
 0x276   :  { %v290_v61 = vsel %vm286_vm1, %v285_v57, %v272_v58  ;;  %v3502_v37 = vpop.permute.xlu0 %721 }
 0x277   :  { %v298_v62 = vmul.f32 %v294_v55, %v290_v61  ;;  %v302_v55 = vld [vmem:[#allocation7 + $0x38] sm:$0xff] }
 0x279   :  { %2834 = vmatprep.subr.mxu1 %v298_v62  ;;  %v268_v3 = vpop.permute.xlu1 %267 }
 0x27a   :  { %v288_v4 = vsel %vm286_vm1, %v283_v1, %v268_v3  ;;  %2835 = vmatpush3.msra.mxu1 %v298_v62  ;;  %v3506_v39 = vpop.permute.xlu0 %717 }
 0x27b   :  { %v296_v6 = vmul.f32 %v292_v0, %v288_v4  ;;  %2836 = vmatprep.subr.mxu1 %v297_v2  ;;  %v301_v4 = vld [vmem:[#allocation7 + $0x30] sm:$0xff] }
 0x27c   :  { %2837 = vmatpush3.msra.mxu1 %v297_v2 }
 0x27d   :  { %2838 = vmatprep.subr.mxu1 %v296_v6  ;;  %v254_v8 = vpop.permute.xlu1 %253 }
 0x27e   :  { %v282_v12 = vsel %vm281_vm2, %v277_v7, %v254_v8  ;;  %2839 = vmatpush3.msra.mxu1 %v296_v6 }
 0x27f   :  { %v287_v13 = vsel %vm286_vm1, %v282_v12, %v266_v5 }
 0x280   :  { %v295_v14 = vmul.f32 %v291_v11, %v287_v13 }
 0x281   :  { %v3456_v17 = vpop.permute.xlu1 %745 }
 0x282   :  { %v778_v21 = vmul.f32 %v3456_v17, %v3398_v20  ;;  %2840 = vmatprep.subr.mxu1 %v295_v14 }
 0x283   :  { %2841 = vmatpush3.msra.mxu1 %v295_v14 }
 0x284   :  { %825 = vrot.lane.b32.xlu0 %v778_v21, %s3313_s17  ;;  %2843 = vmatmul.mubr.msk.f32.vlgmr.msra.gmra.mxu1 %vm91_vm0, %v3390_v18 }
 0x285   :  { %v3463_v22 = vpop.permute.xlu1 %743  ;;  %2845 = vmatprep.mubr.msk.f32.mxu1 %vm91_vm0, %v3392_v19 }
 0x286   :  { %v777_v24 = vmul.f32 %v3463_v22, %v3392_v19 }
 0x288   :  { %821 = vrot.lane.b32.xlu0 %v776_v23, %s3313_s17  ;;  %823 = vrot.lane.b32.xlu1 %v777_v24, %s3313_s17 }
 0x289   :  { %2846 = vmatmul.mubr.msk.f32.gmra.mxu1 %vm91_vm0, %v3398_v20  ;;  %v3477_v26 = vpop.permute.xlu1 %739 }
 0x28a   :  { %v775_v28 = vmul.f32 %v3477_v26, %v3384_v15 }
 0x28c   :  { %817 = vrot.lane.b32.xlu0 %v774_v27, %s3313_s17  ;;  %819 = vrot.lane.b32.xlu1 %v775_v28, %s3313_s17 }
 0x28d   :  { %v3485_v29 = vpop.permute.xlu1 %735 }
 0x28e   :  { %v773_v30 = vmul.f32 %v3485_v29, %v3392_v19 }
 0x290   :  { %815 = vrot.lane.b32.xlu1 %v773_v30, %s3313_s17 }
 0x291   :  { %v3492_v32 = vpop.permute.xlu1 %731 }
 0x295   :  { %v3496_v34 = vpop.permute.xlu1 %727 }
 0x299   :  { %v3500_v36 = vpop.permute.xlu1 %723 }
 0x29d   :  { %v3504_v38 = vpop.permute.xlu1 %719 }
 0x2a1   :  { %v3508_v40 = vpop.permute.xlu1 %715 }
 0x2f6   :  { %v826_v41 = vpop.permute.xlu0 %825 }
 0x2f7   :  { %2848 = vmatprep.subr.mxu0 %v826_v41 }
 0x2f8   :  { %2849 = vmatpush3.msra.mxu0 %v826_v41 }
 0x2fa   :  { %v822_v42 = vpop.permute.xlu0 %821  ;;  %v824_v43 = vpop.permute.xlu1 %823 }
 0x2fb   :  { %2850 = vmatprep.subr.mxu0 %v824_v43 }
 0x2fc   :  { %2851 = vmatpush3.msra.mxu0 %v824_v43 }
 0x2fd   :  { %2852 = vmatprep.subr.mxu0 %v822_v42 }
 0x2fe   :  { %2853 = vmatpush3.msra.mxu0 %v822_v42  ;;  %v820_v44 = vpop.permute.xlu1 %819  ;;  %v818_v45 = vpop.permute.xlu0 %817 }
 0x2ff   :  { %2854 = vmatprep.subr.mxu0 %v820_v44 }
 0x300   :  { %2855 = vmatpush3.msra.mxu0 %v820_v44 }
 0x301   :  { %2856 = vmatprep.subr.mxu0 %v818_v45 }
 0x302   :  { %2857 = vmatpush3.msra.mxu0 %v818_v45  ;;  %v816_v46 = vpop.permute.xlu1 %815 }
 0x303   :  { %2858 = vmatprep.subr.mxu0 %v816_v46 }
 0x304   :  { %2859 = vmatpush3.msra.mxu0 %v816_v46 }
 0x344   :  { %v2844_v48 = vpop.f32.mrf.mxu1 }
 0x345   :  { %v3510_v50 = vadd.f32 %v2844_v48, %v300_v47 }
 0x346   :  { %v377_v51 = vpop.f32.mrf.mxu1 }
 0x347   :  { %v3512_v52 = vadd.f32 %v377_v51, %v299_v49  ;;  %v456_v53 = vsel %vm452_vm3, %v3510_v50, -inf  ;;  %v399_v54 = vsel %vm91_vm0, %v3510_v50, -inf  ;;  %v529_v58 = vsel %vm525_vm4, %v3510_v50, -inf }
 0x348   :  { %457 = vmax.xlane.f32.xlu1 %v456_v53  ;;  %400 = vmax.xlane.f32.xlu0 %v399_v54  ;;  %v602_v60 = vsel %vm598_vm5, %v3510_v50, -inf }
 0x349   :  { %v2847_v56 = vpop.f32.mrf.mxu1  ;;  %v526_v59 = vsel %vm525_vm4, %v3512_v52, -inf  ;;  %v453_v63 = vsel %vm452_vm3, %v3512_v52, -inf  ;;  %v599_v0 = vsel %vm598_vm5, %v3512_v52, -inf  ;;  %v396_v1 = vsel %vm91_vm0, %v3512_v52, -inf }
 0x34a   :  { %v3518_v57 = vadd.f32 %v2847_v56, %v302_v55 }
 0x34b   :  { %v387_v3 = vpop.f32.mrf.mxu1 }
 0x34c   :  { %530 = vmax.xlane.f32.xlu1 %v529_v58  ;;  %527 = vmax.xlane.f32.xlu0 %v526_v59  ;;  %v608_v61 = vsel %vm598_vm5, %v3518_v57, -inf  ;;  %v405_v62 = vsel %vm91_vm0, %v3518_v57, -inf  ;;  %v462_v2 = vsel %vm452_vm3, %v3518_v57, -inf  ;;  %v3538_v5 = vadd.f32 %v387_v3, %v301_v4 }
 0x34d   :  { %v535_v6 = vsel %vm525_vm4, %v3518_v57, -inf }
 0x34e   :  { %v459_v7 = vsel %vm452_vm3, %v3538_v5, -inf  ;;  %v532_v8 = vsel %vm525_vm4, %v3538_v5, -inf  ;;  %v605_v11 = vsel %vm598_vm5, %v3538_v5, -inf  ;;  %v402_v12 = vsel %vm91_vm0, %v3538_v5, -inf }
 0x350   :  { %603 = vmax.xlane.f32.xlu1 %v602_v60  ;;  %609 = vmax.xlane.f32.xlu0 %v608_v61 }
 0x354   :  { %406 = vmax.xlane.f32.xlu0 %v405_v62  ;;  %454 = vmax.xlane.f32.xlu1 %v453_v63 }
 0x358   :  { %600 = vmax.xlane.f32.xlu1 %v599_v0 }
 0x35c   :  { %397 = vmax.xlane.f32.xlu1 %v396_v1 }
 0x360   :  { %463 = vmax.xlane.f32.xlu1 %v462_v2 }
 0x364   :  { %536 = vmax.xlane.f32.xlu1 %v535_v6 }
 0x368   :  { %460 = vmax.xlane.f32.xlu1 %v459_v7 }
 0x36c   :  { %533 = vmax.xlane.f32.xlu1 %v532_v8 }
 0x370   :  { %606 = vmax.xlane.f32.xlu1 %v605_v11 }
 0x374   :  { %403 = vmax.xlane.f32.xlu1 %v402_v12 }
 0x3d1   :  { %v458_v13 = vpop.xlane.xlu1 %457  ;;  %v401_v24 = vpop.xlane.xlu0 %400 }
 0x3d2   :  { %v466_v14 = vsub.f32 %v3510_v50, %v458_v13  ;;  %v409_v56 = vsub.f32 %v3510_v50, %v401_v24 }
 0x3d4   :  { %v471_v21 = vmul.f32 1.442695, %v466_v14  ;;  %v414_v61 = vmul.f32 1.442695, %v409_v56 }
 0x3d5   :  { %v531_v23 = vpop.xlane.xlu1 %530  ;;  %v528_v42 = vpop.xlane.xlu0 %527 }
 0x3d6   :  { %3062 = vpow2.f32 %v471_v21  ;;  %v539_v27 = vsub.f32 %v3510_v50, %v531_v23  ;;  %v538_v46 = vsub.f32 %v3512_v52, %v528_v42  ;;  %v771_v42 = vmul.f32 %v3492_v32, %v3384_v15 }
 0x3d8   :  { %v544_v28 = vmul.f32 1.442695, %v539_v27  ;;  %v542_v51 = vmul.f32 1.442695, %v538_v46 }
 0x3d9   :  { %v604_v30 = vpop.xlane.xlu1 %603  ;;  %v610_v0 = vpop.xlane.xlu0 %609 }
 0x3da   :  { %3064 = vpow2.f32 %v544_v28  ;;  %v612_v41 = vsub.f32 %v3510_v50, %v604_v30 }
 0x3dc   :  { %v617_v43 = vmul.f32 1.442695, %v612_v41 }
 0x3dd   :  { %v455_v44 = vpop.xlane.xlu1 %454  ;;  %v407_v4 = vpop.xlane.xlu0 %406 }
 0x3de   :  { %3066 = vpow2.f32 %v617_v43  ;;  %v465_v45 = vsub.f32 %v3512_v52, %v455_v44  ;;  %v411_v6 = vsub.f32 %v3518_v57, %v407_v4 }
 0x3e0   :  { %v469_v47 = vmul.f32 1.442695, %v465_v45  ;;  %v418_v11 = vmul.f32 1.442695, %v411_v6 }
 0x3e1   :  { %v601_v48 = vpop.xlane.xlu1 %600 }
 0x3e2   :  { %3068 = vpow2.f32 %v469_v47  ;;  %v611_v3 = vsub.f32 %v3512_v52, %v601_v48  ;;  %v767_v47 = vmul.f32 %v3500_v36, %v3384_v15  ;;  %v614_v48 = vsub.f32 %v3518_v57, %v610_v0 }
 0x3e3   :  { %v3555_v49 = vpop.eup %3062  ;;  %3070 = vpow2.f32 %v542_v51 }
 0x3e4   :  { %483 = vrot.lane.b32.xlu0 %v3555_v49, %s3311_s15  ;;  %v615_v7 = vmul.f32 1.442695, %v611_v3 }
 0x3e5   :  { %v398_v53 = vpop.xlane.xlu1 %397 }
 0x3e6   :  { %v408_v24 = vsub.f32 %v3512_v52, %v398_v53  ;;  %v769_v52 = vmul.f32 %v3496_v34, %v3392_v19  ;;  %v765_v53 = vmul.f32 %v3504_v38, %v3392_v19 }
 0x3e7   :  { %v3559_v54 = vpop.eup %3064 }
 0x3e8   :  { %556 = vrot.lane.b32.xlu1 %v3559_v54, %s3313_s17  ;;  %v412_v30 = vmul.f32 1.442695, %v408_v24 }
 0x3e9   :  { %v464_v55 = vpop.xlane.xlu1 %463 }
 0x3ea   :  { %v468_v58 = vsub.f32 %v3518_v57, %v464_v55  ;;  %v621_v55 = vmul.f32 1.442695, %v614_v48 }
 0x3eb   :  { %v3565_v59 = vpop.eup %3066 }
 0x3ec   :  { %v475_v60 = vmul.f32 1.442695, %v468_v58  ;;  %629 = vrot.lane.b32.xlu1 %v3565_v59, %s3312_s16 }
 0x3ed   :  { %v537_v8 = vpop.xlane.xlu1 %536 }
 0x3ee   :  { %3072 = vpow2.f32 %v475_v60  ;;  %v541_v46 = vsub.f32 %v3518_v57, %v537_v8 }
 0x3ef   :  { %v3569_v62 = vpop.eup %3068  ;;  %3074 = vpow2.f32 %v414_v61 }
 0x3f0   :  { %481 = vrot.lane.b32.xlu1 %v3569_v62, %s3311_s15  ;;  %v3573_v63 = vpop.eup %3070  ;;  %3076 = vpow2.f32 %v615_v7  ;;  %v548_v51 = vmul.f32 1.442695, %v541_v46  ;;  %v772_v7 = vmul.f32 %v3490_v31, %v3390_v18 }
 0x3f1   :  { %3078 = vpow2.f32 %v418_v11  ;;  %v461_v12 = vpop.xlane.xlu1 %460  ;;  %v770_v11 = vmul.f32 %v3494_v33, %v3398_v20 }
 0x3f2   :  { %3080 = vpow2.f32 %v412_v30  ;;  %v467_v56 = vsub.f32 %v3538_v5, %v461_v12 }
 0x3f4   :  { %554 = vrot.lane.b32.xlu1 %v3573_v63, %s3313_s17  ;;  %v473_v58 = vmul.f32 1.442695, %v467_v56 }
 0x3f5   :  { %v534_v13 = vpop.xlane.xlu1 %533 }
 0x3f6   :  { %v540_v60 = vsub.f32 %v3538_v5, %v534_v13 }
 0x3f8   :  { %v546_v61 = vmul.f32 1.442695, %v540_v60 }
 0x3f9   :  { %v607_v23 = vpop.xlane.xlu1 %606 }
 0x3fa   :  { %v613_v27 = vsub.f32 %v3538_v5, %v607_v23  ;;  %v768_v23 = vmul.f32 %v3498_v35, %v3390_v18 }
 0x3fb   :  { %v3577_v50 = vpop.eup %3072 }
 0x3fc   :  { %487 = vrot.lane.b32.xlu1 %v3577_v50, %s3311_s15  ;;  %v3581_v1 = vpop.eup %3074  ;;  %v619_v41 = vmul.f32 1.442695, %v613_v27  ;;  %v766_v27 = vmul.f32 %v3502_v37, %v3398_v20 }
 0x3fd   :  { %v423_v2 = vsel %vm91_vm0, %v3581_v1, 0.0  ;;  %v3587_v14 = vpop.eup %3076 }
 0x3fe   :  { %v3591_v21 = vpop.eup %3078  ;;  %3082 = vpow2.f32 %v619_v41 }
 0x3ff   :  { %v429_v28 = vsel %vm91_vm0, %v3591_v21, 0.0  ;;  %v3600_v43 = vpop.eup %3080  ;;  %3084 = vpow2.f32 %v548_v51 }
 0x400   :  { %v420_v45 = vsel %vm91_vm0, %v3600_v43, 0.0  ;;  %3086 = vpow2.f32 %v621_v55 }
 0x401   :  { %3088 = vpow2.f32 %v473_v58 }
 0x402   :  { %3090 = vpow2.f32 %v546_v61 }
 0x403   :  { %424 = vadd.xlane.f32.xlu0 %v423_v2  ;;  %v404_v2 = vpop.xlane.xlu1 %403 }
 0x404   :  { %v410_v57 = vsub.f32 %v3538_v5, %v404_v2 }
 0x406   :  { %v416_v19 = vmul.f32 1.442695, %v410_v57 }
 0x408   :  { %3092 = vpow2.f32 %v416_v19 }
 0x40b   :  { %v3602_v44 = vpop.eup %3082 }
 0x40c   :  { %v3622_v0 = vpop.eup %3084 }
 0x40d   :  { %v3626_v3 = vpop.eup %3086 }
 0x40e   :  { %v3630_v4 = vpop.eup %3088 }
 0x40f   :  { %v3634_v6 = vpop.eup %3090 }
 0x415   :  { %v3643_v12 = vpop.eup %3092 }
 0x416   :  { %v426_v24 = vsel %vm91_vm0, %v3643_v12, 0.0 }
 0x419   :  { %627 = vrot.lane.b32.xlu0 %v3587_v14, %s3312_s16 }
 0x420   :  { %430 = vadd.xlane.f32.xlu1 %v429_v28 }
 0x431   :  { %811 = vrot.lane.b32.xlu1 %v771_v42, %s3313_s17 }
 0x435   :  { %631 = vrot.lane.b32.xlu1 %v3602_v44, %s3312_s16 }
 0x438   :  { %421 = vadd.xlane.f32.xlu0 %v420_v45 }
 0x439   :  { %807 = vrot.lane.b32.xlu1 %v769_v52, %s3313_s17 }
 0x43d   :  { %803 = vrot.lane.b32.xlu1 %v767_v47, %s3313_s17 }
 0x441   :  { %799 = vrot.lane.b32.xlu1 %v765_v53, %s3313_s17 }
 0x44e   :  { %560 = vrot.lane.b32.xlu0 %v3622_v0, %s3313_s17 }
 0x452   :  { %633 = vrot.lane.b32.xlu0 %v3626_v3, %s3312_s16 }
 0x456   :  { %485 = vrot.lane.b32.xlu0 %v3630_v4, %s3311_s15  ;;  %v484_v42 = vpop.permute.xlu0 %483 }
 0x457   :  { %v496_v52 = vsel %vm91_vm0, %v484_v42, 0.0  ;;  %v764_v42 = vmul.f32 %v3506_v39, %v3390_v18 }
 0x45a   :  { %558 = vrot.lane.b32.xlu0 %v3634_v6, %s3313_s17  ;;  %v557_v5 = vpop.permute.xlu1 %556 }
 0x45b   :  { %v569_v46 = vsel %vm91_vm0, %v557_v5, 0.0 }
 0x45e   :  { %813 = vrot.lane.b32.xlu0 %v772_v7, %s3313_s17  ;;  %v630_v8 = vpop.permute.xlu1 %629 }
 0x45f   :  { %v642_v20 = vsel %vm91_vm0, %v630_v8, 0.0 }
 0x462   :  { %809 = vrot.lane.b32.xlu0 %v770_v11, %s3313_s17  ;;  %v482_v13 = vpop.permute.xlu1 %481 }
 0x463   :  { %v493_v28 = vsel %vm91_vm0, %v482_v13, 0.0 }
 0x465   :  { %427 = vadd.xlane.f32.xlu1 %v426_v24 }
 0x466   :  { %805 = vrot.lane.b32.xlu0 %v768_v23, %s3313_s17  ;;  %v555_v30 = vpop.permute.xlu1 %554 }
 0x467   :  { %v566_v41 = vsel %vm91_vm0, %v555_v30, 0.0 }
 0x469   :  { %494 = vadd.xlane.f32.xlu1 %v493_v28 }
 0x46a   :  { %801 = vrot.lane.b32.xlu0 %v766_v27, %s3313_s17 }
 0x46d   :  { %567 = vadd.xlane.f32.xlu1 %v566_v41 }
 0x46e   :  { %v488_v48 = vpop.permute.xlu1 %487 }
 0x46f   :  { %v502_v53 = vsel %vm91_vm0, %v488_v48, 0.0 }
 0x489   :  { %497 = vadd.xlane.f32.xlu0 %v496_v52 }
 0x48c   :  { %v3657_v45 = vpop.xlane.xlu0 %424 }
 0x48d   :  { %570 = vadd.xlane.f32.xlu0 %v569_v46  ;;  %v763_v46 = vmul.f32 %v3508_v40, %v3384_v15 }
 0x490   :  { %v628_v47 = vpop.permute.xlu0 %627 }
 0x491   :  { %v639_v51 = vsel %vm91_vm0, %v628_v47, 0.0  ;;  %643 = vadd.xlane.f32.xlu0 %v642_v20  ;;  %v76_v47 = vld [vmem:[%s4250_s1 + $0x50] sm:$0xff]  ;;  %v73_v20 = vld [vmem:[%s4250_s1 + $0x38] sm:$0xff] }
 0x492   :  { %640 = vadd.xlane.f32.xlu1 %v639_v51  ;;  %2886 = vmatprep.subr.mxu1 %v76_v47 }
 0x493   :  { %2887 = vmatpush3.msra.mxu1 %v76_v47 }
 0x494   :  { %2888 = vmatprep.subr.mxu1 %v73_v20 }
 0x495   :  { %503 = vadd.xlane.f32.xlu0 %v502_v53  ;;  %2889 = vmatpush3.msra.mxu1 %v73_v20 }
 0x4a9   :  { %v3665_v56 = vpop.xlane.xlu1 %430 }
 0x4ad   :  { %v812_v57 = vpop.permute.xlu1 %811 }
 0x4b1   :  { %v632_v7 = vpop.permute.xlu1 %631 }
 0x4b2   :  { %v645_v23 = vsel %vm91_vm0, %v632_v7, 0.0 }
 0x4b5   :  { %v808_v24 = vpop.permute.xlu1 %807 }
 0x4b9   :  { %v804_v28 = vpop.permute.xlu1 %803 }
 0x4bd   :  { %v800_v52 = vpop.permute.xlu1 %799 }
 0x4c1   :  { %v3663_v55 = vpop.xlane.xlu0 %421 }
 0x4c5   :  { %v561_v58 = vpop.permute.xlu0 %560 }
 0x4c6   :  { %v575_v60 = vsel %vm91_vm0, %v561_v58, 0.0 }
 0x4c7   :  { %576 = vadd.xlane.f32.xlu0 %v575_v60 }
 0x4c9   :  { %v634_v61 = vpop.permute.xlu0 %633 }
 0x4ca   :  { %v648_v2 = vsel %vm91_vm0, %v634_v61, 0.0 }
 0x4cb   :  { %649 = vadd.xlane.f32.xlu1 %v648_v2 }
 0x4cd   :  { %v486_v19 = vpop.permute.xlu0 %485 }
 0x4ce   :  { %v499_v5 = vsel %vm91_vm0, %v486_v19, 0.0 }
 0x4cf   :  { %500 = vadd.xlane.f32.xlu0 %v499_v5 }
 0x4d1   :  { %v559_v8 = vpop.permute.xlu0 %558 }
 0x4d2   :  { %v572_v11 = vsel %vm91_vm0, %v559_v8, 0.0 }
 0x4d3   :  { %573 = vadd.xlane.f32.xlu1 %v572_v11 }
 0x4d5   :  { %v814_v13 = vpop.permute.xlu0 %813 }
 0x4d6   :  { %2860 = vmatprep.subr.mxu0 %v814_v13 }
 0x4d7   :  { %2861 = vmatpush3.msra.mxu0 %v814_v13  ;;  %646 = vadd.xlane.f32.xlu1 %v645_v23 }
 0x4d8   :  { %2862 = vmatprep.subr.mxu0 %v812_v57 }
 0x4d9   :  { %v810_v27 = vpop.permute.xlu0 %809  ;;  %2863 = vmatpush3.msra.mxu0 %v812_v57 }
 0x4da   :  { %2864 = vmatprep.subr.mxu0 %v810_v27 }
 0x4db   :  { %2865 = vmatpush3.msra.mxu0 %v810_v27 }
 0x4dc   :  { %2866 = vmatprep.subr.mxu0 %v808_v24 }
 0x4dd   :  { %v806_v30 = vpop.permute.xlu0 %805  ;;  %2867 = vmatpush3.msra.mxu0 %v808_v24 }
 0x4de   :  { %2868 = vmatprep.subr.mxu0 %v806_v30 }
 0x4df   :  { %2869 = vmatpush3.msra.mxu0 %v806_v30 }
 0x4e0   :  { %2870 = vmatprep.subr.mxu0 %v804_v28 }
 0x4e1   :  { %v802_v41 = vpop.permute.xlu0 %801  ;;  %2871 = vmatpush3.msra.mxu0 %v804_v28 }
 0x4e2   :  { %2872 = vmatprep.subr.mxu0 %v802_v41 }
 0x4e3   :  { %2873 = vmatpush3.msra.mxu0 %v802_v41 }
 0x4e4   :  { %2874 = vmatprep.subr.mxu0 %v800_v52 }
 0x4e5   :  { %797 = vrot.lane.b32.xlu0 %v764_v42, %s3313_s17  ;;  %2875 = vmatpush3.msra.mxu0 %v800_v52 }
 0x4e8   :  { %795 = vrot.lane.b32.xlu1 %v763_v46, %s3313_s17 }
 0x4ee   :  { %v3684_v18 = vpop.xlane.xlu1 %427 }
 0x4f2   :  { %v495_v48 = vpop.xlane.xlu1 %494 }
 0x4f3   :  { %3094 = vrcp.f32 %v495_v48 }
 0x4f6   :  { %v568_v51 = vpop.xlane.xlu1 %567 }
 0x4f7   :  { %3096 = vrcp.f32 %v568_v51 }
 0x4f8   :  { %3098 = vrcp.f32 %v3663_v55 }
 0x500   :  { %v3095_v53 = vpop.eup %3094 }
 0x501   :  { %v509_v61 = vmul.f32 %v3095_v53, %v495_v48 }
 0x503   :  { %v513_v19 = vsub.f32 2.0, %v509_v61 }
 0x504   :  { %v3097_v58 = vpop.eup %3096 }
 0x505   :  { %v3099_v60 = vpop.eup %3098  ;;  %v582_v2 = vmul.f32 %v3097_v58, %v568_v51  ;;  %v517_v8 = vmul.f32 %v3095_v53, %v513_v19 }
 0x506   :  { %v436_v57 = vmul.f32 %v3099_v60, %v3663_v55 }
 0x507   :  { %v586_v5 = vsub.f32 2.0, %v582_v2  ;;  %v521_v27 = vmul.f32 %v3569_v62, %v517_v8 }
 0x508   :  { %v440_v7 = vsub.f32 2.0, %v436_v57 }
 0x509   :  { %v590_v13 = vmul.f32 %v3097_v58, %v586_v5 }
 0x50a   :  { %v444_v23 = vmul.f32 %v3099_v60, %v440_v7 }
 0x50b   :  { %v594_v30 = vmul.f32 %v3573_v63, %v590_v13 }
 0x50c   :  { %v448_v41 = vmul.f32 %v3600_v43, %v444_v23 }
 0x50e   :  { %v671_v55 = vsel %vm91_vm0, %v448_v41, %v521_v27 }
 0x50f   :  { %v675_v46 = vsel %vm281_vm2, %v671_v55, %v594_v30 }
 0x512   :  { %v498_v20 = vpop.xlane.xlu0 %497 }
 0x516   :  { %v571_v48 = vpop.xlane.xlu0 %570 }
 0x51a   :  { %v644_v62 = vpop.xlane.xlu0 %643 }
 0x51b   :  { %v641_v15 = vpop.xlane.xlu1 %640 }
 0x51c   :  { %3100 = vrcp.f32 %v641_v15 }
 0x51d   :  { %3102 = vrcp.f32 %v3657_v45 }
 0x51e   :  { %3104 = vrcp.f32 %v498_v20  ;;  %v504_v43 = vpop.xlane.xlu0 %503 }
 0x51f   :  { %3106 = vrcp.f32 %v571_v48 }
 0x520   :  { %3108 = vrcp.f32 %v644_v62 }
 0x521   :  { %3110 = vrcp.f32 %v3665_v56 }
 0x522   :  { %3112 = vrcp.f32 %v3684_v18 }
 0x523   :  { %3114 = vrcp.f32 %v504_v43 }
 0x529   :  { %v3101_v11 = vpop.eup %3100 }
 0x52a   :  { %v655_v24 = vmul.f32 %v3101_v11, %v641_v15  ;;  %v3103_v63 = vpop.eup %3102 }
 0x52b   :  { %v3105_v51 = vpop.eup %3104  ;;  %v437_v2 = vmul.f32 %v3103_v63, %v3657_v45 }
 0x52c   :  { %v659_v28 = vsub.f32 2.0, %v655_v24  ;;  %v3107_v15 = vpop.eup %3106  ;;  %v510_v53 = vmul.f32 %v3105_v51, %v498_v20 }
 0x52d   :  { %v583_v60 = vmul.f32 %v3107_v15, %v571_v48  ;;  %v441_v8 = vsub.f32 2.0, %v437_v2 }
 0x52e   :  { %v663_v42 = vmul.f32 %v3101_v11, %v659_v28  ;;  %v514_v19 = vsub.f32 2.0, %v510_v53 }
 0x52f   :  { %v587_v7 = vsub.f32 2.0, %v583_v60  ;;  %v445_v28 = vmul.f32 %v3103_v63, %v441_v8 }
 0x530   :  { %v667_v52 = vmul.f32 %v3587_v14, %v663_v42  ;;  %v3109_v14 = vpop.eup %3108  ;;  %v518_v13 = vmul.f32 %v3105_v51, %v514_v19 }
 0x531   :  { %v656_v57 = vmul.f32 %v3109_v14, %v644_v62  ;;  %v591_v27 = vmul.f32 %v3107_v15, %v587_v7  ;;  %v3111_v42 = vpop.eup %3110 }
 0x532   :  { %v679_v47 = vsel %vm286_vm1, %v675_v46, %v667_v52  ;;  %v522_v45 = vmul.f32 %v3555_v49, %v518_v13  ;;  %v3113_v55 = vpop.eup %3112  ;;  %v449_v46 = vmul.f32 %v3581_v1, %v445_v28 }
 0x533   :  { %2880 = vmatprep.mubr.f32.mxu0 %v679_v47  ;;  %v660_v11 = vsub.f32 2.0, %v656_v57  ;;  %v595_v52 = vmul.f32 %v3559_v54, %v591_v27  ;;  %v3115_v20 = vpop.eup %3114  ;;  %v438_v53 = vmul.f32 %v3113_v55, %v3684_v18 }
 0x534   :  { %v672_v51 = vsel %vm91_vm0, %v449_v46, %v522_v45 }
 0x535   :  { %v664_v30 = vmul.f32 %v3109_v14, %v660_v11  ;;  %v676_v15 = vsel %vm281_vm2, %v672_v51, %v595_v52  ;;  %v512_v14 = vmul.f32 %v3115_v20, %v504_v43  ;;  %v442_v8 = vsub.f32 2.0, %v438_v53  ;;  %v74_v53 = vld [vmem:[%s4250_s1 + $0x40] sm:$0xff] }
 0x537   :  { %v668_v47 = vmul.f32 %v3565_v59, %v664_v30  ;;  %v439_v59 = vmul.f32 %v3111_v42, %v3665_v56  ;;  %v516_v7 = vsub.f32 2.0, %v512_v14  ;;  %v446_v52 = vmul.f32 %v3113_v55, %v442_v8 }
 0x539   :  { %v680_v54 = vsel %vm286_vm1, %v676_v15, %v668_v47  ;;  %v520_v45 = vmul.f32 %v3115_v20, %v516_v7 }
 0x550   :  { %v577_v58 = vpop.xlane.xlu0 %576 }
 0x551   :  { %3116 = vrcp.f32 %v577_v58 }
 0x554   :  { %v650_v61 = vpop.xlane.xlu1 %649 }
 0x555   :  { %3118 = vrcp.f32 %v650_v61 }
 0x558   :  { %v501_v5 = vpop.xlane.xlu0 %500 }
 0x559   :  { %3120 = vrcp.f32 %v501_v5 }
 0x55c   :  { %v798_v23 = vpop.permute.xlu0 %797  ;;  %v574_v24 = vpop.xlane.xlu1 %573 }
 0x55d   :  { %3122 = vrcp.f32 %v574_v24  ;;  %2876 = vmatprep.subr.mxu0 %v798_v23 }
 0x55e   :  { %2877 = vmatpush3.msra.mxu0 %v798_v23  ;;  %v3117_v48 = vpop.eup %3116  ;;  %v443_v23 = vsub.f32 2.0, %v439_v59  ;;  %v3747_v59 = vld [vmem:[%s4251_s2 + $0x38] sm:$0xff] }
 0x55f   :  { %v585_v60 = vmul.f32 %v3117_v48, %v577_v58 }
 0x560   :  { %v647_v41 = vpop.xlane.xlu1 %646  ;;  %v447_v46 = vmul.f32 %v3111_v42, %v443_v23 }
 0x561   :  { %3124 = vrcp.f32 %v647_v41  ;;  %v589_v11 = vsub.f32 2.0, %v585_v60  ;;  %v71_v60 = vld [vmem:[%s4250_s1 + $0x28] sm:$0xff] }
 0x562   :  { %v3119_v63 = vpop.eup %3118  ;;  %v451_v20 = vmul.f32 %v3591_v21, %v447_v46  ;;  %v70_v21 = vld [vmem:[%s4250_s1 + $0x20] sm:$0xff] }
 0x563   :  { %v658_v2 = vmul.f32 %v3119_v63, %v650_v61  ;;  %v593_v18 = vmul.f32 %v3117_v48, %v589_v11  ;;  %2890 = vmatprep.subr.mxu1 %v70_v21 }
 0x564   :  { %v796_v62 = vpop.permute.xlu1 %795  ;;  %2891 = vmatpush3.msra.mxu1 %v70_v21 }
 0x565   :  { %2878 = vmatprep.subr.mxu0 %v796_v62  ;;  %v662_v27 = vsub.f32 2.0, %v658_v2  ;;  %v597_v15 = vmul.f32 %v3622_v0, %v593_v18  ;;  %v930_v2 = vsub.s32 1, %v3379_v9 }
 0x566   :  { %v3121_v49 = vpop.eup %3120  ;;  %2879 = vmatpush3.msra.mxu0 %v796_v62  ;;  %v524_v62 = vmul.f32 %v3577_v50, %v520_v45 }
 0x567   :  { %v511_v1 = vmul.f32 %v3121_v49, %v501_v5  ;;  %2881 = vmatmul.mubr.f32.vlgmr.msra.gmra.mxu0 %v680_v54  ;;  %v666_v47 = vmul.f32 %v3119_v63, %v662_v27  ;;  %v77_v54 = vld [vmem:[%s4250_s1 + $0x58] sm:$0xff] }
 0x568   :  { %v674_v48 = vsel %vm91_vm0, %v451_v20, %v524_v62 }
 0x569   :  { %v515_v57 = vsub.f32 2.0, %v511_v1  ;;  %v670_v55 = vmul.f32 %v3626_v3, %v666_v47  ;;  %v68_v1 = vld [vmem:[%s4250_s1 + $0x10] sm:$0xff] }
 0x56a   :  { %v3123_v19 = vpop.eup %3122 }
 0x56b   :  { %v584_v13 = vmul.f32 %v3123_v19, %v574_v24  ;;  %v519_v43 = vmul.f32 %v3121_v49, %v515_v57  ;;  %v450_v24 = vmul.f32 %v3643_v12, %v446_v52  ;;  %v3751_v57 = vld [vmem:[#allocation5] sm:$0xff] }
 0x56d   :  { %v588_v28 = vsub.f32 2.0, %v584_v13  ;;  %v523_v56 = vmul.f32 %v3630_v4, %v519_v43  ;;  %v3207_v13 = vld [vmem:[#allocation2 + $0x8] sm:$0xff]  ;;  %v3208_v43 = vld [vmem:[#allocation2] sm:$0xff] }
 0x56e   :  { %v3125_v30 = vpop.eup %3124 }
 0x56f   :  { %v592_v58 = vmul.f32 %v3123_v19, %v588_v28  ;;  %v657_v5 = vmul.f32 %v3125_v30, %v647_v41  ;;  %v673_v42 = vsel %vm91_vm0, %v450_v24, %v523_v56  ;;  %v931_v19 = vrot.slane %v3751_v57, %v930_v2  ;;  %v3209_v24 = vld [vmem:[#allocation2 + $0x18] sm:$0xff] }
 0x571   :  { %v661_v61 = vsub.f32 2.0, %v657_v5  ;;  %v596_v51 = vmul.f32 %v3634_v6, %v592_v58  ;;  %v678_v6 = vsel %vm281_vm2, %v674_v48, %v597_v15 }
 0x572   :  { %v682_v0 = vsel %vm286_vm1, %v678_v6, %v670_v55  ;;  %v3210_v55 = vld [vmem:[#allocation2 + $0x10] sm:$0xff] }
 0x573   :  { %v665_v49 = vmul.f32 %v3125_v30, %v661_v61  ;;  %v677_v4 = vsel %vm281_vm2, %v673_v42, %v596_v51 }
 0x575   :  { %v669_v41 = vmul.f32 %v3602_v44, %v665_v49  ;;  %v67_v44 = vld [vmem:[%s4250_s1 + $0x8] sm:$0xff] }
 0x576   :  { %2892 = vmatprep.subr.mxu1 %v67_v44 }
 0x577   :  { %v681_v50 = vsel %vm286_vm1, %v677_v4, %v669_v41  ;;  %2893 = vmatpush3.msra.mxu1 %v67_v44 }
 0x578   :  { %2883 = vmatprep.mubr.f32.mxu0 %v681_v50  ;;  %2900 = vmatprep.subr.mxu1 %v77_v54 }
 0x579   :  { %2884 = vmatmul.mubr.f32.gmra.mxu0 %v682_v0 }
 0x627   :  { %v2882_v3 = vpop.f32.mrf.mxu0 }
 0x629   :  { %v909_v12 = vpop.f32.mrf.mxu0 }
 0x62a   :  { %2894 = vmatprep.mubr.msk.f32.mxu1 %vm91_vm0, %v909_v12 }
 0x62b   :  { %2895 = vmatmul.mubr.msk.f32.vlgmr.msra.gmra.mxu1 %vm91_vm0, %v2882_v3 }
 0x62c   :  { %2901 = vmatpush3.msra.mxu1 %v77_v54 }
 0x62d   :  { %2902 = vmatprep.subr.mxu1 %v74_v53 }
 0x62e   :  { %2903 = vmatpush3.msra.mxu1 %v74_v53 }
 0x62f   :  { %2904 = vmatprep.subr.mxu1 %v71_v60 }
 0x630   :  { %2905 = vmatpush3.msra.mxu1 %v71_v60 }
 0x631   :  { %2906 = vmatprep.subr.mxu1 %v68_v1 }
 0x632   :  { %2907 = vmatpush3.msra.mxu1 %v68_v1 }
 0x633   :  { %2914 = vmatprep.subr.mxu1 %v3747_v59 }
 0x639   :  { %v2885_v63 = vpop.f32.mrf.mxu0 }
 0x63b   :  { %v919_v14 = vpop.f32.mrf.mxu0 }
 0x63c   :  { %2897 = vmatprep.mubr.msk.f32.mxu1 %vm91_vm0, %v919_v14 }
 0x63d   :  { %2898 = vmatmul.mubr.msk.f32.gmra.mxu1 %vm91_vm0, %v2885_v63 }
 0x6eb   :  { %v2896_v7 = vpop.f32.mrf.mxu1 }
 0x6ec   :  { %v1016_v8 = vadd.f32 %v2896_v7, %v931_v19 }
 0x6ed   :  { %v1010_v11 = vpop.f32.mrf.mxu1 }
 0x6ee   :  { %v1030_v23 = vadd.f32 %v3207_v13, %v1016_v8  ;;  %v1011_v27 = vadd.f32 %v1010_v11, %v931_v19 }
 0x6f0   :  { %v1029_v28 = vadd.f32 %v3208_v43, %v1011_v27  ;;  %v1034_v30 = vsel %vm91_vm0, %v1030_v23, 0.0 }
 0x6f2   :  { %v1033_v45 = vsel %vm91_vm0, %v1029_v28, 0.0 }
 0x6f3   :  { %v1035_v52 = vadd.f32 %v1034_v30, %v1033_v45 }
 0x6f5   :  { %v1036_v18 = vrot.slane %v1035_v52, 4 }
 0x6f7   :  { %v1037_v58 = vadd.f32 %v1036_v18, %v1035_v52 }
 0x6f9   :  { %v1038_v5 = vrot.slane %v1037_v58, 2 }
 0x6fb   :  { %v1039_v46 = vadd.f32 %v1038_v5, %v1037_v58 }
 0x6fd   :  { %v1040_v47 = vrot.slane %v1039_v46, 1  ;;  %v2899_v56 = vpop.f32.mrf.mxu1 }
 0x6fe   :  { %v1026_v61 = vadd.f32 %v2899_v56, %v931_v19 }
 0x6ff   :  { %v1041_v62 = vadd.f32 %v1040_v47, %v1039_v46  ;;  %v1020_v51 = vpop.f32.mrf.mxu1 }
 0x700   :  { %v1032_v15 = vadd.f32 %v3209_v24, %v1026_v61  ;;  %v1021_v49 = vadd.f32 %v1020_v51, %v931_v19  ;;  %v1100_v24 = vsub.s32 4, %v3379_v9 }
 0x701   :  { %v1043_v20 = vmul.f32 0.0625, %v1041_v62  ;;  %v1092_v62 = vsub.s32 3, %v3379_v9 }
 0x702   :  { %v1031_v41 = vadd.f32 %v3210_v55, %v1021_v49  ;;  %v1063_v48 = vsel %vm91_vm0, %v1032_v15, 0.0 }
 0x703   :  { %v1044_v42 = vsub.f32 %v1029_v28, %v1043_v20  ;;  %v1045_v4 = vsub.f32 %v1030_v23, %v1043_v20 }
 0x704   :  { %v1062_v50 = vsel %vm91_vm0, %v1031_v41, 0.0 }
 0x705   :  { %v1046_v6 = vmul.f32 %v1044_v42, %v1044_v42  ;;  %v1047_v0 = vmul.f32 %v1045_v4, %v1045_v4  ;;  %v1064_v21 = vadd.f32 %v1063_v48, %v1062_v50  ;;  %v1101_v50 = vrot.slane %v3751_v57, %v1100_v24 }
 0x707   :  { %v1048_v44 = vsel %vm91_vm0, %v1046_v6, 0.0  ;;  %v1049_v3 = vsel %vm91_vm0, %v1047_v0, 0.0  ;;  %v1065_v12 = vrot.slane %v1064_v21, 4 }
 0x708   :  { %v1050_v63 = vadd.f32 %v1049_v3, %v1048_v44 }
 0x709   :  { %v1066_v14 = vadd.f32 %v1065_v12, %v1064_v21 }
 0x70a   :  { %v1051_v54 = vrot.slane %v1050_v63, 4 }
 0x70b   :  { %v1067_v53 = vrot.slane %v1066_v14, 2 }
 0x70c   :  { %v1052_v60 = vadd.f32 %v1051_v54, %v1050_v63  ;;  %v82_v63 = vld [vmem:[%s4251_s2 + $0x20] sm:$0xff] }
 0x70d   :  { %v1068_v1 = vadd.f32 %v1067_v53, %v1066_v14 }
 0x70e   :  { %v1053_v19 = vrot.slane %v1052_v60, 2 }
 0x70f   :  { %v1069_v7 = vrot.slane %v1068_v1, 1 }
 0x710   :  { %v1054_v8 = vadd.f32 %v1053_v19, %v1052_v60 }
 0x711   :  { %v1070_v11 = vadd.f32 %v1069_v7, %v1068_v1  ;;  %v81_v7 = vld [vmem:[%s4251_s2 + $0x18] sm:$0xff] }
 0x712   :  { %v1055_v13 = vrot.slane %v1054_v8, 1 }
 0x713   :  { %v1071_v23 = vmul.f32 0.0625, %v1070_v11  ;;  %v79_v11 = vld [vmem:[%s4251_s2 + $0x8] sm:$0xff] }
 0x714   :  { %v1056_v27 = vadd.f32 %v1055_v13, %v1054_v8  ;;  %v80_v8 = vld [vmem:[%s4251_s2 + $0x10] sm:$0xff]  ;;  %v78_v13 = vld [vmem:[%s4251_s2] sm:$0xff] }
 0x715   :  { %v1072_v43 = vsub.f32 %v1031_v41, %v1071_v23  ;;  %v1073_v28 = vsub.f32 %v1032_v15, %v1071_v23  ;;  %v1093_v15 = vrot.slane %v3751_v57, %v1092_v62  ;;  %v1108_v23 = vsub.s32 2, %v3379_v9 }
 0x716   :  { %v1057_v30 = vmul.f32 0.0625, %v1056_v27 }
 0x717   :  { %v1074_v45 = vmul.f32 %v1072_v43, %v1072_v43  ;;  %v1075_v52 = vmul.f32 %v1073_v28, %v1073_v28  ;;  %v1109_v27 = vrot.slane %v3751_v57, %v1108_v23 }
 0x718   :  { %v1058_v18 = vadd.f32 1e-05, %v1057_v30 }
 0x719   :  { %v1076_v58 = vsel %vm91_vm0, %v1074_v45, 0.0  ;;  %v1077_v5 = vsel %vm91_vm0, %v1075_v52, 0.0 }
 0x71a   :  { %3126 = vrsqrt.f32 %v1058_v18  ;;  %v1078_v46 = vadd.f32 %v1077_v5, %v1076_v58 }
 0x71c   :  { %v1079_v47 = vrot.slane %v1078_v46, 4 }
 0x71e   :  { %v1080_v56 = vadd.f32 %v1079_v47, %v1078_v46 }
 0x720   :  { %v1081_v61 = vrot.slane %v1080_v56, 2 }
 0x722   :  { %v1082_v51 = vadd.f32 %v1081_v61, %v1080_v56 }
 0x724   :  { %v1083_v49 = vrot.slane %v1082_v51, 1 }
 0x726   :  { %v1084_v20 = vadd.f32 %v1083_v49, %v1082_v51  ;;  %v2661_v51 = vld [vmem:[%s4250_s1 + $0xa8] sm:$0xff]  ;;  %v2658_v49 = vld [vmem:[%s4250_s1 + $0x90] sm:$0xff] }
 0x727   :  { %v3127_v55 = vpop.eup %3126  ;;  %2936 = vmatprep.subr.mxu0 %v2661_v51 }
 0x728   :  { %v1060_v41 = vmul.f32 %v3127_v55, %v1044_v42  ;;  %v1061_v48 = vmul.f32 %v3127_v55, %v1045_v4  ;;  %v1085_v6 = vmul.f32 0.0625, %v1084_v20  ;;  %v84_v42 = vld [vmem:[%s4251_s2 + $0x30] sm:$0xff]  ;;  %v83_v4 = vld [vmem:[%s4251_s2 + $0x28] sm:$0xff]  ;;  %2937 = vmatpush3.msra.mxu0 %v2661_v51  ;;  %v2652_v20 = vld [vmem:[%s4250_s1 + $0x60] sm:$0xff] }
 0x729   :  { %2938 = vmatprep.subr.mxu0 %v2658_v49 }
 0x72a   :  { %v1094_v0 = vmul.f32 %v1093_v15, %v1060_v41  ;;  %v1095_v21 = vmul.f32 %v1093_v15, %v1061_v48  ;;  %v1086_v44 = vadd.f32 1e-05, %v1085_v6  ;;  %2939 = vmatpush3.msra.mxu0 %v2658_v49 }
 0x72c   :  { %v3772_v3 = vadd.f32 %v1101_v50, %v1095_v21  ;;  %3128 = vrsqrt.f32 %v1086_v44  ;;  %v3774_v12 = vadd.f32 %v1101_v50, %v1094_v0 }
 0x72e   :  { %2908 = vmatprep.mubr.msk.f32.mxu1 %vm91_vm0, %v3774_v12 }
 0x72f   :  { %2909 = vmatmul.mubr.msk.f32.vlgmr.msra.gmra.mxu1 %vm91_vm0, %v3772_v3 }
 0x730   :  { %2915 = vmatpush3.msra.mxu1 %v3747_v59 }
 0x731   :  { %2916 = vmatprep.subr.mxu1 %v84_v42 }
 0x732   :  { %2917 = vmatpush3.msra.mxu1 %v84_v42 }
 0x733   :  { %2918 = vmatprep.subr.mxu1 %v83_v4 }
 0x734   :  { %2919 = vmatpush3.msra.mxu1 %v83_v4 }
 0x735   :  { %2920 = vmatprep.subr.mxu1 %v82_v63 }
 0x736   :  { %2921 = vmatpush3.msra.mxu1 %v82_v63 }
 0x737   :  { %2922 = vmatprep.subr.mxu1 %v81_v7 }
 0x738   :  { %2923 = vmatpush3.msra.mxu1 %v81_v7 }
 0x739   :  { %v3129_v14 = vpop.eup %3128  ;;  %2924 = vmatprep.subr.mxu1 %v80_v8 }
 0x73a   :  { %v1088_v54 = vmul.f32 %v3129_v14, %v1072_v43  ;;  %v1089_v53 = vmul.f32 %v3129_v14, %v1073_v28  ;;  %2925 = vmatpush3.msra.mxu1 %v80_v8 }
 0x73b   :  { %2926 = vmatprep.subr.mxu1 %v79_v11 }
 0x73c   :  { %v1096_v60 = vmul.f32 %v1093_v15, %v1088_v54  ;;  %v1097_v1 = vmul.f32 %v1093_v15, %v1089_v53  ;;  %2927 = vmatpush3.msra.mxu1 %v79_v11  ;;  %v2655_v15 = vld [vmem:[%s4250_s1 + $0x78] sm:$0xff] }
 0x73d   :  { %2928 = vmatprep.subr.mxu1 %v78_v13  ;;  %2940 = vmatprep.subr.mxu0 %v2655_v15 }
 0x73e   :  { %v3790_v59 = vadd.f32 %v1101_v50, %v1096_v60  ;;  %v1105_v19 = vadd.f32 %v1101_v50, %v1097_v1  ;;  %2929 = vmatpush3.msra.mxu1 %v78_v13  ;;  %2941 = vmatpush3.msra.mxu0 %v2655_v15 }
 0x73f   :  { %2942 = vmatprep.subr.mxu0 %v2652_v20 }
 0x740   :  { %2911 = vmatprep.mubr.msk.f32.mxu1 %vm91_vm0, %v3790_v59  ;;  %2943 = vmatpush3.msra.mxu0 %v2652_v20 }
 0x741   :  { %2912 = vmatmul.mubr.msk.f32.gmra.mxu1 %vm91_vm0, %v1105_v19 }
 0x7ef   :  { %v2910_v43 = vpop.f32.mrf.mxu1 }
 0x7f0   :  { %v1194_v28 = vadd.f32 %v2910_v43, %v1109_v27 }
 0x7f1   :  { %v1188_v30 = vpop.f32.mrf.mxu1 }
 0x7f2   :  { %v1189_v45 = vadd.f32 %v1188_v30, %v1109_v27  ;;  %v1208_v18 = vmax.f32 %v1194_v28, 0.0 }
 0x7f4   :  { %v1207_v52 = vmax.f32 %v1189_v45, 0.0 }
 0x7f6   :  { %2930 = vmatprep.mubr.msk.f32.mxu1 %vm281_vm2, %v1207_v52 }
 0x7f7   :  { %2931 = vmatmul.mubr.msk.f32.vlgmr.msra.gmra.mxu1 %vm281_vm2, %v1208_v18 }
 0x801   :  { %v2913_v58 = vpop.f32.mrf.mxu1 }
 0x802   :  { %v1204_v5 = vadd.f32 %v2913_v58, %v1109_v27 }
 0x803   :  { %v1198_v46 = vpop.f32.mrf.mxu1 }
 0x804   :  { %v1199_v47 = vadd.f32 %v1198_v46, %v1109_v27  ;;  %v1210_v61 = vmax.f32 %v1204_v5, 0.0 }
 0x806   :  { %v1209_v56 = vmax.f32 %v1199_v47, 0.0 }
 0x808   :  { %2933 = vmatprep.mubr.msk.f32.mxu1 %vm281_vm2, %v1209_v56 }
 0x809   :  { %2934 = vmatmul.mubr.msk.f32.gmra.mxu1 %vm281_vm2, %v1210_v61 }
 0x8b7   :  { %v2932_v55 = vpop.f32.mrf.mxu1 }
 0x8b8   :  { %v1309_v41 = vadd.f32 %v2932_v55, %v3772_v3 }
 0x8b9   :  { %v1289_v48 = vpop.f32.mrf.mxu1 }
 0x8ba   :  { %v1308_v50 = vadd.f32 %v1289_v48, %v3774_v12  ;;  %v1313_v6 = vsel %vm91_vm0, %v1309_v41, 0.0 }
 0x8bc   :  { %v1312_v0 = vsel %vm91_vm0, %v1308_v50, 0.0 }
 0x8bd   :  { %v1314_v21 = vadd.f32 %v1313_v6, %v1312_v0 }
 0x8bf   :  { %v1315_v44 = vrot.slane %v1314_v21, 4 }
 0x8c1   :  { %v1316_v42 = vadd.f32 %v1315_v44, %v1314_v21 }
 0x8c3   :  { %v1317_v4 = vrot.slane %v1316_v42, 2 }
 0x8c5   :  { %v1318_v63 = vadd.f32 %v1317_v4, %v1316_v42 }
 0x8c7   :  { %v1319_v14 = vrot.slane %v1318_v63, 1 }
 0x8c9   :  { %v1320_v54 = vadd.f32 %v1319_v14, %v1318_v63  ;;  %v2935_v53 = vpop.f32.mrf.mxu1 }
 0x8ca   :  { %v1311_v60 = vadd.f32 %v2935_v53, %v1105_v19 }
 0x8cb   :  { %v1321_v1 = vmul.f32 0.0625, %v1320_v54  ;;  %v1299_v7 = vpop.f32.mrf.mxu1  ;;  %v1370_v54 = vsub.s32 5, %v3379_v9 }
 0x8cc   :  { %v1310_v3 = vadd.f32 %v1299_v7, %v3790_v59  ;;  %v1341_v12 = vsel %vm91_vm0, %v1311_v60, 0.0 }
 0x8cd   :  { %v1322_v8 = vsub.f32 %v1308_v50, %v1321_v1  ;;  %v1323_v11 = vsub.f32 %v1309_v41, %v1321_v1  ;;  %v1378_v1 = vsub.s32 6, %v3379_v9 }
 0x8ce   :  { %v1340_v13 = vsel %vm91_vm0, %v1310_v3, 0.0 }
 0x8cf   :  { %v1324_v27 = vmul.f32 %v1322_v8, %v1322_v8  ;;  %v1325_v43 = vmul.f32 %v1323_v11, %v1323_v11  ;;  %v1342_v28 = vadd.f32 %v1341_v12, %v1340_v13 }
 0x8d1   :  { %v1326_v30 = vsel %vm91_vm0, %v1324_v27, 0.0  ;;  %v1327_v45 = vsel %vm91_vm0, %v1325_v43, 0.0  ;;  %v1343_v52 = vrot.slane %v1342_v28, 4  ;;  %v1379_v43 = vrot.slane %v3751_v57, %v1378_v1 }
 0x8d2   :  { %v1328_v18 = vadd.f32 %v1327_v45, %v1326_v30 }
 0x8d3   :  { %v1344_v19 = vadd.f32 %v1343_v52, %v1342_v28 }
 0x8d4   :  { %v1329_v58 = vrot.slane %v1328_v18, 4 }
 0x8d5   :  { %v1345_v5 = vrot.slane %v1344_v19, 2 }
 0x8d6   :  { %v1330_v46 = vadd.f32 %v1329_v58, %v1328_v18 }
 0x8d7   :  { %v1346_v59 = vadd.f32 %v1345_v5, %v1344_v19 }
 0x8d8   :  { %v1331_v47 = vrot.slane %v1330_v46, 2 }
 0x8d9   :  { %v1347_v56 = vrot.slane %v1346_v59, 1 }
 0x8da   :  { %v1332_v61 = vadd.f32 %v1331_v47, %v1330_v46  ;;  %v3862_v47 = vld [vmem:[#allocation5 + $0x8] sm:$0xff] }
 0x8db   :  { %v1348_v51 = vadd.f32 %v1347_v56, %v1346_v59  ;;  %v1411_v56 = vrot.slane %v3862_v47, %v89_v10 }
 0x8dc   :  { %v1333_v49 = vrot.slane %v1332_v61, 1 }
 0x8dd   :  { %v1349_v15 = vmul.f32 0.0625, %v1348_v51 }
 0x8de   :  { %v1334_v20 = vadd.f32 %v1333_v49, %v1332_v61 }
 0x8df   :  { %v1350_v55 = vsub.f32 %v1310_v3, %v1349_v15  ;;  %v1351_v41 = vsub.f32 %v1311_v60, %v1349_v15  ;;  %v1371_v60 = vrot.slane %v3751_v57, %v1370_v54 }
 0x8e0   :  { %v1335_v48 = vmul.f32 0.0625, %v1334_v20 }
 0x8e1   :  { %v1352_v50 = vmul.f32 %v1350_v55, %v1350_v55  ;;  %v1353_v6 = vmul.f32 %v1351_v41, %v1351_v41 }
 0x8e2   :  { %v1336_v0 = vadd.f32 1e-05, %v1335_v48 }
 0x8e3   :  { %v1354_v21 = vsel %vm91_vm0, %v1352_v50, 0.0  ;;  %v1355_v44 = vsel %vm91_vm0, %v1353_v6, 0.0 }
 0x8e4   :  { %3130 = vrsqrt.f32 %v1336_v0  ;;  %v1356_v42 = vadd.f32 %v1355_v44, %v1354_v21 }
 0x8e6   :  { %v1357_v4 = vrot.slane %v1356_v42, 4 }
 0x8e8   :  { %v1358_v63 = vadd.f32 %v1357_v4, %v1356_v42 }
 0x8ea   :  { %v1359_v14 = vrot.slane %v1358_v63, 2 }
 0x8ec   :  { %v1360_v53 = vadd.f32 %v1359_v14, %v1358_v63 }
 0x8ee   :  { %v1361_v7 = vrot.slane %v1360_v53, 1 }
 0x8f0   :  { %v1362_v3 = vadd.f32 %v1361_v7, %v1360_v53 }
 0x8f1   :  { %v3131_v12 = vpop.eup %3130 }
 0x8f2   :  { %v1338_v13 = vmul.f32 %v3131_v12, %v1322_v8  ;;  %v1339_v27 = vmul.f32 %v3131_v12, %v1323_v11  ;;  %v1363_v28 = vmul.f32 0.0625, %v1362_v3 }
 0x8f4   :  { %v1372_v30 = vmul.f32 %v1371_v60, %v1338_v13  ;;  %v1373_v45 = vmul.f32 %v1371_v60, %v1339_v27  ;;  %v1364_v52 = vadd.f32 1e-05, %v1363_v28 }
 0x8f6   :  { %v3846_v18 = vadd.f32 %v1379_v43, %v1373_v45  ;;  %3132 = vrsqrt.f32 %v1364_v52  ;;  %v3848_v19 = vadd.f32 %v1379_v43, %v1372_v30 }
 0x8f8   :  { %2944 = vmatprep.mubr.msk.f32.mxu0 %vm91_vm0, %v3848_v19 }
 0x8f9   :  { %2945 = vmatmul.mubr.msk.f32.vlgmr.msra.gmra.mxu0 %vm91_vm0, %v3846_v18 }
 0x903   :  { %v3133_v8 = vpop.eup %3132 }
 0x904   :  { %v1366_v11 = vmul.f32 %v3133_v8, %v1350_v55  ;;  %v1367_v58 = vmul.f32 %v3133_v8, %v1351_v41 }
 0x906   :  { %v1374_v5 = vmul.f32 %v1371_v60, %v1366_v11  ;;  %v1375_v57 = vmul.f32 %v1371_v60, %v1367_v58 }
 0x908   :  { %v3854_v46 = vadd.f32 %v1379_v43, %v1374_v5  ;;  %v3856_v59 = vadd.f32 %v1379_v43, %v1375_v57  ;;  %v3211_v5 = vld [vmem:[#allocation7 + $0x18] sm:$0xff] }
 0x90a   :  { %2947 = vmatprep.mubr.msk.f32.mxu0 %vm91_vm0, %v3854_v46 }
 0x90b   :  { %2948 = vmatmul.mubr.msk.f32.gmra.mxu0 %vm91_vm0, %v3856_v59 }
 0x9b9   :  { %v2946_v61 = vpop.f32.mrf.mxu0 }
 0x9ba   :  { %v3867_v51 = vadd.f32 %v2946_v61, %v1411_v56 }
 0x9bb   :  { %v1490_v49 = vpop.f32.mrf.mxu0 }
 0x9bc   :  { %v3869_v15 = vadd.f32 %v1490_v49, %v1411_v56  ;;  %1515 = vrot.lane.b32.xlu1 %v3867_v51, %s3311_s15  ;;  %v2003_v4 = vmul.f32 %v3867_v51, %v3454_v16  ;;  %v3212_v49 = vld [vmem:[#allocation7 + $0x10] sm:$0xff] }
 0x9be   :  { %1513 = vrot.lane.b32.xlu0 %v3869_v15, %s3311_s15  ;;  %2958 = vmatprep.mubr.msk.f32.mxu1 %vm91_vm0, %v3869_v15 }
 0x9cb   :  { %v2949_v20 = vpop.f32.mrf.mxu0 }
 0x9cc   :  { %v3877_v55 = vadd.f32 %v2949_v20, %v1411_v56 }
 0x9cd   :  { %v1500_v41 = vpop.f32.mrf.mxu0 }
 0x9ce   :  { %v3879_v10 = vadd.f32 %v1500_v41, %v1411_v56  ;;  %1519 = vrot.lane.b32.xlu1 %v3877_v55, %s3311_s15  ;;  %v2005_v44 = vmul.f32 %v3877_v55, %v3456_v17  ;;  %v2001_v14 = vmul.f32 %v3877_v55, %v3471_v25  ;;  %v2002_v25 = vmul.f32 %v3869_v15, %v3477_v26 }
 0x9d0   :  { %1517 = vrot.lane.b32.xlu0 %v3879_v10, %s3311_s15  ;;  %v2004_v16 = vmul.f32 %v3879_v10, %v3463_v22  ;;  %v2000_v53 = vmul.f32 %v3879_v10, %v3485_v29 }
 0xa2e   :  { %v1516_v50 = vpop.permute.xlu1 %1515 }
 0xa30   :  { %v1514_v48 = vpop.permute.xlu0 %1513 }
 0xa31   :  { %1525 = vxpose.xlu0.b32.start [1/4] (short) (narrow) %v1514_v48, 32 }
 0xa35   :  { %1526 = vxpose.xlu0.b32.cont [2/4] (short) (narrow) %v1516_v50, 32  ;;  %v3213_v50 = vld [vmem:[#allocation7 + $0x8] sm:$0xff] }
 0xa40   :  { %v1520_v0 = vpop.permute.xlu1 %1519 }
 0xa42   :  { %v1518_v6 = vpop.permute.xlu0 %1517 }
 0xa43   :  { %1527 = vxpose.xlu0.b32.cont [3/4] (short) (narrow) %v1518_v6, 32 }
 0xa47   :  { %1528 = vxpose.xlu0.b32.end [4/4] (short) (narrow) %v1520_v0, 32 }
 0xab7   :  { %v1541_v21 = vpop.trf.xlu0 }
 0xab8   :  { %1585 = vrot.lane.b32.xlu0 %v1541_v21, %s3311_s15  ;;  %1561 = vrot.lane.b32.xlu1 %v1541_v21, %s3312_s16 }
 0xabb   :  { %v1542_v42 = vpop.trf.xlu0 }
 0xabc   :  { %2052 = vrot.lane.b32.xlu0 %v2005_v44, %s3313_s17  ;;  %1563 = vrot.lane.b32.xlu1 %v1542_v42, %s3312_s16 }
 0xabf   :  { %v1543_v63 = vpop.trf.xlu0 }
 0xac0   :  { %2048 = vrot.lane.b32.xlu0 %v2003_v4, %s3313_s17  ;;  %1575 = vrot.lane.b32.xlu1 %v1542_v42, %s3313_s17 }
 0xac3   :  { %v1544_v17 = vpop.trf.xlu0 }
 0xac4   :  { %2044 = vrot.lane.b32.xlu0 %v2001_v14, %s3313_s17  ;;  %1565 = vrot.lane.b32.xlu1 %v1543_v63, %s3312_s16 }
 0xac8   :  { %1577 = vrot.lane.b32.xlu1 %v1543_v63, %s3313_s17 }
 0xacc   :  { %1589 = vrot.lane.b32.xlu1 %v1543_v63, %s3311_s15 }
 0xad0   :  { %1567 = vrot.lane.b32.xlu1 %v1544_v17, %s3312_s16 }
 0xad4   :  { %1579 = vrot.lane.b32.xlu1 %v1544_v17, %s3313_s17 }
 0xad8   :  { %1591 = vrot.lane.b32.xlu1 %v1544_v17, %s3311_s15 }
 0xadc   :  { %1587 = vrot.lane.b32.xlu1 %v1542_v42, %s3311_s15 }
 0xae0   :  { %1573 = vrot.lane.b32.xlu1 %v1541_v21, %s3313_s17 }
 0xae4   :  { %2050 = vrot.lane.b32.xlu1 %v2004_v16, %s3313_s17 }
 0xae8   :  { %2046 = vrot.lane.b32.xlu1 %v2002_v25, %s3313_s17 }
 0xaec   :  { %2042 = vrot.lane.b32.xlu1 %v2000_v53, %s3313_s17 }
 0xb2a   :  { %v1562_v7 = vpop.permute.xlu1 %1561  ;;  %v1586_v60 = vpop.permute.xlu0 %1585 }
 0xb2b   :  { %v1597_v0 = vsel %vm91_vm0, %v1541_v21, %v1562_v7 }
 0xb2e   :  { %v1564_v3 = vpop.permute.xlu1 %1563  ;;  %v2053_v12 = vpop.permute.xlu0 %2052 }
 0xb2f   :  { %2964 = vmatprep.subr.mxu0 %v2053_v12  ;;  %v1598_v56 = vsel %vm91_vm0, %v1542_v42, %v1564_v3 }
 0xb30   :  { %2965 = vmatpush3.msra.mxu0 %v2053_v12 }
 0xb32   :  { %v1576_v13 = vpop.permute.xlu1 %1575 }
 0xb33   :  { %v1602_v61 = vsel %vm281_vm2, %v1598_v56, %v1576_v13  ;;  %v3216_v13 = vld [vmem:[#allocation7 + $0x20] sm:$0xff] }
 0xb36   :  { %v1566_v22 = vpop.permute.xlu1 %1565 }
 0xb37   :  { %v1599_v26 = vsel %vm91_vm0, %v1543_v63, %v1566_v22  ;;  %v3214_v63 = vld [vmem:[#allocation7] sm:$0xff] }
 0xb3a   :  { %v1578_v27 = vpop.permute.xlu1 %1577 }
 0xb3b   :  { %v1603_v29 = vsel %vm281_vm2, %v1599_v26, %v1578_v27 }
 0xb3e   :  { %v1590_v43 = vpop.permute.xlu1 %1589 }
 0xb3f   :  { %v1607_v11 = vsel %vm286_vm1, %v1603_v29, %v1590_v43 }
 0xb40   :  { %v1611_v20 = vmul.f32 %v3212_v49, %v1607_v11  ;;  %v3218_v49 = vld [vmem:[#allocation7 + $0x30] sm:$0xff] }
 0xb42   :  { %v1568_v28 = vpop.permute.xlu1 %1567 }
 0xb43   :  { %v1600_v45 = vsel %vm91_vm0, %v1544_v17, %v1568_v28  ;;  %v2049_v17 = vpop.permute.xlu0 %2048 }
 0xb46   :  { %v1580_v30 = vpop.permute.xlu1 %1579 }
 0xb47   :  { %v1604_v52 = vsel %vm281_vm2, %v1600_v45, %v1580_v30  ;;  %v2045_v25 = vpop.permute.xlu0 %2044  ;;  %v3217_v30 = vld [vmem:[#allocation7 + $0x38] sm:$0xff] }
 0xb4a   :  { %v1592_v8 = vpop.permute.xlu1 %1591 }
 0xb4b   :  { %v1608_v58 = vsel %vm286_vm1, %v1604_v52, %v1592_v8 }
 0xb4c   :  { %v1612_v57 = vmul.f32 %v3211_v5, %v1608_v58 }
 0xb4e   :  { %2950 = vmatprep.subr.mxu1 %v1612_v57  ;;  %v1588_v41 = vpop.permute.xlu1 %1587 }
 0xb4f   :  { %v1606_v48 = vsel %vm286_vm1, %v1602_v61, %v1588_v41  ;;  %2951 = vmatpush3.msra.mxu1 %v1612_v57 }
 0xb50   :  { %v1610_v6 = vmul.f32 %v3213_v50, %v1606_v48  ;;  %2952 = vmatprep.subr.mxu1 %v1611_v20 }
 0xb51   :  { %2953 = vmatpush3.msra.mxu1 %v1611_v20 }
 0xb52   :  { %2954 = vmatprep.subr.mxu1 %v1610_v6  ;;  %v1574_v44 = vpop.permute.xlu1 %1573 }
 0xb53   :  { %v1601_v4 = vsel %vm281_vm2, %v1597_v0, %v1574_v44  ;;  %2955 = vmatpush3.msra.mxu1 %v1610_v6 }
 0xb54   :  { %v1605_v42 = vsel %vm286_vm1, %v1601_v4, %v1586_v60  ;;  %v3215_v60 = vld [vmem:[#allocation7 + $0x28] sm:$0xff] }
 0xb55   :  { %v1609_v14 = vmul.f32 %v3214_v63, %v1605_v42 }
 0xb56   :  { %v2051_v16 = vpop.permute.xlu1 %2050 }
 0xb57   :  { %2956 = vmatprep.subr.mxu1 %v1609_v14  ;;  %2966 = vmatprep.subr.mxu0 %v2051_v16 }
 0xb58   :  { %2957 = vmatpush3.msra.mxu1 %v1609_v14  ;;  %2967 = vmatpush3.msra.mxu0 %v2051_v16 }
 0xb59   :  { %2959 = vmatmul.mubr.msk.f32.vlgmr.msra.gmra.mxu1 %vm91_vm0, %v3867_v51  ;;  %2968 = vmatprep.subr.mxu0 %v2049_v17 }
 0xb5a   :  { %2961 = vmatprep.mubr.msk.f32.mxu1 %vm91_vm0, %v3879_v10  ;;  %2969 = vmatpush3.msra.mxu0 %v2049_v17  ;;  %v2047_v21 = vpop.permute.xlu1 %2046 }
 0xb5b   :  { %2970 = vmatprep.subr.mxu0 %v2047_v21 }
 0xb5c   :  { %2971 = vmatpush3.msra.mxu0 %v2047_v21 }
 0xb5d   :  { %2962 = vmatmul.mubr.msk.f32.gmra.mxu1 %vm91_vm0, %v3877_v55  ;;  %2972 = vmatprep.subr.mxu0 %v2045_v25 }
 0xb5e   :  { %2973 = vmatpush3.msra.mxu0 %v2045_v25  ;;  %v2043_v53 = vpop.permute.xlu1 %2042 }
 0xb5f   :  { %2974 = vmatprep.subr.mxu0 %v2043_v53 }
 0xb60   :  { %2975 = vmatpush3.msra.mxu0 %v2043_v53 }
 0xc19   :  { %v2960_v7 = vpop.f32.mrf.mxu1 }
 0xc1a   :  { %v3933_v3 = vadd.f32 %v3215_v60, %v2960_v7 }
 0xc1b   :  { %v1687_v12 = vpop.f32.mrf.mxu1 }
 0xc1c   :  { %v3935_v22 = vadd.f32 %v3216_v13, %v1687_v12  ;;  %v1709_v27 = vsel %vm91_vm0, %v3933_v3, -inf  ;;  %v1765_v43 = vsel %vm452_vm3, %v3933_v3, -inf  ;;  %v1837_v29 = vsel %vm525_vm4, %v3933_v3, -inf }
 0xc1d   :  { %1710 = vmax.xlane.f32.xlu0 %v1709_v27  ;;  %v2963_v28 = vpop.f32.mrf.mxu1  ;;  %1766 = vmax.xlane.f32.xlu1 %v1765_v43  ;;  %v1909_v8 = vsel %vm598_vm5, %v3933_v3, -inf }
 0xc1e   :  { %v3941_v26 = vadd.f32 %v3217_v30, %v2963_v28  ;;  %v1834_v45 = vsel %vm525_vm4, %v3935_v22, -inf  ;;  %v1762_v58 = vsel %vm452_vm3, %v3935_v22, -inf  ;;  %v1906_v5 = vsel %vm598_vm5, %v3935_v22, -inf }
 0xc1f   :  { %v1706_v57 = vsel %vm91_vm0, %v3935_v22, -inf  ;;  %v1697_v61 = vpop.f32.mrf.mxu1 }
 0xc20   :  { %v1915_v52 = vsel %vm598_vm5, %v3941_v26, -inf  ;;  %v1715_v11 = vsel %vm91_vm0, %v3941_v26, -inf  ;;  %v1771_v56 = vsel %vm452_vm3, %v3941_v26, -inf  ;;  %v3961_v20 = vadd.f32 %v3218_v49, %v1697_v61 }
 0xc21   :  { %1835 = vmax.xlane.f32.xlu0 %v1834_v45  ;;  %1838 = vmax.xlane.f32.xlu1 %v1837_v29  ;;  %v1843_v41 = vsel %vm525_vm4, %v3941_v26, -inf }
 0xc22   :  { %v1768_v48 = vsel %vm452_vm3, %v3961_v20, -inf  ;;  %v1840_v50 = vsel %vm525_vm4, %v3961_v20, -inf  ;;  %v1912_v6 = vsel %vm598_vm5, %v3961_v20, -inf  ;;  %v1712_v0 = vsel %vm91_vm0, %v3961_v20, -inf }
 0xc25   :  { %1916 = vmax.xlane.f32.xlu0 %v1915_v52  ;;  %1910 = vmax.xlane.f32.xlu1 %v1909_v8 }
 0xc29   :  { %1716 = vmax.xlane.f32.xlu0 %v1715_v11  ;;  %1763 = vmax.xlane.f32.xlu1 %v1762_v58 }
 0xc2d   :  { %1907 = vmax.xlane.f32.xlu1 %v1906_v5 }
 0xc31   :  { %1707 = vmax.xlane.f32.xlu1 %v1706_v57 }
 0xc35   :  { %1772 = vmax.xlane.f32.xlu1 %v1771_v56 }
 0xc39   :  { %1844 = vmax.xlane.f32.xlu1 %v1843_v41 }
 0xc3d   :  { %1769 = vmax.xlane.f32.xlu1 %v1768_v48 }
 0xc41   :  { %1841 = vmax.xlane.f32.xlu1 %v1840_v50 }
 0xc45   :  { %1913 = vmax.xlane.f32.xlu1 %v1912_v6 }
 0xc49   :  { %1713 = vmax.xlane.f32.xlu1 %v1712_v0 }
 0xca6   :  { %v1767_v44 = vpop.xlane.xlu1 %1766  ;;  %v1711_v14 = vpop.xlane.xlu0 %1710 }
 0xca7   :  { %v1775_v4 = vsub.f32 %v3933_v3, %v1767_v44  ;;  %v1719_v11 = vsub.f32 %v3933_v3, %v1711_v14 }
 0xca9   :  { %v1780_v42 = vmul.f32 1.442695, %v1775_v4  ;;  %v1724_v41 = vmul.f32 1.442695, %v1719_v11 }
 0xcaa   :  { %v1839_v63 = vpop.xlane.xlu1 %1838  ;;  %v1836_v53 = vpop.xlane.xlu0 %1835 }
 0xcab   :  { %v1847_v17 = vsub.f32 %v3933_v3, %v1839_v63  ;;  %3134 = vpow2.f32 %v1780_v42  ;;  %v1846_v13 = vsub.f32 %v3935_v22, %v1836_v53 }
 0xcad   :  { %v1852_v16 = vmul.f32 1.442695, %v1847_v17  ;;  %v1850_v28 = vmul.f32 1.442695, %v1846_v13 }
 0xcae   :  { %v1911_v21 = vpop.xlane.xlu1 %1910  ;;  %v1917_v58 = vpop.xlane.xlu0 %1916 }
 0xcaf   :  { %v1919_v25 = vsub.f32 %v3933_v3, %v1911_v21  ;;  %3136 = vpow2.f32 %v1852_v16  ;;  %v1921_v61 = vsub.f32 %v3941_v26, %v1917_v58 }
 0xcb1   :  { %v1924_v7 = vmul.f32 1.442695, %v1919_v25  ;;  %v1928_v3 = vmul.f32 1.442695, %v1921_v61  ;;  %v1992_v61 = vmul.f32 %v3879_v10, %v3504_v38 }
 0xcb2   :  { %v1764_v60 = vpop.xlane.xlu1 %1763  ;;  %v1717_v16 = vpop.xlane.xlu0 %1716 }
 0xcb3   :  { %v1774_v12 = vsub.f32 %v3935_v22, %v1764_v60  ;;  %3138 = vpow2.f32 %v1924_v7  ;;  %v1721_v21 = vsub.f32 %v3941_v26, %v1717_v16 }
 0xcb5   :  { %v1778_v27 = vmul.f32 1.442695, %v1774_v12  ;;  %v1728_v25 = vmul.f32 1.442695, %v1721_v21  ;;  %v1993_v21 = vmul.f32 %v3877_v55, %v3502_v37 }
 0xcb6   :  { %v1908_v43 = vpop.xlane.xlu1 %1907 }
 0xcb7   :  { %3140 = vpow2.f32 %v1778_v27  ;;  %v1918_v14 = vsub.f32 %v3935_v22, %v1908_v43 }
 0xcb8   :  { %v3978_v30 = vpop.eup %3134  ;;  %3142 = vpow2.f32 %v1850_v28 }
 0xcb9   :  { %1792 = vrot.lane.b32.xlu0 %v3978_v30, %s3311_s15  ;;  %v1922_v17 = vmul.f32 1.442695, %v1918_v14 }
 0xcba   :  { %v1708_v45 = vpop.xlane.xlu1 %1707 }
 0xcbb   :  { %v1718_v7 = vsub.f32 %v3935_v22, %v1708_v45  ;;  %v1996_v45 = vmul.f32 %v3879_v10, %v3496_v34  ;;  %v1999_v10 = vmul.f32 %v3867_v51, %v3490_v31 }
 0xcbc   :  { %v3982_v29 = vpop.eup %3136 }
 0xcbd   :  { %1864 = vrot.lane.b32.xlu1 %v3982_v29, %s3313_s17  ;;  %v1722_v12 = vmul.f32 1.442695, %v1718_v7 }
 0xcbe   :  { %v1773_v52 = vpop.xlane.xlu1 %1772 }
 0xcbf   :  { %v1777_v8 = vsub.f32 %v3941_v26, %v1773_v52 }
 0xcc0   :  { %v3988_v5 = vpop.eup %3138 }
 0xcc1   :  { %v1784_v57 = vmul.f32 1.442695, %v1777_v8  ;;  %1936 = vrot.lane.b32.xlu1 %v3988_v5, %s3312_s16 }
 0xcc2   :  { %v1845_v56 = vpop.xlane.xlu1 %1844 }
 0xcc3   :  { %3144 = vpow2.f32 %v1784_v57  ;;  %v1849_v49 = vsub.f32 %v3941_v26, %v1845_v56  ;;  %v1998_v26 = vmul.f32 %v3869_v15, %v3492_v32  ;;  %v1994_v32 = vmul.f32 %v3869_v15, %v3500_v36 }
 0xcc4   :  { %v3994_v48 = vpop.eup %3140 }
 0xcc5   :  { %v1856_v50 = vmul.f32 1.442695, %v1849_v49  ;;  %1790 = vrot.lane.b32.xlu1 %v3994_v48, %s3311_s15  ;;  %v3998_v6 = vpop.eup %3142 }
 0xcc6   :  { %v1770_v27 = vpop.xlane.xlu1 %1769 }
 0xcc7   :  { %3146 = vpow2.f32 %v1856_v50  ;;  %v1776_v22 = vsub.f32 %v3961_v20, %v1770_v27 }
 0xcc8   :  { %3148 = vpow2.f32 %v1724_v41 }
 0xcc9   :  { %1862 = vrot.lane.b32.xlu1 %v3998_v6, %s3313_s17  ;;  %3150 = vpow2.f32 %v1928_v3  ;;  %v1782_v8 = vmul.f32 1.442695, %v1776_v22 }
 0xcca   :  { %3152 = vpow2.f32 %v1922_v17  ;;  %v1842_v28 = vpop.xlane.xlu1 %1841  ;;  %v1995_v17 = vmul.f32 %v3867_v51, %v3498_v35 }
 0xccb   :  { %3154 = vpow2.f32 %v1728_v25  ;;  %v1848_v11 = vsub.f32 %v3961_v20, %v1842_v28 }
 0xccc   :  { %3156 = vpow2.f32 %v1722_v12 }
 0xccd   :  { %3158 = vpow2.f32 %v1782_v8  ;;  %v1854_v57 = vmul.f32 1.442695, %v1848_v11 }
 0xcce   :  { %v1914_v58 = vpop.xlane.xlu1 %1913 }
 0xccf   :  { %v1920_v56 = vsub.f32 %v3961_v20, %v1914_v58  ;;  %3160 = vpow2.f32 %v1854_v57 }
 0xcd0   :  { %v4002_v0 = vpop.eup %3144 }
 0xcd1   :  { %1796 = vrot.lane.b32.xlu1 %v4002_v0, %s3311_s15  ;;  %v1926_v34 = vmul.f32 1.442695, %v1920_v56 }
 0xcd2   :  { %v1714_v49 = vpop.xlane.xlu1 %1713 }
 0xcd3   :  { %3162 = vpow2.f32 %v1926_v34  ;;  %v1720_v36 = vsub.f32 %v3961_v20, %v1714_v49  ;;  %v1997_v20 = vmul.f32 %v3877_v55, %v3494_v33 }
 0xcd4   :  { %v4006_v44 = vpop.eup %3146 }
 0xcd5   :  { %v4008_v4 = vpop.eup %3148  ;;  %1868 = vrot.lane.b32.xlu1 %v4006_v44, %s3313_s17  ;;  %v1726_v3 = vmul.f32 1.442695, %v1720_v36 }
 0xcd6   :  { %v4012_v42 = vpop.eup %3150  ;;  %v1733_v63 = vsel %vm91_vm0, %v4008_v4, 0.0 }
 0xcd7   :  { %v4020_v53 = vpop.eup %3152  ;;  %3164 = vpow2.f32 %v1726_v3 }
 0xcd8   :  { %1734 = vadd.xlane.f32.xlu0 %v1733_v63  ;;  %v4025_v60 = vpop.eup %3154 }
 0xcd9   :  { %1940 = vrot.lane.b32.xlu1 %v4012_v42, %s3312_s16  ;;  %v1739_v13 = vsel %vm91_vm0, %v4025_v60, 0.0  ;;  %v4029_v43 = vpop.eup %3156 }
 0xcda   :  { %v1730_v52 = vsel %vm91_vm0, %v4029_v43, 0.0  ;;  %v4048_v41 = vpop.eup %3158 }
 0xcdc   :  { %v4053_v50 = vpop.eup %3160 }
 0xce0   :  { %v4057_v38 = vpop.eup %3162 }
 0xce4   :  { %v4070_v16 = vpop.eup %3164 }
 0xce5   :  { %v1736_v25 = vsel %vm91_vm0, %v4070_v16, 0.0 }
 0xcee   :  { %1934 = vrot.lane.b32.xlu0 %v4020_v53, %s3312_s16 }
 0xcfd   :  { %1740 = vadd.xlane.f32.xlu1 %v1739_v13 }
 0xd0d   :  { %1731 = vadd.xlane.f32.xlu0 %v1730_v52 }
 0xd0e   :  { %2038 = vrot.lane.b32.xlu1 %v1998_v26, %s3313_s17 }
 0xd12   :  { %2034 = vrot.lane.b32.xlu1 %v1996_v45, %s3313_s17 }
 0xd16   :  { %2030 = vrot.lane.b32.xlu1 %v1994_v32, %s3313_s17 }
 0xd1a   :  { %2026 = vrot.lane.b32.xlu1 %v1992_v61, %s3313_s17 }
 0xd23   :  { %1794 = vrot.lane.b32.xlu0 %v4048_v41, %s3311_s15 }
 0xd27   :  { %1866 = vrot.lane.b32.xlu0 %v4053_v50, %s3313_s17 }
 0xd2b   :  { %1938 = vrot.lane.b32.xlu0 %v4057_v38, %s3312_s16  ;;  %v1793_v12 = vpop.permute.xlu0 %1792 }
 0xd2c   :  { %v1805_v13 = vsel %vm91_vm0, %v1793_v12, 0.0 }
 0xd2f   :  { %2040 = vrot.lane.b32.xlu0 %v1999_v10, %s3313_s17  ;;  %v1865_v63 = vpop.permute.xlu1 %1864 }
 0xd30   :  { %v1877_v37 = vsel %vm91_vm0, %v1865_v63, 0.0 }
 0xd33   :  { %2036 = vrot.lane.b32.xlu0 %v1997_v20, %s3313_s17  ;;  %v1937_v14 = vpop.permute.xlu1 %1936 }
 0xd34   :  { %v1949_v55 = vsel %vm91_vm0, %v1937_v14, 0.0 }
 0xd37   :  { %2032 = vrot.lane.b32.xlu0 %v1995_v17, %s3313_s17  ;;  %v1791_v31 = vpop.permute.xlu1 %1790 }
 0xd38   :  { %v1802_v33 = vsel %vm91_vm0, %v1791_v31, 0.0  ;;  %v1991_v31 = vmul.f32 %v3867_v51, %v3506_v39  ;;  %v2659_v39 = vld [vmem:[%s4250_s1 + $0x98] sm:$0xff] }
 0xd3b   :  { %2028 = vrot.lane.b32.xlu0 %v1993_v21, %s3313_s17  ;;  %v1863_v7 = vpop.permute.xlu1 %1862 }
 0xd3c   :  { %v1874_v35 = vsel %vm91_vm0, %v1863_v7, 0.0 }
 0xd3e   :  { %1737 = vadd.xlane.f32.xlu1 %v1736_v25 }
 0xd42   :  { %1803 = vadd.xlane.f32.xlu1 %v1802_v33  ;;  %v1990_v33 = vmul.f32 %v3869_v15, %v3508_v40 }
 0xd43   :  { %v1797_v27 = vpop.permute.xlu1 %1796 }
 0xd44   :  { %v1811_v52 = vsel %vm91_vm0, %v1797_v27, 0.0 }
 0xd46   :  { %1875 = vadd.xlane.f32.xlu1 %v1874_v35  ;;  %v2662_v35 = vld [vmem:[%s4250_s1 + $0xb0] sm:$0xff] }
 0xd47   :  { %v1869_v26 = vpop.permute.xlu1 %1868  ;;  %3002 = vmatprep.subr.mxu1 %v2662_v35 }
 0xd48   :  { %v1883_v11 = vsel %vm91_vm0, %v1869_v26, 0.0  ;;  %3003 = vmatpush3.msra.mxu1 %v2662_v35 }
 0xd49   :  { %3004 = vmatprep.subr.mxu1 %v2659_v39 }
 0xd4a   :  { %3005 = vmatpush3.msra.mxu1 %v2659_v39 }
 0xd4b   :  { %v1941_v8 = vpop.permute.xlu1 %1940 }
 0xd4c   :  { %v1955_v58 = vsel %vm91_vm0, %v1941_v8, 0.0 }
 0xd5a   :  { %1806 = vadd.xlane.f32.xlu0 %v1805_v13 }
 0xd5e   :  { %1878 = vadd.xlane.f32.xlu0 %v1877_v37 }
 0xd61   :  { %v4082_v28 = vpop.xlane.xlu0 %1734 }
 0xd62   :  { %1950 = vadd.xlane.f32.xlu0 %v1949_v55 }
 0xd65   :  { %v1935_v22 = vpop.permute.xlu0 %1934 }
 0xd66   :  { %v1946_v45 = vsel %vm91_vm0, %v1935_v22, 0.0  ;;  %1812 = vadd.xlane.f32.xlu0 %v1811_v52 }
 0xd67   :  { %1947 = vadd.xlane.f32.xlu1 %v1946_v45 }
 0xd6a   :  { %1884 = vadd.xlane.f32.xlu0 %v1883_v11 }
 0xd6b   :  { %1956 = vadd.xlane.f32.xlu1 %v1955_v58 }
 0xd86   :  { %v4089_v61 = vpop.xlane.xlu1 %1740 }
 0xd8a   :  { %v2039_v36 = vpop.permute.xlu1 %2038 }
 0xd8e   :  { %v2035_v20 = vpop.permute.xlu1 %2034 }
 0xd92   :  { %v2031_v17 = vpop.permute.xlu1 %2030 }
 0xd96   :  { %v1732_v32 = vpop.xlane.xlu0 %1731  ;;  %v2027_v7 = vpop.permute.xlu1 %2026 }
 0xd9a   :  { %v1795_v57 = vpop.permute.xlu0 %1794 }
 0xd9b   :  { %v1808_v56 = vsel %vm91_vm0, %v1795_v57, 0.0 }
 0xd9c   :  { %1809 = vadd.xlane.f32.xlu0 %v1808_v56 }
 0xd9e   :  { %v1867_v34 = vpop.permute.xlu0 %1866 }
 0xd9f   :  { %v1880_v49 = vsel %vm91_vm0, %v1867_v34, 0.0 }
 0xda0   :  { %1881 = vadd.xlane.f32.xlu1 %v1880_v49 }
 0xda2   :  { %v1939_v3 = vpop.permute.xlu0 %1938 }
 0xda3   :  { %v1952_v10 = vsel %vm91_vm0, %v1939_v3, 0.0 }
 0xda4   :  { %1953 = vadd.xlane.f32.xlu1 %v1952_v10 }
 0xda6   :  { %v2041_v63 = vpop.permute.xlu0 %2040 }
 0xda7   :  { %2976 = vmatprep.subr.mxu0 %v2041_v63 }
 0xda8   :  { %2977 = vmatpush3.msra.mxu0 %v2041_v63 }
 0xda9   :  { %2978 = vmatprep.subr.mxu0 %v2039_v36 }
 0xdaa   :  { %v2037_v14 = vpop.permute.xlu0 %2036  ;;  %2979 = vmatpush3.msra.mxu0 %v2039_v36 }
 0xdab   :  { %2980 = vmatprep.subr.mxu0 %v2037_v14 }
 0xdac   :  { %2981 = vmatpush3.msra.mxu0 %v2037_v14 }
 0xdad   :  { %2982 = vmatprep.subr.mxu0 %v2035_v20 }
 0xdae   :  { %v2033_v21 = vpop.permute.xlu0 %2032  ;;  %2983 = vmatpush3.msra.mxu0 %v2035_v20 }
 0xdaf   :  { %2984 = vmatprep.subr.mxu0 %v2033_v21 }
 0xdb0   :  { %2985 = vmatpush3.msra.mxu0 %v2033_v21 }
 0xdb1   :  { %2986 = vmatprep.subr.mxu0 %v2031_v17 }
 0xdb2   :  { %v2029_v25 = vpop.permute.xlu0 %2028  ;;  %2024 = vrot.lane.b32.xlu0 %v1991_v31, %s3313_s17  ;;  %2987 = vmatpush3.msra.mxu0 %v2031_v17 }
 0xdb3   :  { %2988 = vmatprep.subr.mxu0 %v2029_v25 }
 0xdb4   :  { %2989 = vmatpush3.msra.mxu0 %v2029_v25 }
 0xdb5   :  { %2022 = vrot.lane.b32.xlu1 %v1990_v33, %s3313_s17  ;;  %2990 = vmatprep.subr.mxu0 %v2027_v7 }
 0xdb6   :  { %2991 = vmatpush3.msra.mxu0 %v2027_v7 }
 0xdc7   :  { %v4105_v51 = vpop.xlane.xlu1 %1737 }
 0xdcb   :  { %v1804_v40 = vpop.xlane.xlu1 %1803 }
 0xdcc   :  { %3166 = vrcp.f32 %v1804_v40 }
 0xdcf   :  { %v1876_v15 = vpop.xlane.xlu1 %1875 }
 0xdd0   :  { %3168 = vrcp.f32 %v1876_v15 }
 0xdd1   :  { %3170 = vrcp.f32 %v1732_v32 }
 0xdd9   :  { %v3167_v13 = vpop.eup %3166 }
 0xdda   :  { %v1818_v55 = vmul.f32 %v3167_v13, %v1804_v40 }
 0xddc   :  { %v1822_v22 = vsub.f32 2.0, %v1818_v55 }
 0xddd   :  { %v3169_v27 = vpop.eup %3168 }
 0xdde   :  { %v3171_v37 = vpop.eup %3170  ;;  %v1890_v26 = vmul.f32 %v3169_v27, %v1876_v15  ;;  %v1826_v11 = vmul.f32 %v3167_v13, %v1822_v22 }
 0xddf   :  { %v1746_v52 = vmul.f32 %v3171_v37, %v1732_v32 }
 0xde0   :  { %v1894_v45 = vsub.f32 2.0, %v1890_v26  ;;  %v1830_v49 = vmul.f32 %v3994_v48, %v1826_v11 }
 0xde1   :  { %v1750_v8 = vsub.f32 2.0, %v1746_v52 }
 0xde2   :  { %v1898_v57 = vmul.f32 %v3169_v27, %v1894_v45 }
 0xde3   :  { %v1754_v56 = vmul.f32 %v3171_v37, %v1750_v8  ;;  %v1807_v20 = vpop.xlane.xlu0 %1806 }
 0xde4   :  { %v1902_v3 = vmul.f32 %v3998_v6, %v1898_v57 }
 0xde5   :  { %v1758_v10 = vmul.f32 %v4029_v43, %v1754_v56 }
 0xde7   :  { %v1978_v32 = vsel %vm91_vm0, %v1758_v10, %v1830_v49  ;;  %v1879_v31 = vpop.xlane.xlu0 %1878 }
 0xde8   :  { %v1982_v17 = vsel %vm281_vm2, %v1978_v32, %v1902_v3 }
 0xdeb   :  { %v1951_v48 = vpop.xlane.xlu0 %1950 }
 0xdef   :  { %v1813_v6 = vpop.xlane.xlu0 %1812 }
 0xdf0   :  { %v1948_v12 = vpop.xlane.xlu1 %1947 }
 0xdf1   :  { %3172 = vrcp.f32 %v1948_v12 }
 0xdf2   :  { %3174 = vrcp.f32 %v4082_v28 }
 0xdf3   :  { %3176 = vrcp.f32 %v1807_v20  ;;  %v1885_v7 = vpop.xlane.xlu0 %1884 }
 0xdf4   :  { %3178 = vrcp.f32 %v1879_v31  ;;  %v1957_v40 = vpop.xlane.xlu1 %1956 }
 0xdf5   :  { %3180 = vrcp.f32 %v1951_v48 }
 0xdf6   :  { %3182 = vrcp.f32 %v1813_v6 }
 0xdf7   :  { %3184 = vrcp.f32 %v1885_v7 }
 0xdf8   :  { %3186 = vrcp.f32 %v4089_v61 }
 0xdf9   :  { %3188 = vrcp.f32 %v4105_v51 }
 0xdfa   :  { %3190 = vrcp.f32 %v1957_v40 }
 0xdfe   :  { %v3173_v58 = vpop.eup %3172 }
 0xdff   :  { %v1962_v34 = vmul.f32 %v3173_v58, %v1948_v12  ;;  %v3175_v43 = vpop.eup %3174 }
 0xe00   :  { %v3177_v25 = vpop.eup %3176  ;;  %v1747_v15 = vmul.f32 %v3175_v43, %v4082_v28 }
 0xe01   :  { %v1966_v36 = vsub.f32 2.0, %v1962_v34  ;;  %v3179_v33 = vpop.eup %3178  ;;  %v1819_v35 = vmul.f32 %v3177_v25, %v1807_v20 }
 0xe02   :  { %v1891_v39 = vmul.f32 %v3179_v33, %v1879_v31  ;;  %v1751_v55 = vsub.f32 2.0, %v1747_v15 }
 0xe03   :  { %v1970_v63 = vmul.f32 %v3173_v58, %v1966_v36  ;;  %v1823_v13 = vsub.f32 2.0, %v1819_v35 }
 0xe04   :  { %v1895_v37 = vsub.f32 2.0, %v1891_v39  ;;  %v1755_v11 = vmul.f32 %v3175_v43, %v1751_v55 }
 0xe05   :  { %v1974_v14 = vmul.f32 %v4020_v53, %v1970_v63  ;;  %v3181_v53 = vpop.eup %3180  ;;  %v1827_v52 = vmul.f32 %v3177_v25, %v1823_v13 }
 0xe06   :  { %v1963_v12 = vmul.f32 %v3181_v53, %v1951_v48  ;;  %v1899_v8 = vmul.f32 %v3179_v33, %v1895_v37  ;;  %v3183_v56 = vpop.eup %3182  ;;  %v1759_v36 = vmul.f32 %v4008_v4, %v1755_v11 }
 0xe07   :  { %v1986_v21 = vsel %vm286_vm1, %v1982_v17, %v1974_v14  ;;  %v1831_v58 = vmul.f32 %v3978_v30, %v1827_v52  ;;  %v3185_v49 = vpop.eup %3184  ;;  %v1821_v20 = vmul.f32 %v3183_v56, %v1813_v6 }
 0xe08   :  { %2996 = vmatprep.mubr.f32.mxu0 %v1986_v21  ;;  %v1967_v26 = vsub.f32 2.0, %v1963_v12  ;;  %v1903_v34 = vmul.f32 %v3982_v29, %v1899_v8  ;;  %v3187_v10 = vpop.eup %3186  ;;  %v1893_v21 = vmul.f32 %v3185_v49, %v1885_v7 }
 0xe09   :  { %v3189_v63 = vpop.eup %3188  ;;  %v1979_v32 = vsel %vm91_vm0, %v1759_v36, %v1831_v58  ;;  %v1749_v29 = vmul.f32 %v3187_v10, %v4089_v61  ;;  %v1825_v43 = vsub.f32 2.0, %v1821_v20  ;;  %v2663_v20 = vld [vmem:[%s4250_s1 + $0xb8] sm:$0xff] }
 0xe0a   :  { %v1971_v28 = vmul.f32 %v3181_v53, %v1967_v26  ;;  %v3191_v17 = vpop.eup %3190  ;;  %v1983_v30 = vsel %vm281_vm2, %v1979_v32, %v1903_v34  ;;  %v1748_v4 = vmul.f32 %v3189_v63, %v4105_v51  ;;  %v1897_v25 = vsub.f32 2.0, %v1893_v21  ;;  %v2657_v32 = vld [vmem:[%s4250_s1 + $0x88] sm:$0xff]  ;;  %v4166_v21 = vld [vmem:[%s4251_s2 + $0x78] sm:$0xff] }
 0xe0b   :  { %v1965_v6 = vmul.f32 %v3191_v17, %v1957_v40  ;;  %v1753_v35 = vsub.f32 2.0, %v1749_v29  ;;  %v1829_v15 = vmul.f32 %v3183_v56, %v1825_v43 }
 0xe0c   :  { %v1975_v3 = vmul.f32 %v3988_v5, %v1971_v28  ;;  %v1752_v7 = vsub.f32 2.0, %v1748_v4  ;;  %v1901_v13 = vmul.f32 %v3185_v49, %v1897_v25 }
 0xe0d   :  { %v1969_v12 = vsub.f32 2.0, %v1965_v6  ;;  %v1757_v26 = vmul.f32 %v3187_v10, %v1753_v35 }
 0xe0e   :  { %v1987_v48 = vsel %vm286_vm1, %v1983_v30, %v1975_v3  ;;  %v1756_v52 = vmul.f32 %v3189_v63, %v1752_v7  ;;  %v1905_v40 = vmul.f32 %v4006_v44, %v1901_v13  ;;  %v2158_v30 = vrot.slane %v3862_v47, %v930_v2 }
 0xe0f   :  { %v1973_v8 = vmul.f32 %v3191_v17, %v1969_v12  ;;  %v2654_v17 = vld [vmem:[%s4250_s1 + $0x70] sm:$0xff] }
 0xe10   :  { %v1760_v56 = vmul.f32 %v4070_v16, %v1756_v52 }
 0xe11   :  { %v1977_v49 = vmul.f32 %v4012_v42, %v1973_v8  ;;  %v2656_v42 = vld [vmem:[%s4250_s1 + $0x80] sm:$0xff] }
 0xe12   :  { %3006 = vmatprep.subr.mxu1 %v2656_v42 }
 0xe13   :  { %3007 = vmatpush3.msra.mxu1 %v2656_v42 }
 0xe25   :  { %v1810_v27 = vpop.xlane.xlu0 %1809 }
 0xe26   :  { %3192 = vrcp.f32 %v1810_v27 }
 0xe29   :  { %v2025_v22 = vpop.permute.xlu0 %2024  ;;  %v1882_v45 = vpop.xlane.xlu1 %1881 }
 0xe2a   :  { %3194 = vrcp.f32 %v1882_v45  ;;  %2992 = vmatprep.subr.mxu0 %v2025_v22 }
 0xe2b   :  { %2993 = vmatpush3.msra.mxu0 %v2025_v22 }
 0xe2d   :  { %v1954_v57 = vpop.xlane.xlu1 %1953 }
 0xe2e   :  { %3196 = vrcp.f32 %v1954_v57 }
 0xe31   :  { %v2023_v14 = vpop.permute.xlu1 %2022 }
 0xe32   :  { %2994 = vmatprep.subr.mxu0 %v2023_v14 }
 0xe33   :  { %v3193_v31 = vpop.eup %3192  ;;  %2995 = vmatpush3.msra.mxu0 %v2023_v14  ;;  %v2660_v14 = vld [vmem:[%s4250_s1 + $0xa0] sm:$0xff] }
 0xe34   :  { %v1820_v5 = vmul.f32 %v3193_v31, %v1810_v27  ;;  %2997 = vmatmul.mubr.f32.vlgmr.msra.gmra.mxu0 %v1987_v48  ;;  %v1833_v27 = vmul.f32 %v4002_v0, %v1829_v15 }
 0xe36   :  { %v1824_v33 = vsub.f32 2.0, %v1820_v5 }
 0xe37   :  { %v3195_v53 = vpop.eup %3194 }
 0xe38   :  { %v1892_v39 = vmul.f32 %v3195_v53, %v1882_v45  ;;  %v1828_v37 = vmul.f32 %v3193_v31, %v1824_v33  ;;  %v1761_v45 = vmul.f32 %v4025_v60, %v1757_v26 }
 0xe3a   :  { %v1896_v61 = vsub.f32 2.0, %v1892_v39  ;;  %v1832_v11 = vmul.f32 %v4048_v41, %v1828_v37  ;;  %v1981_v36 = vsel %vm91_vm0, %v1761_v45, %v1833_v27 }
 0xe3b   :  { %v3197_v55 = vpop.eup %3196  ;;  %v1985_v44 = vsel %vm281_vm2, %v1981_v36, %v1905_v40 }
 0xe3c   :  { %v1900_v22 = vmul.f32 %v3195_v53, %v1896_v61  ;;  %v1964_v51 = vmul.f32 %v3197_v55, %v1954_v57  ;;  %v1980_v0 = vsel %vm91_vm0, %v1760_v56, %v1832_v11  ;;  %v1989_v60 = vsel %vm286_vm1, %v1985_v44, %v1977_v49 }
 0xe3e   :  { %v1968_v28 = vsub.f32 2.0, %v1964_v51  ;;  %v1904_v58 = vmul.f32 %v4053_v50, %v1900_v22  ;;  %v2653_v50 = vld [vmem:[%s4250_s1 + $0x68] sm:$0xff] }
 0xe3f   :  { %3008 = vmatprep.subr.mxu1 %v2653_v50 }
 0xe40   :  { %v1972_v34 = vmul.f32 %v3197_v55, %v1968_v28  ;;  %v1984_v41 = vsel %vm281_vm2, %v1980_v0, %v1904_v58  ;;  %3009 = vmatpush3.msra.mxu1 %v2653_v50 }
 0xe41   :  { %3016 = vmatprep.subr.mxu1 %v2663_v20 }
 0xe42   :  { %v1976_v57 = vmul.f32 %v4057_v38, %v1972_v34 }
 0xe44   :  { %v1988_v3 = vsel %vm286_vm1, %v1984_v41, %v1976_v57 }
 0xe45   :  { %2999 = vmatprep.mubr.f32.mxu0 %v1988_v3 }
 0xe46   :  { %3000 = vmatmul.mubr.f32.gmra.mxu0 %v1989_v60 }
 0xef4   :  { %v2998_v38 = vpop.f32.mrf.mxu0 }
 0xef6   :  { %v2136_v16 = vpop.f32.mrf.mxu0 }
 0xef7   :  { %3010 = vmatprep.mubr.msk.f32.mxu1 %vm91_vm0, %v2136_v16 }
 0xef8   :  { %3011 = vmatmul.mubr.msk.f32.vlgmr.msra.gmra.mxu1 %vm91_vm0, %v2998_v38 }
 0xef9   :  { %3017 = vmatpush3.msra.mxu1 %v2663_v20 }
 0xefa   :  { %3018 = vmatprep.subr.mxu1 %v2660_v14 }
 0xefb   :  { %3019 = vmatpush3.msra.mxu1 %v2660_v14 }
 0xefc   :  { %3020 = vmatprep.subr.mxu1 %v2657_v32 }
 0xefd   :  { %3021 = vmatpush3.msra.mxu1 %v2657_v32 }
 0xefe   :  { %3022 = vmatprep.subr.mxu1 %v2654_v17 }
 0xeff   :  { %3023 = vmatpush3.msra.mxu1 %v2654_v17 }
 0xf00   :  { %3030 = vmatprep.subr.mxu1 %v4166_v21 }
 0xf06   :  { %v3001_v10 = vpop.f32.mrf.mxu0 }
 0xf08   :  { %v2146_v63 = vpop.f32.mrf.mxu0 }
 0xf09   :  { %3013 = vmatprep.mubr.msk.f32.mxu1 %vm91_vm0, %v2146_v63 }
 0xf0a   :  { %3014 = vmatmul.mubr.msk.f32.gmra.mxu1 %vm91_vm0, %v3001_v10 }
 0xfb8   :  { %v3012_v31 = vpop.f32.mrf.mxu1 }
 0xfb9   :  { %v2243_v29 = vadd.f32 %v3012_v31, %v2158_v30 }
 0xfba   :  { %v2237_v48 = vpop.f32.mrf.mxu1 }
 0xfbb   :  { %v2257_v4 = vadd.f32 %v2243_v29, %v3846_v18  ;;  %v2238_v5 = vadd.f32 %v2237_v48, %v2158_v30  ;;  %v4184_v48 = vld [vmem:[#allocation5 + $0x8] sm:$0xff] }
 0xfbd   :  { %v2256_v43 = vadd.f32 %v2238_v5, %v3848_v19  ;;  %v2261_v6 = vsel %vm91_vm0, %v2257_v4, 0.0 }
 0xfbf   :  { %v2260_v25 = vsel %vm91_vm0, %v2256_v43, 0.0 }
 0xfc0   :  { %v2262_v33 = vadd.f32 %v2261_v6, %v2260_v25 }
 0xfc2   :  { %v2263_v53 = vrot.slane %v2262_v33, 4 }
 0xfc4   :  { %v2264_v35 = vadd.f32 %v2263_v53, %v2262_v33  ;;  %v2327_v33 = vrot.slane %v4184_v48, %v1100_v24  ;;  %v2669_v24 = vld [vmem:[%s4251_s2 + $0x68] sm:$0xff] }
 0xfc6   :  { %v2265_v7 = vrot.slane %v2264_v35, 2 }
 0xfc8   :  { %v2266_v39 = vadd.f32 %v2265_v7, %v2264_v35 }
 0xfca   :  { %v2267_v15 = vrot.slane %v2266_v39, 1  ;;  %v3015_v12 = vpop.f32.mrf.mxu1 }
 0xfcb   :  { %v2253_v2 = vadd.f32 %v3015_v12, %v2158_v30 }
 0xfcc   :  { %v2268_v47 = vadd.f32 %v2267_v15, %v2266_v39  ;;  %v2247_v13 = vpop.f32.mrf.mxu1 }
 0xfcd   :  { %v2259_v37 = vadd.f32 %v2253_v2, %v3856_v59  ;;  %v2248_v18 = vadd.f32 %v2247_v13, %v2158_v30  ;;  %v2668_v2 = vld [vmem:[%s4251_s2 + $0x60] sm:$0xff] }
 0xfce   :  { %v2269_v61 = vmul.f32 0.0625, %v2268_v47 }
 0xfcf   :  { %v2258_v19 = vadd.f32 %v2248_v18, %v3854_v46  ;;  %v2289_v52 = vsel %vm91_vm0, %v2259_v37, 0.0 }
 0xfd0   :  { %v2270_v55 = vsub.f32 %v2256_v43, %v2269_v61  ;;  %v2271_v26 = vsub.f32 %v2257_v4, %v2269_v61  ;;  %v2319_v4 = vrot.slane %v4184_v48, %v1092_v62  ;;  %v2670_v62 = vld [vmem:[%s4251_s2 + $0x70] sm:$0xff] }
 0xfd1   :  { %v2288_v22 = vsel %vm91_vm0, %v2258_v19, 0.0 }
 0xfd2   :  { %v2272_v51 = vmul.f32 %v2270_v55, %v2270_v55  ;;  %v2273_v27 = vmul.f32 %v2271_v26, %v2271_v26  ;;  %v2290_v8 = vadd.f32 %v2289_v52, %v2288_v22  ;;  %v2665_v52 = vld [vmem:[%s4251_s2 + $0x48] sm:$0xff]  ;;  %v2664_v22 = vld [vmem:[%s4251_s2 + $0x40] sm:$0xff] }
 0xfd4   :  { %v2274_v40 = vsel %vm91_vm0, %v2272_v51, 0.0  ;;  %v2275_v11 = vsel %vm91_vm0, %v2273_v27, 0.0  ;;  %v2291_v28 = vrot.slane %v2290_v8, 4  ;;  %v2335_v51 = vrot.slane %v4184_v48, %v1108_v23 }
 0xfd5   :  { %v2276_v45 = vadd.f32 %v2275_v11, %v2274_v40 }
 0xfd6   :  { %v2292_v59 = vadd.f32 %v2291_v28, %v2290_v8 }
 0xfd7   :  { %v2277_v58 = vrot.slane %v2276_v45, 4 }
 0xfd8   :  { %v2293_v56 = vrot.slane %v2292_v59, 2 }
 0xfd9   :  { %v2278_v34 = vadd.f32 %v2277_v58, %v2276_v45 }
 0xfda   :  { %v2294_v46 = vadd.f32 %v2293_v56, %v2292_v59 }
 0xfdb   :  { %v2279_v49 = vrot.slane %v2278_v34, 2 }
 0xfdc   :  { %v2295_v36 = vrot.slane %v2294_v46, 1 }
 0xfdd   :  { %v2280_v57 = vadd.f32 %v2279_v49, %v2278_v34 }
 0xfde   :  { %v2296_v0 = vadd.f32 %v2295_v36, %v2294_v46 }
 0xfdf   :  { %v2281_v44 = vrot.slane %v2280_v57, 1 }
 0xfe0   :  { %v2297_v41 = vmul.f32 0.0625, %v2296_v0 }
 0xfe1   :  { %v2282_v3 = vadd.f32 %v2281_v44, %v2280_v57 }
 0xfe2   :  { %v2298_v60 = vsub.f32 %v2258_v19, %v2297_v41  ;;  %v2299_v42 = vsub.f32 %v2259_v37, %v2297_v41 }
 0xfe3   :  { %v2283_v50 = vmul.f32 0.0625, %v2282_v3 }
 0xfe4   :  { %v2300_v38 = vmul.f32 %v2298_v60, %v2298_v60  ;;  %v2301_v16 = vmul.f32 %v2299_v42, %v2299_v42 }
 0xfe5   :  { %v2284_v10 = vadd.f32 1e-05, %v2283_v50 }
 0xfe6   :  { %v2302_v63 = vsel %vm91_vm0, %v2300_v38, 0.0  ;;  %v2303_v20 = vsel %vm91_vm0, %v2301_v16, 0.0 }
 0xfe7   :  { %3198 = vrsqrt.f32 %v2284_v10  ;;  %v2304_v14 = vadd.f32 %v2303_v20, %v2302_v63 }
 0xfe9   :  { %v2305_v32 = vrot.slane %v2304_v14, 4 }
 0xfeb   :  { %v2306_v17 = vadd.f32 %v2305_v32, %v2304_v14 }
 0xfed   :  { %v2307_v30 = vrot.slane %v2306_v17, 2 }
 0xfef   :  { %v2308_v31 = vadd.f32 %v2307_v30, %v2306_v17 }
 0xff1   :  { %v2309_v29 = vrot.slane %v2308_v31, 1 }
 0xff3   :  { %v2310_v5 = vadd.f32 %v2309_v29, %v2308_v31 }
 0xff4   :  { %v3199_v43 = vpop.eup %3198 }
 0xff5   :  { %v2286_v6 = vmul.f32 %v3199_v43, %v2270_v55  ;;  %v2287_v25 = vmul.f32 %v3199_v43, %v2271_v26  ;;  %v2311_v53 = vmul.f32 0.0625, %v2310_v5  ;;  %v2667_v55 = vld [vmem:[%s4251_s2 + $0x58] sm:$0xff]  ;;  %v2666_v26 = vld [vmem:[%s4251_s2 + $0x50] sm:$0xff]  ;;  %s3314_s2 = smov [#allocation8]  }
 0xff6   :  { %s2619_s12 = sshll.u32 %s3314_s2, 4  ;;  %s2620_s12 = int_to_ptr.vmem [resolvable:$true] %s2619_s12 }
 0xff7   :  { %v2320_v35 = vmul.f32 %v2319_v4, %v2286_v6  ;;  %v2321_v7 = vmul.f32 %v2319_v4, %v2287_v25  ;;  %v2312_v39 = vadd.f32 1e-05, %v2311_v53  ;;  %s3280_s13 = scalar_lea.vmem %s2620_s12, 512  ;;  %p3285_p2 = scmp.lt.s32.totalorder %s2620_s12, %s2620_s12 }
 0xff8   :  { %p3281_p1 = scmp.ne.s32.totalorder %s2620_s12, %s3280_s13  ;;  %p3286_p3 = scmp.lt.s32.totalorder %s3280_s13, %s3280_s13 }
 0xff9   :  { %v2329_v15 = vadd.f32 %v2327_v33, %v2321_v7  ;;  %3200 = vrsqrt.f32 %v2312_v39  ;;  %v2328_v12 = vadd.f32 %v2327_v33, %v2320_v35 }
 0xffa   :  { %p3287_p4 = por %p3286_p3, %p3285_p2 }
 0xffb   :  { %3024 = vmatprep.mubr.msk.f32.mxu1 %vm91_vm0, %v2328_v12 }
 0xffc   :  { %3025 = vmatmul.mubr.msk.f32.vlgmr.msra.gmra.mxu1 %vm91_vm0, %v2329_v15  ;;  %p3288_p5 = pnand %p3287_p4, %p3281_p1 }
 0xffd   :  { %3031 = vmatpush3.msra.mxu1 %v4166_v21 }
 0xffe   :  { %3032 = vmatprep.subr.mxu1 %v2670_v62 }
 0xfff   :  { %3033 = vmatpush3.msra.mxu1 %v2670_v62 }
0x1000   :  { %3034 = vmatprep.subr.mxu1 %v2669_v24 }
0x1001   :  { %3035 = vmatpush3.msra.mxu1 %v2669_v24 }
0x1002   :  { %3036 = vmatprep.subr.mxu1 %v2668_v2 }
0x1003   :  { %3037 = vmatpush3.msra.mxu1 %v2668_v2 }
0x1004   :  { %3038 = vmatprep.subr.mxu1 %v2667_v55 }
0x1005   :  { %3039 = vmatpush3.msra.mxu1 %v2667_v55 }
0x1006   :  { %v3201_v47 = vpop.eup %3200  ;;  %3040 = vmatprep.subr.mxu1 %v2666_v26 }
0x1007   :  { %v2314_v13 = vmul.f32 %v3201_v47, %v2298_v60  ;;  %v2315_v37 = vmul.f32 %v3201_v47, %v2299_v42  ;;  %3041 = vmatpush3.msra.mxu1 %v2666_v26 }
0x1008   :  { %3042 = vmatprep.subr.mxu1 %v2665_v52 }
0x1009   :  { %v2322_v18 = vmul.f32 %v2319_v4, %v2314_v13  ;;  %v2323_v61 = vmul.f32 %v2319_v4, %v2315_v37  ;;  %3043 = vmatpush3.msra.mxu1 %v2665_v52 }
0x100a   :  { %3044 = vmatprep.subr.mxu1 %v2664_v22 }
0x100b   :  { %v2330_v21 = vadd.f32 %v2327_v33, %v2322_v18  ;;  %v2331_v19 = vadd.f32 %v2327_v33, %v2323_v61  ;;  %3045 = vmatpush3.msra.mxu1 %v2664_v22 }
0x100d   :  { %3027 = vmatprep.mubr.msk.f32.mxu1 %vm91_vm0, %v2330_v21 }
0x100e   :  { %3028 = vmatmul.mubr.msk.f32.gmra.mxu1 %vm91_vm0, %v2331_v19 }
0x10bc   :  { %v3026_v27 = vpop.f32.mrf.mxu1 }
0x10bd   :  { %v2420_v8 = vadd.f32 %v3026_v27, %v2335_v51 }
0x10be   :  { %v2414_v40 = vpop.f32.mrf.mxu1 }
0x10bf   :  { %v2415_v11 = vadd.f32 %v2414_v40, %v2335_v51  ;;  %v2434_v45 = vmax.f32 %v2420_v8, 0.0 }
0x10c1   :  { %v2433_v28 = vmax.f32 %v2415_v11, 0.0 }
0x10c3   :  { %3046 = vmatprep.mubr.msk.f32.mxu1 %vm281_vm2, %v2433_v28 }
0x10c4   :  { %3047 = vmatmul.mubr.msk.f32.vlgmr.msra.gmra.mxu1 %vm281_vm2, %v2434_v45 }
0x10ce   :  { %v3029_v59 = vpop.f32.mrf.mxu1 }
0x10cf   :  { %v2430_v58 = vadd.f32 %v3029_v59, %v2335_v51 }
0x10d0   :  { %v2424_v56 = vpop.f32.mrf.mxu1 }
0x10d1   :  { %v2425_v34 = vadd.f32 %v2424_v56, %v2335_v51  ;;  %v2436_v49 = vmax.f32 %v2430_v58, 0.0  ;;  %v2597_v58 = vrot.slane %v4184_v48, %v1370_v54 }
0x10d3   :  { %v2435_v46 = vmax.f32 %v2425_v34, 0.0 }
0x10d5   :  { %3049 = vmatprep.mubr.msk.f32.mxu1 %vm281_vm2, %v2435_v46 }
0x10d6   :  { %3050 = vmatmul.mubr.msk.f32.gmra.mxu1 %vm281_vm2, %v2436_v49 }
0x1184   :  { %v3048_v23 = vpop.f32.mrf.mxu1 }
0x1185   :  { %v2535_v36 = vadd.f32 %v3048_v23, %v2329_v15  ;;  %v2605_v23 = vrot.slane %v4184_v48, %v1378_v1 }
0x1186   :  { %v2515_v57 = vpop.f32.mrf.mxu1 }
0x1187   :  { %v2534_v0 = vadd.f32 %v2515_v57, %v2328_v12  ;;  %v2539_v44 = vsel %vm91_vm0, %v2535_v36, 0.0 }
0x1189   :  { %v2538_v41 = vsel %vm91_vm0, %v2534_v0, 0.0 }
0x118a   :  { %v2540_v3 = vadd.f32 %v2539_v44, %v2538_v41 }
0x118c   :  { %v2541_v60 = vrot.slane %v2540_v3, 4 }
0x118e   :  { %v2542_v42 = vadd.f32 %v2541_v60, %v2540_v3 }
0x1190   :  { %v2543_v50 = vrot.slane %v2542_v42, 2 }
0x1192   :  { %v2544_v38 = vadd.f32 %v2543_v50, %v2542_v42 }
0x1194   :  { %v2545_v16 = vrot.slane %v2544_v38, 1 }
0x1196   :  { %v2546_v10 = vadd.f32 %v2545_v16, %v2544_v38  ;;  %v3051_v63 = vpop.f32.mrf.mxu1 }
0x1197   :  { %v2537_v20 = vadd.f32 %v3051_v63, %v2331_v19 }
0x1198   :  { %v2547_v14 = vmul.f32 0.0625, %v2546_v10  ;;  %v2525_v32 = vpop.f32.mrf.mxu1 }
0x1199   :  { %v2536_v17 = vadd.f32 %v2525_v32, %v2330_v21  ;;  %v2567_v29 = vsel %vm91_vm0, %v2537_v20, 0.0 }
0x119a   :  { %v2548_v30 = vsub.f32 %v2534_v0, %v2547_v14  ;;  %v2549_v31 = vsub.f32 %v2535_v36, %v2547_v14 }
0x119b   :  { %v2566_v4 = vsel %vm91_vm0, %v2536_v17, 0.0 }
0x119c   :  { %v2550_v5 = vmul.f32 %v2548_v30, %v2548_v30  ;;  %v2551_v43 = vmul.f32 %v2549_v31, %v2549_v31  ;;  %v2568_v6 = vadd.f32 %v2567_v29, %v2566_v4 }
0x119e   :  { %v2552_v25 = vsel %vm91_vm0, %v2550_v5, 0.0  ;;  %v2553_v33 = vsel %vm91_vm0, %v2551_v43, 0.0  ;;  %v2569_v53 = vrot.slane %v2568_v6, 4 }
0x119f   :  { %v2554_v35 = vadd.f32 %v2553_v33, %v2552_v25 }
0x11a0   :  { %v2570_v7 = vadd.f32 %v2569_v53, %v2568_v6 }
0x11a1   :  { %v2555_v39 = vrot.slane %v2554_v35, 4 }
0x11a2   :  { %v2571_v15 = vrot.slane %v2570_v7, 2 }
0x11a3   :  { %v2556_v12 = vadd.f32 %v2555_v39, %v2554_v35 }
0x11a4   :  { %v2572_v62 = vadd.f32 %v2571_v15, %v2570_v7 }
0x11a5   :  { %v2557_v24 = vrot.slane %v2556_v12, 2 }
0x11a6   :  { %v2573_v2 = vrot.slane %v2572_v62, 1 }
0x11a7   :  { %v2558_v47 = vadd.f32 %v2557_v24, %v2556_v12 }
0x11a8   :  { %v2574_v13 = vadd.f32 %v2573_v2, %v2572_v62 }
0x11a9   :  { %v2559_v37 = vrot.slane %v2558_v47, 1 }
0x11aa   :  { %v2575_v18 = vmul.f32 0.0625, %v2574_v13 }
0x11ab   :  { %v2560_v61 = vadd.f32 %v2559_v37, %v2558_v47 }
0x11ac   :  { %v2576_v21 = vsub.f32 %v2536_v17, %v2575_v18  ;;  %v2577_v19 = vsub.f32 %v2537_v20, %v2575_v18 }
0x11ad   :  { %v2561_v55 = vmul.f32 0.0625, %v2560_v61 }
0x11ae   :  { %v2578_v26 = vmul.f32 %v2576_v21, %v2576_v21  ;;  %v2579_v52 = vmul.f32 %v2577_v19, %v2577_v19 }
0x11af   :  { %v2562_v22 = vadd.f32 1e-05, %v2561_v55 }
0x11b0   :  { %v2580_v51 = vsel %vm91_vm0, %v2578_v26, 0.0  ;;  %v2581_v27 = vsel %vm91_vm0, %v2579_v52, 0.0 }
0x11b1   :  { %3202 = vrsqrt.f32 %v2562_v22  ;;  %v2582_v8 = vadd.f32 %v2581_v27, %v2580_v51 }
0x11b3   :  { %v2583_v40 = vrot.slane %v2582_v8, 4 }
0x11b5   :  { %v2584_v11 = vadd.f32 %v2583_v40, %v2582_v8 }
0x11b7   :  { %v2585_v28 = vrot.slane %v2584_v11, 2 }
0x11b9   :  { %v2586_v45 = vadd.f32 %v2585_v28, %v2584_v11 }
0x11bb   :  { %v2587_v59 = vrot.slane %v2586_v45, 1 }
0x11bd   :  { %v2588_v56 = vadd.f32 %v2587_v59, %v2586_v45 }
0x11be   :  { %v3203_v34 = vpop.eup %3202 }
0x11bf   :  { %v2564_v46 = vmul.f32 %v3203_v34, %v2548_v30  ;;  %v2565_v49 = vmul.f32 %v3203_v34, %v2549_v31  ;;  %v2589_v36 = vmul.f32 0.0625, %v2588_v56 }
0x11c1   :  { %v2598_v57 = vmul.f32 %v2597_v58, %v2564_v46  ;;  %v2599_v0 = vmul.f32 %v2597_v58, %v2565_v49  ;;  %v2590_v44 = vadd.f32 1e-05, %v2589_v36 }
0x11c3   :  { %v2606_v41 = vadd.f32 %v2605_v23, %v2598_v57  ;;  %v2607_v3 = vadd.f32 %v2605_v23, %v2599_v0  ;;  %3204 = vrsqrt.f32 %v2590_v44 }
0x11c5   :  { %2610 = vst.msk [vmem:[#allocation8] sm:$0xff] %vm91_vm0, %v2606_v41  ;;  %2611 = vst.msk [vmem:[#allocation8 + $0x8] sm:$0xff] %vm91_vm0, %v2607_v3 }
0x11d0   :  { %v3205_v54 = vpop.eup %3204 }
0x11d1   :  { %v2592_v60 = vmul.f32 %v3205_v54, %v2576_v21  ;;  %v2593_v42 = vmul.f32 %v3205_v54, %v2577_v19 }
0x11d3   :  { %v2600_v50 = vmul.f32 %v2597_v58, %v2592_v60  ;;  %v2601_v9 = vmul.f32 %v2597_v58, %v2593_v42 }
0x11d5   :  { %v2608_v38 = vadd.f32 %v2605_v23, %v2600_v50  ;;  %v2609_v1 = vadd.f32 %v2605_v23, %v2601_v9 }
0x11d7   :  { %2612 = vst.msk [vmem:[#allocation8 + $0x10] sm:$0xff] %vm91_vm0, %v2608_v38  ;;  %2613 = vst.msk [vmem:[#allocation8 + $0x18] sm:$0xff] %vm91_vm0, %v2609_v1 }
0x11d8   :  { %3291 = shalt.err (!%p3288_p5)
}
0x11d9   :  { %2625 = dma.vmem_to_hbm [thread:$0]  %s2620_s12, 512, %s4254_s5, [#allocation4], %s3308_s23, %s3308_s23, %s3309_s24  }
0x11da   :  { %3304 = dma.done.wait [#allocation4], 512  }
0x11db   :  { %3305 = vsyncadd [#allocation4], 4294966784 }
0x11dc   :  { %2629 = vsyncpa [#allocation3], 1 }
0x11dd   :  { %2630 = vsyncpa [#allocation6], 1 }
0x11de   :  { %2631 = vsyncpa [#allocation4], 1 }

</bundles_post_ra>
